<compile_context>
chip_gen: v6e
topology: v6e:2x2x1
jax: 0.10.0
libtpu: 0.0.40
codegen_flags: <defaults>
</compile_context>

<pallas_src>
import functools

import jax
import jax.numpy as jnp
from jax.experimental import pallas as pl
from jax.experimental.pallas import tpu as pltpu


def _round_up(x, m):
    return ((x + m - 1) // m) * m


def _largest_divisor_tile(dim, cap, unit=128):
    """Largest multiple of `unit` <= cap that divides `dim` (dim % unit == 0)."""
    t = min(cap, dim)
    t -= t % unit
    t = max(t, unit)
    while dim % t:
        t -= unit
    return t


# --------------------- Buffered(1) support probe (single-buffer invariant operands) ---------------------
@functools.lru_cache(maxsize=None)
def _invariant_spec_kwargs():
    """Returns {'pipeline_mode': pl.Buffered(1)} if single-buffering is supported, else {}."""
    try:
        kwargs = {"pipeline_mode": pl.Buffered(1)}

        def _probe_kernel(a_ref, w_ref, o_ref):
            o_ref[...] = a_ref[...] + w_ref[...]

        out = pl.pallas_call(
            _probe_kernel,
            out_shape=jax.ShapeDtypeStruct((16, 128), jnp.float32),
            grid_spec=pltpu.PrefetchScalarGridSpec(
                num_scalar_prefetch=0,
                grid=(2,),
                in_specs=[
                    pl.BlockSpec((8, 128), lambda i: (i, 0)),
                    pl.BlockSpec((8, 128), lambda i: (0, 0), **kwargs),
                ],
                out_specs=pl.BlockSpec((8, 128), lambda i: (i, 0)),
            ),
        )(jnp.ones((16, 128), jnp.float32), jnp.ones((8, 128), jnp.float32))
        jax.block_until_ready(out)
        return kwargs
    except Exception:   # pragma: no cover - fallback to default double-buffering
        return {}


# ----------------------------- Decoder: tiled GEMM + bias (accumulate in o_ref) -----------------------------
def decoder_kernel(y_ref, w_ref, b_ref, o_ref):
    k = pl.program_id(2)

    @pl.when(k == 0)
    def _zero():
        o_ref[...] = jnp.zeros_like(o_ref)

    # bf16 x bf16 -> f32 accumulate directly into the resident output block.
    o_ref[...] += jnp.dot(y_ref[...], w_ref[...], preferred_element_type=jnp.float32)

    @pl.when(k == pl.num_programs(2) - 1)
    def _bias():
        o_ref[...] += b_ref[...]


def decoder_matmul(y, w, b):
    """y: (N, K) bf16 @ w: (K, V) bf16 + b: (1, V) f32 -> (N, V) f32.

    N, K, V must already be multiples of the chosen tiles (done in the wrapper /
    prepare_kernel_params so no re-padding happens on the hot path)."""
    N, K = y.shape
    _, V = w.shape
    tm = _largest_divisor_tile(N, 256, unit=8)
    tk = _largest_divisor_tile(K, 1024)
    tn = _largest_divisor_tile(V, 1024)

    bytes_blocks = 2 * (tm * tk * 2 + tk * tn * 2 + tn * 4) + 2 * tm * tn * 4
    vmem_limit = int(min(max(bytes_blocks + (8 << 20), 32 << 20), 128 << 20))

    return pl.pallas_call(
        decoder_kernel,
        out_shape=jax.ShapeDtypeStruct((N, V), jnp.float32),
        grid_spec=pltpu.PrefetchScalarGridSpec(
            num_scalar_prefetch=0,
            grid=(N // tm, V // tn, K // tk),
            in_specs=[
                pl.BlockSpec((tm, tk), lambda i, j, k: (i, k)),
                pl.BlockSpec((tk, tn), lambda i, j, k: (k, j)),
                pl.BlockSpec((1, tn), lambda i, j, k: (0, j)),
            ],
            out_specs=pl.BlockSpec((tm, tn), lambda i, j, k: (i, j)),
        ),
        compiler_params=pltpu.CompilerParams(
            dimension_semantics=("parallel", "parallel", "arbitrary"),
            vmem_limit_bytes=vmem_limit),
    )(y, w, b)


# ----------------------------- Fused GRU layer kernel (input proj + recurrence) -----------------------------
def gru_layer_kernel(x_ref, wi_ref, wh_ref, b_ref, bhn_ref, out_ref,
                     h_ref, gx_ref, oacc_ref, *, tchunk, bp, hdim, unroll):
    """One GRU layer over one chunk of `tchunk` timesteps (time-major-flattened rows).

    x_ref   : (tchunk*Bp, in_dim) bf16   layer input chunk (row = t*Bp + b)
    wi_ref  : (in_dim, 3*Hp)      bf16   fused [W_ir|W_iz|W_in]   (grid-invariant)
    wh_ref  : (Hp, 3*Hp)          bf16   fused [W_hr|W_hz|W_hn]   (grid-invariant)
    b_ref   : (1, 3*Hp)           f32    fused biases (b_ir+b_hr | b_iz+b_hz | b_in)
    bhn_ref : (1, Hp)             f32    b_hn (kept separate: r * (h@W_hn + b_hn))
    out_ref : (tchunk*Bp, Hp)     bf16   per-timestep hidden outputs
    h_ref   : (Bp, Hp)            f32    hidden state carried across chunks (scratch)
    gx_ref  : (tchunk*Bp, 3*Hp)   f32    precomputed input-gate pre-activations (scratch)
    oacc_ref: (tchunk*Bp, Hp)     f32    per-chunk output staging (scratch)
    """
    c = pl.program_id(0)

    @pl.when(c == 0)
    def _init():
        h_ref[...] = jnp.zeros_like(h_ref)

    # Hoisted per-chunk input projection: one large-row bf16 GEMM, f32 accumulate.
    gx_ref[...] = jnp.dot(x_ref[...], wi_ref[...],
                          preferred_element_type=jnp.float32) + b_ref[...]

    wh = wh_ref[...]                                    # VMEM-resident bf16 weights
    bhn = jnp.broadcast_to(bhn_ref[...], (bp, hdim))    # hoisted out of the step loop

    def step(t, h):
        row = pl.multiple_of(t * bp, bp)
        g = gx_ref[pl.ds(row, bp), :]                                   # (Bp, 3Hp) f32
        hh = jnp.dot(h.astype(wh.dtype), wh,
                     preferred_element_type=jnp.float32)                # fused h@[Wr|Wz|Wn]
        rz = jax.nn.sigmoid(g[:, :2 * hdim] + hh[:, :2 * hdim])
        r = rz[:, :hdim]
        z = rz[:, hdim:]
        n = jnp.tanh(g[:, 2 * hdim:] + r * (hh[:, 2 * hdim:] + bhn))
        h_new = n + z * (h - n)                                         # == (1-z)*n + z*h
        oacc_ref[pl.ds(row, bp), :] = h_new
        return h_new

    h_ref[...] = jax.lax.fori_loop(0, tchunk, step, h_ref[...], unroll=unroll)
    # Single dense, lane-aligned bf16 writeback for the whole chunk.
    out_ref[...] = oacc_ref[...].astype(out_ref.dtype)


def gru_layer(x, wi_cat, wh_cat, b_fused, bhn, *, bp, tchunk):
    """x: (Tp*Bp, in_dim) bf16 -> (Tp*Bp, Hp) bf16 (time-major-flattened rows)."""
    rows, in_dim = x.shape
    Hp = wh_cat.shape[0]
    G3 = 3 * Hp
    block_rows = tchunk * bp
    nc = rows // block_rows
    inv = _invariant_spec_kwargs()

    # VMEM budget: weights (assume worst-case double-buffered) + 2x x/out blocks (bf16)
    # + gx/out/h scratch (f32) + headroom; never below the platform default.
    wbytes = (in_dim + Hp) * G3 * 2 + (G3 + Hp) * 4
    stream = 2 * block_rows * (in_dim + Hp) * 2
    scratch = block_rows * (G3 + Hp) * 4 + bp * Hp * 4
    vmem_limit = int(min(max(2 * wbytes + stream + scratch + (8 << 20), 32 << 20),
                         128 << 20))

    kernel = functools.partial(gru_layer_kernel, tchunk=tchunk, bp=bp, hdim=Hp,
                               unroll=min(8, tchunk))
    return pl.pallas_call(
        kernel,
        out_shape=jax.ShapeDtypeStruct((rows, Hp), jnp.bfloat16),
        grid_spec=pltpu.PrefetchScalarGridSpec(
            num_scalar_prefetch=0,
            grid=(nc,),
            in_specs=[
                pl.BlockSpec((block_rows, in_dim), lambda c: (c, 0)),
                pl.BlockSpec((in_dim, G3), lambda c: (0, 0), **inv),
                pl.BlockSpec((Hp, G3), lambda c: (0, 0), **inv),
                pl.BlockSpec((1, G3), lambda c: (0, 0), **inv),
                pl.BlockSpec((1, Hp), lambda c: (0, 0), **inv),
            ],
            out_specs=pl.BlockSpec((block_rows, Hp), lambda c: (c, 0)),
            scratch_shapes=[
                pltpu.VMEM((bp, Hp), jnp.float32),          # h carried across chunks
                pltpu.VMEM((block_rows, G3), jnp.float32),  # gate pre-activations
                pltpu.VMEM((block_rows, Hp), jnp.float32),  # output staging
            ],
        ),
        compiler_params=pltpu.CompilerParams(
            dimension_semantics=("arbitrary",),             # h carried across chunks
            vmem_limit_bytes=vmem_limit),
    )(x, wi_cat, wh_cat, b_fused, bhn)


# ----------------------------- Parameter init / kernel layout -----------------------------
def init_params(key, vocab_size, embedding_size, hidden_size, num_layers):
    """Logical (PyTorch-like) f32 layout, used by the pure-JAX reference."""
    keys = jax.random.split(key, 2 + 4 * num_layers)
    params = {}
    params["embedding"] = jax.random.uniform(
        keys[0], (vocab_size, embedding_size), jnp.float32, -0.1, 0.1)
    params["linear_w_t"] = jax.random.uniform(
        keys[1], (hidden_size, vocab_size), jnp.float32, -0.1, 0.1)  # W_lin^T
    params["linear_b"] = jnp.zeros((1, vocab_size), jnp.float32)

    std = 1.0 / jnp.sqrt(jnp.float32(hidden_size))
    layers = []
    for l in range(num_layers):
        in_dim = embedding_size if l == 0 else hidden_size
        k0, k1, k2, k3 = keys[2 + 4 * l: 2 + 4 * (l + 1)]
        wi = jax.random.uniform(k0, (3, in_dim, hidden_size), jnp.float32, -std, std)
        wh = jax.random.uniform(k1, (3, hidden_size, hidden_size), jnp.float32, -std, std)
        bi = jax.random.uniform(k2, (3, 1, hidden_size), jnp.float32, -std, std)
        bh = jax.random.uniform(k3, (3, 1, hidden_size), jnp.float32, -std, std)
        layers.append((wi, wh, bi, bh))
    params["layers"] = layers
    return params


def prepare_kernel_params(params):
    """Pad + fuse weights ONCE into the kernel layout (lane/sublane + tile aligned, bf16)."""
    emb = params["embedding"]
    V, E = emb.shape
    H = params["linear_w_t"].shape[0]
    Ep = _round_up(E, 128)
    Hp = _round_up(H, 128)
    tn_dec = min(1024, _round_up(V, 128))        # decoder lane tile
    Vp = _round_up(V, tn_dec)                    # pad vocab to a tile multiple once

    layers = []
    for l, (wi, wh, bi, bh) in enumerate(params["layers"]):
        in_dim = wi.shape[1]
        in_pad = Ep if l == 0 else Hp
        wi_cat = jnp.zeros((in_pad, 3 * Hp), jnp.float32)
        wh_cat = jnp.zeros((Hp, 3 * Hp), jnp.float32)
        for g in range(3):
            wi_cat = wi_cat.at[:in_dim, g * Hp: g * Hp + H].set(wi[g])
            wh_cat = wh_cat.at[:H, g * Hp: g * Hp + H].set(wh[g])
        b_fused = jnp.zeros((1, 3 * Hp), jnp.float32)
        b_fused = b_fused.at[:, 0:H].set(bi[0] + bh[0])            # r: b_ir + b_hr
        b_fused = b_fused.at[:, Hp:Hp + H].set(bi[1] + bh[1])      # z: b_iz + b_hz
        b_fused = b_fused.at[:, 2 * Hp:2 * Hp + H].set(bi[2])      # n: b_in only
        bhn = jnp.zeros((1, Hp), jnp.float32).at[:, :H].set(bh[2])
        layers.append((wi_cat.astype(jnp.bfloat16), wh_cat.astype(jnp.bfloat16),
                       b_fused, bhn))

    dec_w = jnp.zeros((Hp, Vp), jnp.float32).at[:H, :V].set(params["linear_w_t"])
    dec_b = jnp.zeros((1, Vp), jnp.float32).at[:, :V].set(params["linear_b"])
    return {
        "embedding": emb,                         # f32 gather table
        "layers": layers,
        "dec_w": dec_w.astype(jnp.bfloat16),
        "dec_b": dec_b,
    }


# ----------------------------- Full model forward -----------------------------
@functools.partial(jax.jit, static_argnames=("vocab_size", "hidden_size"))
def rnn_model_forward(kparams, tokens, *, vocab_size, hidden_size):
    """tokens: (B, T) int32.  Returns (final_out (B,T,V) f32, hidden (L,B,H) f32)."""
    B, T = tokens.shape
    H, V = hidden_size, vocab_size
    Hp, Vp = kparams["dec_w"].shape
    Ep = kparams["layers"][0][0].shape[0]

    Bp = _round_up(B, 8)                 # sublane-pad batch
    # Timesteps per grid step (in-kernel fori_loop).  64 amortizes per-step overhead on
    # v5e/v6e; with bf16 streams it also fits v7x's 64 MiB VMEM for typical H.
    tchunk = min(T, 64)
    Tp = _round_up(T, tchunk)

    # Embedding lookup (gather) -- glue, plain JAX.  Build time-major, padded, bf16,
    # then flatten to the 2-D (Tp*Bp, Ep) slab layout the recurrence kernel streams.
    emb = kparams["embedding"][tokens]                                 # (B, T, E) f32
    E = emb.shape[-1]
    x = jnp.zeros((Tp, Bp, Ep), jnp.bfloat16)
    x = x.at[:T, :B, :E].set(jnp.transpose(emb, (1, 0, 2)).astype(jnp.bfloat16))
    x = x.reshape(Tp * Bp, Ep)

    last_hidden = []
    for (wi_cat, wh_cat, b_fused, bhn) in kparams["layers"]:
        # Fused input projection + recurrence: no gate tensor round-trip through HBM.
        x = gru_layer(x, wi_cat, wh_cat, b_fused, bhn, bp=Bp, tchunk=tchunk)
        last_hidden.append(x.reshape(Tp, Bp, Hp)[T - 1, :B, :H])       # h_T of this layer
    hidden_state = jnp.stack(last_hidden, axis=0).astype(jnp.float32)  # (L, B, H)

    # Decoder: only the real B*T rows (batch-first order, matching out.view(B*T, H)).
    n_rows = B * T
    tm_rows = min(256, _round_up(n_rows, 8))
    Np = _round_up(n_rows, tm_rows)
    y = x.reshape(Tp, Bp, Hp)[:T, :B, :].transpose(1, 0, 2).reshape(n_rows, Hp)
    if Np != n_rows:
        y = jnp.zeros((Np, Hp), jnp.bfloat16).at[:n_rows].set(y)
    decoded = decoder_matmul(y, kparams["dec_w"], kparams["dec_b"])    # (Np, Vp) f32
    final_out = decoded[:n_rows, :V].reshape(B, T, V)                  # (B, T, V)
    return final_out, hidden_state


# ----------------------------- Pure-JAX reference (for checking) -----------------------------
def reference_forward(params, tokens):
    emb = params["embedding"][tokens]                 # (B, T, E)
    x = jnp.transpose(emb, (1, 0, 2))                 # (T, B, E)
    last_hidden = []
    for (wi, wh, bi, bh) in params["layers"]:
        B = x.shape[1]
        H = wh.shape[-1]

        def step(h, x_t):
            i_r = x_t @ wi[0] + bi[0]
            i_z = x_t @ wi[1] + bi[1]
            i_n = x_t @ wi[2] + bi[2]
            h_r = h @ wh[0] + bh[0]
            h_z = h @ wh[1] + bh[1]
            h_n = h @ wh[2] + bh[2]
            r = jax.nn.sigmoid(i_r + h_r)
            z = jax.nn.sigmoid(i_z + h_z)
            n = jnp.tanh(i_n + r * h_n)
            h_new = (1.0 - z) * n + z * h
            return h_new, h_new

        h0 = jnp.zeros((B, H), jnp.float32)
        h_last, outs = jax.lax.scan(step, h0, x)
        x = outs
        last_hidden.append(h_last)
    hidden_state = jnp.stack(last_hidden, axis=0)
    out_bth = jnp.transpose(x, (1, 0, 2))
    B, T, H = out_bth.shape
    decoded = out_bth.reshape(B * T, H) @ params["linear_w_t"] + params["linear_b"]
    return decoded.reshape(B, T, -1), hidden_state


if __name__ == "__main__":
    VOCAB = 50
    EMB = 32
    HID = 32
    LAYERS = 2
    B, T = 2, 8

    key = jax.random.PRNGKey(0)
    pkey, tkey = jax.random.split(key)
    params = init_params(pkey, VOCAB, EMB, HID, LAYERS)
    kparams = prepare_kernel_params(params)
    tokens = jax.random.randint(tkey, (B, T), 0, VOCAB, dtype=jnp.int32)

    _invariant_spec_kwargs()   # prime the Buffered(1) support probe outside jit tracing

    final_out, hidden = rnn_model_forward(
        kparams, tokens, vocab_size=VOCAB, hidden_size=HID)
    final_out = jax.block_until_ready(final_out)
    hidden = jax.block_until_ready(hidden)

    ref_out, ref_hidden = reference_forward(params, tokens)
    assert final_out.shape == (B, T, VOCAB)
    assert hidden.shape == (LAYERS, B, HID)
    # bf16 weights/activations with f32 accumulation: tolerance loosened vs the f32 reference.
    assert jnp.allclose(final_out, ref_out, rtol=2e-2, atol=2e-2), \
        float(jnp.max(jnp.abs(final_out - ref_out)))
    assert jnp.allclose(hidden, ref_hidden, rtol=2e-2, atol=2e-2), \
        float(jnp.max(jnp.abs(hidden - ref_hidden)))

    print("KERNEL_OK")
</pallas_src>

<mosaic_0001>
module attributes {stable_mosaic.version = 11 : i64} {
  func.func @_probe_kernel(%arg0: i32, %arg1: memref<8x128xf32, #tpu.memory_space<vmem>>, %arg2: memref<8x128xf32, #tpu.memory_space<vmem>>, %arg3: memref<8x128xf32, #tpu.memory_space<vmem>>) attributes {dimension_semantics = [#tpu.dimension_semantics<arbitrary>], iteration_bounds = array<i64: 2>, scalar_prefetch = 0 : i64, scratch_operands = 0 : i64, tpu.core_type = #tpu.core_type<tc>, window_params = [{transform_indices = @transform_0, window_bounds = array<i64: 8, 128>}, {pipeline_mode = #tpu.pipeline_mode<synchronous>, transform_indices = @transform_1, window_bounds = array<i64: 8, 128>}, {transform_indices = @transform_2, window_bounds = array<i64: 8, 128>}]} {
    %c0 = arith.constant 0 : index
    %c0_0 = arith.constant 0 : index
    %0 = vector.load %arg1[%c0, %c0_0] : memref<8x128xf32, #tpu.memory_space<vmem>>, vector<8x128xf32>
    %c0_1 = arith.constant 0 : index
    %c0_2 = arith.constant 0 : index
    %1 = vector.load %arg2[%c0_1, %c0_2] : memref<8x128xf32, #tpu.memory_space<vmem>>, vector<8x128xf32>
    %2 = arith.addf %0, %1 : vector<8x128xf32>
    %c0_3 = arith.constant 0 : index
    %c0_4 = arith.constant 0 : index
    %3 = vector.load %arg3[%c0_3, %c0_4] : memref<8x128xf32, #tpu.memory_space<vmem>>, vector<8x128xf32>
    tpu.vector_store %arg3[%c0_3, %c0_4], %2 {strides = array<i32>} : memref<8x128xf32, #tpu.memory_space<vmem>>, vector<8x128xf32>,
    return
  }
  func.func @transform_0(%arg0: i32) -> (i32, i32) {
    %c0_i32 = arith.constant 0 : i32
    %c0_i32_0 = arith.constant 0 : i32
    return %arg0, %c0_i32 : i32, i32
  }
  func.func @transform_1(%arg0: i32) -> (i32, i32) {
    %c0_i32 = arith.constant 0 : i32
    %c0_i32_0 = arith.constant 0 : i32
    %c0_i32_1 = arith.constant 0 : i32
    return %c0_i32, %c0_i32_0 : i32, i32
  }
  func.func @transform_2(%arg0: i32) -> (i32, i32) {
    %c0_i32 = arith.constant 0 : i32
    %c0_i32_0 = arith.constant 0 : i32
    return %arg0, %c0_i32 : i32, i32
  }
}

module attributes {stable_mosaic.version = 11 : i64} {
  func.func @decoder_kernel(%arg0: i32, %arg1: i32, %arg2: i32, %arg3: memref<16x128xbf16, #tpu.memory_space<vmem>>, %arg4: memref<128x128xbf16, #tpu.memory_space<vmem>>, %arg5: memref<1x128xf32, #tpu.memory_space<vmem>>, %arg6: memref<16x128xf32, #tpu.memory_space<vmem>>) attributes {dimension_semantics = [#tpu.dimension_semantics<parallel>, #tpu.dimension_semantics<parallel>, #tpu.dimension_semantics<arbitrary>], iteration_bounds = array<i64: 1, 1, 1>, scalar_prefetch = 0 : i64, scratch_operands = 0 : i64, tpu.core_type = #tpu.core_type<tc>, window_params = [{transform_indices = @transform_0, window_bounds = array<i64: 16, 128>}, {transform_indices = @transform_1, window_bounds = array<i64: 128, 128>}, {transform_indices = @transform_2, window_bounds = array<i64: 1, 128>}, {transform_indices = @transform_3, window_bounds = array<i64: 16, 128>}]} {
    %c0_i32 = arith.constant 0 : i32
    %0 = arith.cmpi eq, %arg2, %c0_i32 : i32
    %1 = arith.extui %0 : i1 to i32
    %c0_i32_0 = arith.constant 0 : i32
    %2 = arith.cmpi ne, %1, %c0_i32_0 : i32
    scf.if %2 {
      %cst_10 = arith.constant 0.000000e+00 : f32
      %12 = vector.broadcast %cst_10 : f32 to vector<16x128xf32>
      %c0_11 = arith.constant 0 : index
      %c0_12 = arith.constant 0 : index
      %13 = vector.load %arg6[%c0_11, %c0_12] : memref<16x128xf32, #tpu.memory_space<vmem>>, vector<16x128xf32>
      tpu.vector_store %arg6[%c0_11, %c0_12], %12 {strides = array<i32>} : memref<16x128xf32, #tpu.memory_space<vmem>>, vector<16x128xf32>,
    } else {
    }
    %c0 = arith.constant 0 : index
    %c0_1 = arith.constant 0 : index
    %3 = vector.load %arg6[%c0, %c0_1] : memref<16x128xf32, #tpu.memory_space<vmem>>, vector<16x128xf32>
    %c0_2 = arith.constant 0 : index
    %c0_3 = arith.constant 0 : index
    %4 = vector.load %arg3[%c0_2, %c0_3] : memref<16x128xbf16, #tpu.memory_space<vmem>>, vector<16x128xbf16>
    %c0_4 = arith.constant 0 : index
    %c0_5 = arith.constant 0 : index
    %5 = vector.load %arg4[%c0_4, %c0_5] : memref<128x128xbf16, #tpu.memory_space<vmem>>, vector<128x128xbf16>
    %cst = arith.constant dense<0.000000e+00> : vector<16x128xf32>
    %6 = tpu.matmul %4, %5, %cst {dimension_numbers = #tpu.dot_dimension_numbers<[1], [0], [0], [1], [0, 0, 1, 1], [], []>} : vector<16x128xbf16>, vector<128x128xbf16>, vector<16x128xf32> -> vector<16x128xf32>
    %7 = arith.addf %3, %6 : vector<16x128xf32>
    %c0_6 = arith.constant 0 : index
    %c0_7 = arith.constant 0 : index
    %8 = vector.load %arg6[%c0_6, %c0_7] : memref<16x128xf32, #tpu.memory_space<vmem>>, vector<16x128xf32>
    tpu.vector_store %arg6[%c0_6, %c0_7], %7 {strides = array<i32>} : memref<16x128xf32, #tpu.memory_space<vmem>>, vector<16x128xf32>,
    %c0_i32_8 = arith.constant 0 : i32
    %9 = arith.cmpi eq, %arg2, %c0_i32_8 : i32
    %10 = arith.extui %9 : i1 to i32
    %c0_i32_9 = arith.constant 0 : i32
    %11 = arith.cmpi ne, %10, %c0_i32_9 : i32
    scf.if %11 {
      %c0_10 = arith.constant 0 : index
      %c0_11 = arith.constant 0 : index
      %12 = vector.load %arg6[%c0_10, %c0_11] : memref<16x128xf32, #tpu.memory_space<vmem>>, vector<16x128xf32>
      %c0_12 = arith.constant 0 : index
      %c0_13 = arith.constant 0 : index
      %13 = vector.load %arg5[%c0_12, %c0_13] : memref<1x128xf32, #tpu.memory_space<vmem>>, vector<1x128xf32>
      %14 = vector.broadcast %13 : vector<1x128xf32> to vector<16x128xf32>
      %15 = arith.addf %12, %14 : vector<16x128xf32>
      %c0_14 = arith.constant 0 : index
      %c0_15 = arith.constant 0 : index
      %16 = vector.load %arg6[%c0_14, %c0_15] : memref<16x128xf32, #tpu.memory_space<vmem>>, vector<16x128xf32>
      tpu.vector_store %arg6[%c0_14, %c0_15], %15 {strides = array<i32>} : memref<16x128xf32, #tpu.memory_space<vmem>>, vector<16x128xf32>,
    } else {
    }
    return
  }
  func.func @transform_0(%arg0: i32, %arg1: i32, %arg2: i32) -> (i32, i32) {
    %c0_i32 = arith.constant 0 : i32
    return %arg0, %arg2 : i32, i32
  }
  func.func @transform_1(%arg0: i32, %arg1: i32, %arg2: i32) -> (i32, i32) {
    %c0_i32 = arith.constant 0 : i32
    return %arg2, %arg1 : i32, i32
  }
  func.func @transform_2(%arg0: i32, %arg1: i32, %arg2: i32) -> (i32, i32) {
    %c0_i32 = arith.constant 0 : i32
    %c0_i32_0 = arith.constant 0 : i32
    return %c0_i32, %arg1 : i32, i32
  }
  func.func @transform_3(%arg0: i32, %arg1: i32, %arg2: i32) -> (i32, i32) {
    %c0_i32 = arith.constant 0 : i32
    return %arg0, %arg1 : i32, i32
  }
}

module attributes {stable_mosaic.version = 11 : i64} {
  func.func @gru_layer_kernel(%arg0: i32, %arg1: memref<64x128xbf16, #tpu.memory_space<vmem>>, %arg2: memref<128x384xbf16, #tpu.memory_space<vmem>>, %arg3: memref<128x384xbf16, #tpu.memory_space<vmem>>, %arg4: memref<1x384xf32, #tpu.memory_space<vmem>>, %arg5: memref<1x128xf32, #tpu.memory_space<vmem>>, %arg6: memref<64x128xbf16, #tpu.memory_space<vmem>>, %arg7: memref<8x128xf32, #tpu.memory_space<vmem>>, %arg8: memref<64x384xf32, #tpu.memory_space<vmem>>, %arg9: memref<64x128xf32, #tpu.memory_space<vmem>>) attributes {dimension_semantics = [#tpu.dimension_semantics<arbitrary>], iteration_bounds = array<i64: 1>, scalar_prefetch = 0 : i64, scratch_operands = 3 : i64, tpu.core_type = #tpu.core_type<tc>, window_params = [{transform_indices = @transform_0, window_bounds = array<i64: 64, 128>}, {pipeline_mode = #tpu.pipeline_mode<synchronous>, transform_indices = @transform_1, window_bounds = array<i64: 128, 384>}, {pipeline_mode = #tpu.pipeline_mode<synchronous>, transform_indices = @transform_2, window_bounds = array<i64: 128, 384>}, {pipeline_mode = #tpu.pipeline_mode<synchronous>, transform_indices = @transform_3, window_bounds = array<i64: 1, 384>}, {pipeline_mode = #tpu.pipeline_mode<synchronous>, transform_indices = @transform_4, window_bounds = array<i64: 1, 128>}, {transform_indices = @transform_5, window_bounds = array<i64: 64, 128>}]} {
    %c0_i32 = arith.constant 0 : i32
    %0 = arith.cmpi eq, %arg0, %c0_i32 : i32
    %1 = arith.extui %0 : i1 to i32
    %c0_i32_0 = arith.constant 0 : i32
    %2 = arith.cmpi ne, %1, %c0_i32_0 : i32
    scf.if %2 {
      %cst_61 = arith.constant 0.000000e+00 : f32
      %235 = vector.broadcast %cst_61 : f32 to vector<8x128xf32>
      %c0_62 = arith.constant 0 : index
      %c0_63 = arith.constant 0 : index
      %236 = vector.load %arg7[%c0_62, %c0_63] : memref<8x128xf32, #tpu.memory_space<vmem>>, vector<8x128xf32>
      tpu.vector_store %arg7[%c0_62, %c0_63], %235 {strides = array<i32>} : memref<8x128xf32, #tpu.memory_space<vmem>>, vector<8x128xf32>,
    } else {
    }
    %c0 = arith.constant 0 : index
    %c0_1 = arith.constant 0 : index
    %3 = vector.load %arg1[%c0, %c0_1] : memref<64x128xbf16, #tpu.memory_space<vmem>>, vector<64x128xbf16>
    %c0_2 = arith.constant 0 : index
    %c0_3 = arith.constant 0 : index
    %4 = vector.load %arg2[%c0_2, %c0_3] : memref<128x384xbf16, #tpu.memory_space<vmem>>, vector<128x384xbf16>
    %cst = arith.constant dense<0.000000e+00> : vector<64x384xf32>
    %5 = tpu.matmul %3, %4, %cst {dimension_numbers = #tpu.dot_dimension_numbers<[1], [0], [0], [1], [0, 0, 1, 1], [], []>} : vector<64x128xbf16>, vector<128x384xbf16>, vector<64x384xf32> -> vector<64x384xf32>
    %c0_4 = arith.constant 0 : index
    %c0_5 = arith.constant 0 : index
    %6 = vector.load %arg4[%c0_4, %c0_5] : memref<1x384xf32, #tpu.memory_space<vmem>>, vector<1x384xf32>
    %7 = vector.broadcast %6 : vector<1x384xf32> to vector<64x384xf32>
    %8 = arith.addf %5, %7 : vector<64x384xf32>
    %c0_6 = arith.constant 0 : index
    %c0_7 = arith.constant 0 : index
    %9 = vector.load %arg8[%c0_6, %c0_7] : memref<64x384xf32, #tpu.memory_space<vmem>>, vector<64x384xf32>
    tpu.vector_store %arg8[%c0_6, %c0_7], %8 {strides = array<i32>} : memref<64x384xf32, #tpu.memory_space<vmem>>, vector<64x384xf32>,
    %c0_8 = arith.constant 0 : index
    %c0_9 = arith.constant 0 : index
    %10 = vector.load %arg3[%c0_8, %c0_9] : memref<128x384xbf16, #tpu.memory_space<vmem>>, vector<128x384xbf16>
    %c0_10 = arith.constant 0 : index
    %c0_11 = arith.constant 0 : index
    %11 = vector.load %arg5[%c0_10, %c0_11] : memref<1x128xf32, #tpu.memory_space<vmem>>, vector<1x128xf32>
    %12 = vector.shape_cast %11 : vector<1x128xf32> to vector<1x128xf32>
    %13 = vector.broadcast %12 : vector<1x128xf32> to vector<8x128xf32>
    %c0_12 = arith.constant 0 : index
    %c0_13 = arith.constant 0 : index
    %14 = vector.load %arg7[%c0_12, %c0_13] : memref<8x128xf32, #tpu.memory_space<vmem>>, vector<8x128xf32>
    %c0_i32_14 = arith.constant 0 : i32
    %c8_i32 = arith.constant 8 : i32
    %15 = arith.muli %c0_i32_14, %c8_i32 : i32
    %16 = tpu.assume_multiple %15, 8 : i32
    %17 = arith.index_cast %16 : i32 to index
    %c0_15 = arith.constant 0 : index
    %18 = vector.load %arg8[%17, %c0_15] : memref<64x384xf32, #tpu.memory_space<vmem>>, vector<8x384xf32>
    %19 = arith.truncf %14 : vector<8x128xf32> to vector<8x128xbf16>
    %cst_16 = arith.constant dense<0.000000e+00> : vector<8x384xf32>
    %20 = tpu.matmul %19, %10, %cst_16 {dimension_numbers = #tpu.dot_dimension_numbers<[1], [0], [0], [1], [0, 0, 1, 1], [], []>} : vector<8x128xbf16>, vector<128x384xbf16>, vector<8x384xf32> -> vector<8x384xf32>
    %21 = vector.extract_strided_slice %18 {offsets = [0, 0], sizes = [8, 256], strides = [1, 1]} : vector<8x384xf32> to vector<8x256xf32>
    %22 = vector.extract_strided_slice %20 {offsets = [0, 0], sizes = [8, 256], strides = [1, 1]} : vector<8x384xf32> to vector<8x256xf32>
    %23 = arith.addf %21, %22 : vector<8x256xf32>
    %24 = arith.negf %23 : vector<8x256xf32>
    %25 = math.exp %24 : vector<8x256xf32>
    %cst_17 = arith.constant 1.000000e+00 : f32
    %26 = vector.broadcast %cst_17 : f32 to vector<8x256xf32>
    %27 = arith.addf %26, %25 : vector<8x256xf32>
    %28 = arith.divf %26, %27 : vector<8x256xf32>
    %29 = vector.extract_strided_slice %28 {offsets = [0, 0], sizes = [8, 128], strides = [1, 1]} : vector<8x256xf32> to vector<8x128xf32>
    %30 = vector.extract_strided_slice %28 {offsets = [0, 128], sizes = [8, 128], strides = [1, 1]} : vector<8x256xf32> to vector<8x128xf32>
    %31 = vector.extract_strided_slice %18 {offsets = [0, 256], sizes = [8, 128], strides = [1, 1]} : vector<8x384xf32> to vector<8x128xf32>
    %32 = vector.extract_strided_slice %20 {offsets = [0, 256], sizes = [8, 128], strides = [1, 1]} : vector<8x384xf32> to vector<8x128xf32>
    %33 = arith.addf %32, %13 : vector<8x128xf32>
    %34 = arith.mulf %29, %33 : vector<8x128xf32>
    %35 = arith.addf %31, %34 : vector<8x128xf32>
    %36 = math.tanh %35 : vector<8x128xf32>
    %37 = arith.subf %14, %36 : vector<8x128xf32>
    %38 = arith.mulf %30, %37 : vector<8x128xf32>
    %39 = arith.addf %36, %38 : vector<8x128xf32>
    %40 = arith.index_cast %16 : i32 to index
    %c0_18 = arith.constant 0 : index
    %41 = vector.load %arg9[%40, %c0_18] : memref<64x128xf32, #tpu.memory_space<vmem>>, vector<8x128xf32>
    tpu.vector_store %arg9[%40, %c0_18], %39 {strides = array<i32>} : memref<64x128xf32, #tpu.memory_space<vmem>>, vector<8x128xf32>,
    %c1_i32 = arith.constant 1 : i32
    %c8_i32_19 = arith.constant 8 : i32
    %42 = arith.muli %c1_i32, %c8_i32_19 : i32
    %43 = tpu.assume_multiple %42, 8 : i32
    %44 = arith.index_cast %43 : i32 to index
    %c0_20 = arith.constant 0 : index
    %45 = vector.load %arg8[%44, %c0_20] : memref<64x384xf32, #tpu.memory_space<vmem>>, vector<8x384xf32>
    %46 = arith.truncf %39 : vector<8x128xf32> to vector<8x128xbf16>
    %cst_21 = arith.constant dense<0.000000e+00> : vector<8x384xf32>
    %47 = tpu.matmul %46, %10, %cst_21 {dimension_numbers = #tpu.dot_dimension_numbers<[1], [0], [0], [1], [0, 0, 1, 1], [], []>} : vector<8x128xbf16>, vector<128x384xbf16>, vector<8x384xf32> -> vector<8x384xf32>
    %48 = vector.extract_strided_slice %45 {offsets = [0, 0], sizes = [8, 256], strides = [1, 1]} : vector<8x384xf32> to vector<8x256xf32>
    %49 = vector.extract_strided_slice %47 {offsets = [0, 0], sizes = [8, 256], strides = [1, 1]} : vector<8x384xf32> to vector<8x256xf32>
    %50 = arith.addf %48, %49 : vector<8x256xf32>
    %51 = arith.negf %50 : vector<8x256xf32>
    %52 = math.exp %51 : vector<8x256xf32>
    %cst_22 = arith.constant 1.000000e+00 : f32
    %53 = vector.broadcast %cst_22 : f32 to vector<8x256xf32>
    %54 = arith.addf %53, %52 : vector<8x256xf32>
    %55 = arith.divf %53, %54 : vector<8x256xf32>
    %56 = vector.extract_strided_slice %55 {offsets = [0, 0], sizes = [8, 128], strides = [1, 1]} : vector<8x256xf32> to vector<8x128xf32>
    %57 = vector.extract_strided_slice %55 {offsets = [0, 128], sizes = [8, 128], strides = [1, 1]} : vector<8x256xf32> to vector<8x128xf32>
    %58 = vector.extract_strided_slice %45 {offsets = [0, 256], sizes = [8, 128], strides = [1, 1]} : vector<8x384xf32> to vector<8x128xf32>
    %59 = vector.extract_strided_slice %47 {offsets = [0, 256], sizes = [8, 128], strides = [1, 1]} : vector<8x384xf32> to vector<8x128xf32>
    %60 = arith.addf %59, %13 : vector<8x128xf32>
    %61 = arith.mulf %56, %60 : vector<8x128xf32>
    %62 = arith.addf %58, %61 : vector<8x128xf32>
    %63 = math.tanh %62 : vector<8x128xf32>
    %64 = arith.subf %39, %63 : vector<8x128xf32>
    %65 = arith.mulf %57, %64 : vector<8x128xf32>
    %66 = arith.addf %63, %65 : vector<8x128xf32>
    %67 = arith.index_cast %43 : i32 to index
    %c0_23 = arith.constant 0 : index
    %68 = vector.load %arg9[%67, %c0_23] : memref<64x128xf32, #tpu.memory_space<vmem>>, vector<8x128xf32>
    tpu.vector_store %arg9[%67, %c0_23], %66 {strides = array<i32>} : memref<64x128xf32, #tpu.memory_space<vmem>>, vector<8x128xf32>,
    %c2_i32 = arith.constant 2 : i32
    %c8_i32_24 = arith.constant 8 : i32
    %69 = arith.muli %c2_i32, %c8_i32_24 : i32
    %70 = tpu.assume_multiple %69, 8 : i32
    %71 = arith.index_cast %70 : i32 to index
    %c0_25 = arith.constant 0 : index
    %72 = vector.load %arg8[%71, %c0_25] : memref<64x384xf32, #tpu.memory_space<vmem>>, vector<8x384xf32>
    %73 = arith.truncf %66 : vector<8x128xf32> to vector<8x128xbf16>
    %cst_26 = arith.constant dense<0.000000e+00> : vector<8x384xf32>
    %74 = tpu.matmul %73, %10, %cst_26 {dimension_numbers = #tpu.dot_dimension_numbers<[1], [0], [0], [1], [0, 0, 1, 1], [], []>} : vector<8x128xbf16>, vector<128x384xbf16>, vector<8x384xf32> -> vector<8x384xf32>
    %75 = vector.extract_strided_slice %72 {offsets = [0, 0], sizes = [8, 256], strides = [1, 1]} : vector<8x384xf32> to vector<8x256xf32>
    %76 = vector.extract_strided_slice %74 {offsets = [0, 0], sizes = [8, 256], strides = [1, 1]} : vector<8x384xf32> to vector<8x256xf32>
    %77 = arith.addf %75, %76 : vector<8x256xf32>
    %78 = arith.negf %77 : vector<8x256xf32>
    %79 = math.exp %78 : vector<8x256xf32>
    %cst_27 = arith.constant 1.000000e+00 : f32
    %80 = vector.broadcast %cst_27 : f32 to vector<8x256xf32>
    %81 = arith.addf %80, %79 : vector<8x256xf32>
    %82 = arith.divf %80, %81 : vector<8x256xf32>
    %83 = vector.extract_strided_slice %82 {offsets = [0, 0], sizes = [8, 128], strides = [1, 1]} : vector<8x256xf32> to vector<8x128xf32>
    %84 = vector.extract_strided_slice %82 {offsets = [0, 128], sizes = [8, 128], strides = [1, 1]} : vector<8x256xf32> to vector<8x128xf32>
    %85 = vector.extract_strided_slice %72 {offsets = [0, 256], sizes = [8, 128], strides = [1, 1]} : vector<8x384xf32> to vector<8x128xf32>
    %86 = vector.extract_strided_slice %74 {offsets = [0, 256], sizes = [8, 128], strides = [1, 1]} : vector<8x384xf32> to vector<8x128xf32>
    %87 = arith.addf %86, %13 : vector<8x128xf32>
    %88 = arith.mulf %83, %87 : vector<8x128xf32>
    %89 = arith.addf %85, %88 : vector<8x128xf32>
    %90 = math.tanh %89 : vector<8x128xf32>
    %91 = arith.subf %66, %90 : vector<8x128xf32>
    %92 = arith.mulf %84, %91 : vector<8x128xf32>
    %93 = arith.addf %90, %92 : vector<8x128xf32>
    %94 = arith.index_cast %70 : i32 to index
    %c0_28 = arith.constant 0 : index
    %95 = vector.load %arg9[%94, %c0_28] : memref<64x128xf32, #tpu.memory_space<vmem>>, vector<8x128xf32>
    tpu.vector_store %arg9[%94, %c0_28], %93 {strides = array<i32>} : memref<64x128xf32, #tpu.memory_space<vmem>>, vector<8x128xf32>,
    %c3_i32 = arith.constant 3 : i32
    %c8_i32_29 = arith.constant 8 : i32
    %96 = arith.muli %c3_i32, %c8_i32_29 : i32
    %97 = tpu.assume_multiple %96, 8 : i32
    %98 = arith.index_cast %97 : i32 to index
    %c0_30 = arith.constant 0 : index
    %99 = vector.load %arg8[%98, %c0_30] : memref<64x384xf32, #tpu.memory_space<vmem>>, vector<8x384xf32>
    %100 = arith.truncf %93 : vector<8x128xf32> to vector<8x128xbf16>
    %cst_31 = arith.constant dense<0.000000e+00> : vector<8x384xf32>
    %101 = tpu.matmul %100, %10, %cst_31 {dimension_numbers = #tpu.dot_dimension_numbers<[1], [0], [0], [1], [0, 0, 1, 1], [], []>} : vector<8x128xbf16>, vector<128x384xbf16>, vector<8x384xf32> -> vector<8x384xf32>
    %102 = vector.extract_strided_slice %99 {offsets = [0, 0], sizes = [8, 256], strides = [1, 1]} : vector<8x384xf32> to vector<8x256xf32>
    %103 = vector.extract_strided_slice %101 {offsets = [0, 0], sizes = [8, 256], strides = [1, 1]} : vector<8x384xf32> to vector<8x256xf32>
    %104 = arith.addf %102, %103 : vector<8x256xf32>
    %105 = arith.negf %104 : vector<8x256xf32>
    %106 = math.exp %105 : vector<8x256xf32>
    %cst_32 = arith.constant 1.000000e+00 : f32
    %107 = vector.broadcast %cst_32 : f32 to vector<8x256xf32>
    %108 = arith.addf %107, %106 : vector<8x256xf32>
    %109 = arith.divf %107, %108 : vector<8x256xf32>
    %110 = vector.extract_strided_slice %109 {offsets = [0, 0], sizes = [8, 128], strides = [1, 1]} : vector<8x256xf32> to vector<8x128xf32>
    %111 = vector.extract_strided_slice %109 {offsets = [0, 128], sizes = [8, 128], strides = [1, 1]} : vector<8x256xf32> to vector<8x128xf32>
    %112 = vector.extract_strided_slice %99 {offsets = [0, 256], sizes = [8, 128], strides = [1, 1]} : vector<8x384xf32> to vector<8x128xf32>
    %113 = vector.extract_strided_slice %101 {offsets = [0, 256], sizes = [8, 128], strides = [1, 1]} : vector<8x384xf32> to vector<8x128xf32>
    %114 = arith.addf %113, %13 : vector<8x128xf32>
    %115 = arith.mulf %110, %114 : vector<8x128xf32>
    %116 = arith.addf %112, %115 : vector<8x128xf32>
    %117 = math.tanh %116 : vector<8x128xf32>
    %118 = arith.subf %93, %117 : vector<8x128xf32>
    %119 = arith.mulf %111, %118 : vector<8x128xf32>
    %120 = arith.addf %117, %119 : vector<8x128xf32>
    %121 = arith.index_cast %97 : i32 to index
    %c0_33 = arith.constant 0 : index
    %122 = vector.load %arg9[%121, %c0_33] : memref<64x128xf32, #tpu.memory_space<vmem>>, vector<8x128xf32>
    tpu.vector_store %arg9[%121, %c0_33], %120 {strides = array<i32>} : memref<64x128xf32, #tpu.memory_space<vmem>>, vector<8x128xf32>,
    %c4_i32 = arith.constant 4 : i32
    %c8_i32_34 = arith.constant 8 : i32
    %123 = arith.muli %c4_i32, %c8_i32_34 : i32
    %124 = tpu.assume_multiple %123, 8 : i32
    %125 = arith.index_cast %124 : i32 to index
    %c0_35 = arith.constant 0 : index
    %126 = vector.load %arg8[%125, %c0_35] : memref<64x384xf32, #tpu.memory_space<vmem>>, vector<8x384xf32>
    %127 = arith.truncf %120 : vector<8x128xf32> to vector<8x128xbf16>
    %cst_36 = arith.constant dense<0.000000e+00> : vector<8x384xf32>
    %128 = tpu.matmul %127, %10, %cst_36 {dimension_numbers = #tpu.dot_dimension_numbers<[1], [0], [0], [1], [0, 0, 1, 1], [], []>} : vector<8x128xbf16>, vector<128x384xbf16>, vector<8x384xf32> -> vector<8x384xf32>
    %129 = vector.extract_strided_slice %126 {offsets = [0, 0], sizes = [8, 256], strides = [1, 1]} : vector<8x384xf32> to vector<8x256xf32>
    %130 = vector.extract_strided_slice %128 {offsets = [0, 0], sizes = [8, 256], strides = [1, 1]} : vector<8x384xf32> to vector<8x256xf32>
    %131 = arith.addf %129, %130 : vector<8x256xf32>
    %132 = arith.negf %131 : vector<8x256xf32>
    %133 = math.exp %132 : vector<8x256xf32>
    %cst_37 = arith.constant 1.000000e+00 : f32
    %134 = vector.broadcast %cst_37 : f32 to vector<8x256xf32>
    %135 = arith.addf %134, %133 : vector<8x256xf32>
    %136 = arith.divf %134, %135 : vector<8x256xf32>
    %137 = vector.extract_strided_slice %136 {offsets = [0, 0], sizes = [8, 128], strides = [1, 1]} : vector<8x256xf32> to vector<8x128xf32>
    %138 = vector.extract_strided_slice %136 {offsets = [0, 128], sizes = [8, 128], strides = [1, 1]} : vector<8x256xf32> to vector<8x128xf32>
    %139 = vector.extract_strided_slice %126 {offsets = [0, 256], sizes = [8, 128], strides = [1, 1]} : vector<8x384xf32> to vector<8x128xf32>
    %140 = vector.extract_strided_slice %128 {offsets = [0, 256], sizes = [8, 128], strides = [1, 1]} : vector<8x384xf32> to vector<8x128xf32>
    %141 = arith.addf %140, %13 : vector<8x128xf32>
    %142 = arith.mulf %137, %141 : vector<8x128xf32>
    %143 = arith.addf %139, %142 : vector<8x128xf32>
    %144 = math.tanh %143 : vector<8x128xf32>
    %145 = arith.subf %120, %144 : vector<8x128xf32>
    %146 = arith.mulf %138, %145 : vector<8x128xf32>
    %147 = arith.addf %144, %146 : vector<8x128xf32>
    %148 = arith.index_cast %124 : i32 to index
    %c0_38 = arith.constant 0 : index
    %149 = vector.load %arg9[%148, %c0_38] : memref<64x128xf32, #tpu.memory_space<vmem>>, vector<8x128xf32>
    tpu.vector_store %arg9[%148, %c0_38], %147 {strides = array<i32>} : memref<64x128xf32, #tpu.memory_space<vmem>>, vector<8x128xf32>,
    %c5_i32 = arith.constant 5 : i32
    %c8_i32_39 = arith.constant 8 : i32
    %150 = arith.muli %c5_i32, %c8_i32_39 : i32
    %151 = tpu.assume_multiple %150, 8 : i32
    %152 = arith.index_cast %151 : i32 to index
    %c0_40 = arith.constant 0 : index
    %153 = vector.load %arg8[%152, %c0_40] : memref<64x384xf32, #tpu.memory_space<vmem>>, vector<8x384xf32>
    %154 = arith.truncf %147 : vector<8x128xf32> to vector<8x128xbf16>
    %cst_41 = arith.constant dense<0.000000e+00> : vector<8x384xf32>
    %155 = tpu.matmul %154, %10, %cst_41 {dimension_numbers = #tpu.dot_dimension_numbers<[1], [0], [0], [1], [0, 0, 1, 1], [], []>} : vector<8x128xbf16>, vector<128x384xbf16>, vector<8x384xf32> -> vector<8x384xf32>
    %156 = vector.extract_strided_slice %153 {offsets = [0, 0], sizes = [8, 256], strides = [1, 1]} : vector<8x384xf32> to vector<8x256xf32>
    %157 = vector.extract_strided_slice %155 {offsets = [0, 0], sizes = [8, 256], strides = [1, 1]} : vector<8x384xf32> to vector<8x256xf32>
    %158 = arith.addf %156, %157 : vector<8x256xf32>
    %159 = arith.negf %158 : vector<8x256xf32>
    %160 = math.exp %159 : vector<8x256xf32>
    %cst_42 = arith.constant 1.000000e+00 : f32
    %161 = vector.broadcast %cst_42 : f32 to vector<8x256xf32>
    %162 = arith.addf %161, %160 : vector<8x256xf32>
    %163 = arith.divf %161, %162 : vector<8x256xf32>
    %164 = vector.extract_strided_slice %163 {offsets = [0, 0], sizes = [8, 128], strides = [1, 1]} : vector<8x256xf32> to vector<8x128xf32>
    %165 = vector.extract_strided_slice %163 {offsets = [0, 128], sizes = [8, 128], strides = [1, 1]} : vector<8x256xf32> to vector<8x128xf32>
    %166 = vector.extract_strided_slice %153 {offsets = [0, 256], sizes = [8, 128], strides = [1, 1]} : vector<8x384xf32> to vector<8x128xf32>
    %167 = vector.extract_strided_slice %155 {offsets = [0, 256], sizes = [8, 128], strides = [1, 1]} : vector<8x384xf32> to vector<8x128xf32>
    %168 = arith.addf %167, %13 : vector<8x128xf32>
    %169 = arith.mulf %164, %168 : vector<8x128xf32>
    %170 = arith.addf %166, %169 : vector<8x128xf32>
    %171 = math.tanh %170 : vector<8x128xf32>
    %172 = arith.subf %147, %171 : vector<8x128xf32>
    %173 = arith.mulf %165, %172 : vector<8x128xf32>
    %174 = arith.addf %171, %173 : vector<8x128xf32>
    %175 = arith.index_cast %151 : i32 to index
    %c0_43 = arith.constant 0 : index
    %176 = vector.load %arg9[%175, %c0_43] : memref<64x128xf32, #tpu.memory_space<vmem>>, vector<8x128xf32>
    tpu.vector_store %arg9[%175, %c0_43], %174 {strides = array<i32>} : memref<64x128xf32, #tpu.memory_space<vmem>>, vector<8x128xf32>,
    %c6_i32 = arith.constant 6 : i32
    %c8_i32_44 = arith.constant 8 : i32
    %177 = arith.muli %c6_i32, %c8_i32_44 : i32
    %178 = tpu.assume_multiple %177, 8 : i32
    %179 = arith.index_cast %178 : i32 to index
    %c0_45 = arith.constant 0 : index
    %180 = vector.load %arg8[%179, %c0_45] : memref<64x384xf32, #tpu.memory_space<vmem>>, vector<8x384xf32>
    %181 = arith.truncf %174 : vector<8x128xf32> to vector<8x128xbf16>
    %cst_46 = arith.constant dense<0.000000e+00> : vector<8x384xf32>
    %182 = tpu.matmul %181, %10, %cst_46 {dimension_numbers = #tpu.dot_dimension_numbers<[1], [0], [0], [1], [0, 0, 1, 1], [], []>} : vector<8x128xbf16>, vector<128x384xbf16>, vector<8x384xf32> -> vector<8x384xf32>
    %183 = vector.extract_strided_slice %180 {offsets = [0, 0], sizes = [8, 256], strides = [1, 1]} : vector<8x384xf32> to vector<8x256xf32>
    %184 = vector.extract_strided_slice %182 {offsets = [0, 0], sizes = [8, 256], strides = [1, 1]} : vector<8x384xf32> to vector<8x256xf32>
    %185 = arith.addf %183, %184 : vector<8x256xf32>
    %186 = arith.negf %185 : vector<8x256xf32>
    %187 = math.exp %186 : vector<8x256xf32>
    %cst_47 = arith.constant 1.000000e+00 : f32
    %188 = vector.broadcast %cst_47 : f32 to vector<8x256xf32>
    %189 = arith.addf %188, %187 : vector<8x256xf32>
    %190 = arith.divf %188, %189 : vector<8x256xf32>
    %191 = vector.extract_strided_slice %190 {offsets = [0, 0], sizes = [8, 128], strides = [1, 1]} : vector<8x256xf32> to vector<8x128xf32>
    %192 = vector.extract_strided_slice %190 {offsets = [0, 128], sizes = [8, 128], strides = [1, 1]} : vector<8x256xf32> to vector<8x128xf32>
    %193 = vector.extract_strided_slice %180 {offsets = [0, 256], sizes = [8, 128], strides = [1, 1]} : vector<8x384xf32> to vector<8x128xf32>
    %194 = vector.extract_strided_slice %182 {offsets = [0, 256], sizes = [8, 128], strides = [1, 1]} : vector<8x384xf32> to vector<8x128xf32>
    %195 = arith.addf %194, %13 : vector<8x128xf32>
    %196 = arith.mulf %191, %195 : vector<8x128xf32>
    %197 = arith.addf %193, %196 : vector<8x128xf32>
    %198 = math.tanh %197 : vector<8x128xf32>
    %199 = arith.subf %174, %198 : vector<8x128xf32>
    %200 = arith.mulf %192, %199 : vector<8x128xf32>
    %201 = arith.addf %198, %200 : vector<8x128xf32>
    %202 = arith.index_cast %178 : i32 to index
    %c0_48 = arith.constant 0 : index
    %203 = vector.load %arg9[%202, %c0_48] : memref<64x128xf32, #tpu.memory_space<vmem>>, vector<8x128xf32>
    tpu.vector_store %arg9[%202, %c0_48], %201 {strides = array<i32>} : memref<64x128xf32, #tpu.memory_space<vmem>>, vector<8x128xf32>,
    %c7_i32 = arith.constant 7 : i32
    %c8_i32_49 = arith.constant 8 : i32
    %204 = arith.muli %c7_i32, %c8_i32_49 : i32
    %205 = tpu.assume_multiple %204, 8 : i32
    %206 = arith.index_cast %205 : i32 to index
    %c0_50 = arith.constant 0 : index
    %207 = vector.load %arg8[%206, %c0_50] : memref<64x384xf32, #tpu.memory_space<vmem>>, vector<8x384xf32>
    %208 = arith.truncf %201 : vector<8x128xf32> to vector<8x128xbf16>
    %cst_51 = arith.constant dense<0.000000e+00> : vector<8x384xf32>
    %209 = tpu.matmul %208, %10, %cst_51 {dimension_numbers = #tpu.dot_dimension_numbers<[1], [0], [0], [1], [0, 0, 1, 1], [], []>} : vector<8x128xbf16>, vector<128x384xbf16>, vector<8x384xf32> -> vector<8x384xf32>
    %210 = vector.extract_strided_slice %207 {offsets = [0, 0], sizes = [8, 256], strides = [1, 1]} : vector<8x384xf32> to vector<8x256xf32>
    %211 = vector.extract_strided_slice %209 {offsets = [0, 0], sizes = [8, 256], strides = [1, 1]} : vector<8x384xf32> to vector<8x256xf32>
    %212 = arith.addf %210, %211 : vector<8x256xf32>
    %213 = arith.negf %212 : vector<8x256xf32>
    %214 = math.exp %213 : vector<8x256xf32>
    %cst_52 = arith.constant 1.000000e+00 : f32
    %215 = vector.broadcast %cst_52 : f32 to vector<8x256xf32>
    %216 = arith.addf %215, %214 : vector<8x256xf32>
    %217 = arith.divf %215, %216 : vector<8x256xf32>
    %218 = vector.extract_strided_slice %217 {offsets = [0, 0], sizes = [8, 128], strides = [1, 1]} : vector<8x256xf32> to vector<8x128xf32>
    %219 = vector.extract_strided_slice %217 {offsets = [0, 128], sizes = [8, 128], strides = [1, 1]} : vector<8x256xf32> to vector<8x128xf32>
    %220 = vector.extract_strided_slice %207 {offsets = [0, 256], sizes = [8, 128], strides = [1, 1]} : vector<8x384xf32> to vector<8x128xf32>
    %221 = vector.extract_strided_slice %209 {offsets = [0, 256], sizes = [8, 128], strides = [1, 1]} : vector<8x384xf32> to vector<8x128xf32>
    %222 = arith.addf %221, %13 : vector<8x128xf32>
    %223 = arith.mulf %218, %222 : vector<8x128xf32>
    %224 = arith.addf %220, %223 : vector<8x128xf32>
    %225 = math.tanh %224 : vector<8x128xf32>
    %226 = arith.subf %201, %225 : vector<8x128xf32>
    %227 = arith.mulf %219, %226 : vector<8x128xf32>
    %228 = arith.addf %225, %227 : vector<8x128xf32>
    %229 = arith.index_cast %205 : i32 to index
    %c0_53 = arith.constant 0 : index
    %230 = vector.load %arg9[%229, %c0_53] : memref<64x128xf32, #tpu.memory_space<vmem>>, vector<8x128xf32>
    tpu.vector_store %arg9[%229, %c0_53], %228 {strides = array<i32>} : memref<64x128xf32, #tpu.memory_space<vmem>>, vector<8x128xf32>,
    %c8_i32_54 = arith.constant 8 : i32
    %c0_55 = arith.constant 0 : index
    %c0_56 = arith.constant 0 : index
    %231 = vector.load %arg7[%c0_55, %c0_56] : memref<8x128xf32, #tpu.memory_space<vmem>>, vector<8x128xf32>
    tpu.vector_store %arg7[%c0_55, %c0_56], %228 {strides = array<i32>} : memref<8x128xf32, #tpu.memory_space<vmem>>, vector<8x128xf32>,
    %c0_57 = arith.constant 0 : index
    %c0_58 = arith.constant 0 : index
    %232 = vector.load %arg9[%c0_57, %c0_58] : memref<64x128xf32, #tpu.memory_space<vmem>>, vector<64x128xf32>
    %233 = arith.truncf %232 : vector<64x128xf32> to vector<64x128xbf16>
    %c0_59 = arith.constant 0 : index
    %c0_60 = arith.constant 0 : index
    %234 = vector.load %arg6[%c0_59, %c0_60] : memref<64x128xbf16, #tpu.memory_space<vmem>>, vector<64x128xbf16>
    tpu.vector_store %arg6[%c0_59, %c0_60], %233 {strides = array<i32>} : memref<64x128xbf16, #tpu.memory_space<vmem>>, vector<64x128xbf16>,
    return
  }
  func.func @transform_0(%arg0: i32) -> (i32, i32) {
    %c0_i32 = arith.constant 0 : i32
    %c0_i32_0 = arith.constant 0 : i32
    return %arg0, %c0_i32 : i32, i32
  }
  func.func @transform_1(%arg0: i32) -> (i32, i32) {
    %c0_i32 = arith.constant 0 : i32
    %c0_i32_0 = arith.constant 0 : i32
    %c0_i32_1 = arith.constant 0 : i32
    return %c0_i32, %c0_i32_0 : i32, i32
  }
  func.func @transform_2(%arg0: i32) -> (i32, i32) {
    %c0_i32 = arith.constant 0 : i32
    %c0_i32_0 = arith.constant 0 : i32
    %c0_i32_1 = arith.constant 0 : i32
    return %c0_i32, %c0_i32_0 : i32, i32
  }
  func.func @transform_3(%arg0: i32) -> (i32, i32) {
    %c0_i32 = arith.constant 0 : i32
    %c0_i32_0 = arith.constant 0 : i32
    %c0_i32_1 = arith.constant 0 : i32
    return %c0_i32, %c0_i32_0 : i32, i32
  }
  func.func @transform_4(%arg0: i32) -> (i32, i32) {
    %c0_i32 = arith.constant 0 : i32
    %c0_i32_0 = arith.constant 0 : i32
    %c0_i32_1 = arith.constant 0 : i32
    return %c0_i32, %c0_i32_0 : i32, i32
  }
  func.func @transform_5(%arg0: i32) -> (i32, i32) {
    %c0_i32 = arith.constant 0 : i32
    %c0_i32_0 = arith.constant 0 : i32
    return %arg0, %c0_i32 : i32, i32
  }
}

module attributes {stable_mosaic.version = 11 : i64} {
  func.func @gru_layer_kernel(%arg0: i32, %arg1: memref<64x128xbf16, #tpu.memory_space<vmem>>, %arg2: memref<128x384xbf16, #tpu.memory_space<vmem>>, %arg3: memref<128x384xbf16, #tpu.memory_space<vmem>>, %arg4: memref<1x384xf32, #tpu.memory_space<vmem>>, %arg5: memref<1x128xf32, #tpu.memory_space<vmem>>, %arg6: memref<64x128xbf16, #tpu.memory_space<vmem>>, %arg7: memref<8x128xf32, #tpu.memory_space<vmem>>, %arg8: memref<64x384xf32, #tpu.memory_space<vmem>>, %arg9: memref<64x128xf32, #tpu.memory_space<vmem>>) attributes {dimension_semantics = [#tpu.dimension_semantics<arbitrary>], iteration_bounds = array<i64: 1>, scalar_prefetch = 0 : i64, scratch_operands = 3 : i64, tpu.core_type = #tpu.core_type<tc>, window_params = [{transform_indices = @transform_0, window_bounds = array<i64: 64, 128>}, {pipeline_mode = #tpu.pipeline_mode<synchronous>, transform_indices = @transform_1, window_bounds = array<i64: 128, 384>}, {pipeline_mode = #tpu.pipeline_mode<synchronous>, transform_indices = @transform_2, window_bounds = array<i64: 128, 384>}, {pipeline_mode = #tpu.pipeline_mode<synchronous>, transform_indices = @transform_3, window_bounds = array<i64: 1, 384>}, {pipeline_mode = #tpu.pipeline_mode<synchronous>, transform_indices = @transform_4, window_bounds = array<i64: 1, 128>}, {transform_indices = @transform_5, window_bounds = array<i64: 64, 128>}]} {
    %c0_i32 = arith.constant 0 : i32
    %0 = arith.cmpi eq, %arg0, %c0_i32 : i32
    %1 = arith.extui %0 : i1 to i32
    %c0_i32_0 = arith.constant 0 : i32
    %2 = arith.cmpi ne, %1, %c0_i32_0 : i32
    scf.if %2 {
      %cst_61 = arith.constant 0.000000e+00 : f32
      %235 = vector.broadcast %cst_61 : f32 to vector<8x128xf32>
      %c0_62 = arith.constant 0 : index
      %c0_63 = arith.constant 0 : index
      %236 = vector.load %arg7[%c0_62, %c0_63] : memref<8x128xf32, #tpu.memory_space<vmem>>, vector<8x128xf32>
      tpu.vector_store %arg7[%c0_62, %c0_63], %235 {strides = array<i32>} : memref<8x128xf32, #tpu.memory_space<vmem>>, vector<8x128xf32>,
    } else {
    }
    %c0 = arith.constant 0 : index
    %c0_1 = arith.constant 0 : index
    %3 = vector.load %arg1[%c0, %c0_1] : memref<64x128xbf16, #tpu.memory_space<vmem>>, vector<64x128xbf16>
    %c0_2 = arith.constant 0 : index
    %c0_3 = arith.constant 0 : index
    %4 = vector.load %arg2[%c0_2, %c0_3] : memref<128x384xbf16, #tpu.memory_space<vmem>>, vector<128x384xbf16>
    %cst = arith.constant dense<0.000000e+00> : vector<64x384xf32>
    %5 = tpu.matmul %3, %4, %cst {dimension_numbers = #tpu.dot_dimension_numbers<[1], [0], [0], [1], [0, 0, 1, 1], [], []>} : vector<64x128xbf16>, vector<128x384xbf16>, vector<64x384xf32> -> vector<64x384xf32>
    %c0_4 = arith.constant 0 : index
    %c0_5 = arith.constant 0 : index
    %6 = vector.load %arg4[%c0_4, %c0_5] : memref<1x384xf32, #tpu.memory_space<vmem>>, vector<1x384xf32>
    %7 = vector.broadcast %6 : vector<1x384xf32> to vector<64x384xf32>
    %8 = arith.addf %5, %7 : vector<64x384xf32>
    %c0_6 = arith.constant 0 : index
    %c0_7 = arith.constant 0 : index
    %9 = vector.load %arg8[%c0_6, %c0_7] : memref<64x384xf32, #tpu.memory_space<vmem>>, vector<64x384xf32>
    tpu.vector_store %arg8[%c0_6, %c0_7], %8 {strides = array<i32>} : memref<64x384xf32, #tpu.memory_space<vmem>>, vector<64x384xf32>,
    %c0_8 = arith.constant 0 : index
    %c0_9 = arith.constant 0 : index
    %10 = vector.load %arg3[%c0_8, %c0_9] : memref<128x384xbf16, #tpu.memory_space<vmem>>, vector<128x384xbf16>
    %c0_10 = arith.constant 0 : index
    %c0_11 = arith.constant 0 : index
    %11 = vector.load %arg5[%c0_10, %c0_11] : memref<1x128xf32, #tpu.memory_space<vmem>>, vector<1x128xf32>
    %12 = vector.shape_cast %11 : vector<1x128xf32> to vector<1x128xf32>
    %13 = vector.broadcast %12 : vector<1x128xf32> to vector<8x128xf32>
    %c0_12 = arith.constant 0 : index
    %c0_13 = arith.constant 0 : index
    %14 = vector.load %arg7[%c0_12, %c0_13] : memref<8x128xf32, #tpu.memory_space<vmem>>, vector<8x128xf32>
    %c0_i32_14 = arith.constant 0 : i32
    %c8_i32 = arith.constant 8 : i32
    %15 = arith.muli %c0_i32_14, %c8_i32 : i32
    %16 = tpu.assume_multiple %15, 8 : i32
    %17 = arith.index_cast %16 : i32 to index
    %c0_15 = arith.constant 0 : index
    %18 = vector.load %arg8[%17, %c0_15] : memref<64x384xf32, #tpu.memory_space<vmem>>, vector<8x384xf32>
    %19 = arith.truncf %14 : vector<8x128xf32> to vector<8x128xbf16>
    %cst_16 = arith.constant dense<0.000000e+00> : vector<8x384xf32>
    %20 = tpu.matmul %19, %10, %cst_16 {dimension_numbers = #tpu.dot_dimension_numbers<[1], [0], [0], [1], [0, 0, 1, 1], [], []>} : vector<8x128xbf16>, vector<128x384xbf16>, vector<8x384xf32> -> vector<8x384xf32>
    %21 = vector.extract_strided_slice %18 {offsets = [0, 0], sizes = [8, 256], strides = [1, 1]} : vector<8x384xf32> to vector<8x256xf32>
    %22 = vector.extract_strided_slice %20 {offsets = [0, 0], sizes = [8, 256], strides = [1, 1]} : vector<8x384xf32> to vector<8x256xf32>
    %23 = arith.addf %21, %22 : vector<8x256xf32>
    %24 = arith.negf %23 : vector<8x256xf32>
    %25 = math.exp %24 : vector<8x256xf32>
    %cst_17 = arith.constant 1.000000e+00 : f32
    %26 = vector.broadcast %cst_17 : f32 to vector<8x256xf32>
    %27 = arith.addf %26, %25 : vector<8x256xf32>
    %28 = arith.divf %26, %27 : vector<8x256xf32>
    %29 = vector.extract_strided_slice %28 {offsets = [0, 0], sizes = [8, 128], strides = [1, 1]} : vector<8x256xf32> to vector<8x128xf32>
    %30 = vector.extract_strided_slice %28 {offsets = [0, 128], sizes = [8, 128], strides = [1, 1]} : vector<8x256xf32> to vector<8x128xf32>
    %31 = vector.extract_strided_slice %18 {offsets = [0, 256], sizes = [8, 128], strides = [1, 1]} : vector<8x384xf32> to vector<8x128xf32>
    %32 = vector.extract_strided_slice %20 {offsets = [0, 256], sizes = [8, 128], strides = [1, 1]} : vector<8x384xf32> to vector<8x128xf32>
    %33 = arith.addf %32, %13 : vector<8x128xf32>
    %34 = arith.mulf %29, %33 : vector<8x128xf32>
    %35 = arith.addf %31, %34 : vector<8x128xf32>
    %36 = math.tanh %35 : vector<8x128xf32>
    %37 = arith.subf %14, %36 : vector<8x128xf32>
    %38 = arith.mulf %30, %37 : vector<8x128xf32>
    %39 = arith.addf %36, %38 : vector<8x128xf32>
    %40 = arith.index_cast %16 : i32 to index
    %c0_18 = arith.constant 0 : index
    %41 = vector.load %arg9[%40, %c0_18] : memref<64x128xf32, #tpu.memory_space<vmem>>, vector<8x128xf32>
    tpu.vector_store %arg9[%40, %c0_18], %39 {strides = array<i32>} : memref<64x128xf32, #tpu.memory_space<vmem>>, vector<8x128xf32>,
    %c1_i32 = arith.constant 1 : i32
    %c8_i32_19 = arith.constant 8 : i32
    %42 = arith.muli %c1_i32, %c8_i32_19 : i32
    %43 = tpu.assume_multiple %42, 8 : i32
    %44 = arith.index_cast %43 : i32 to index
    %c0_20 = arith.constant 0 : index
    %45 = vector.load %arg8[%44, %c0_20] : memref<64x384xf32, #tpu.memory_space<vmem>>, vector<8x384xf32>
    %46 = arith.truncf %39 : vector<8x128xf32> to vector<8x128xbf16>
    %cst_21 = arith.constant dense<0.000000e+00> : vector<8x384xf32>
    %47 = tpu.matmul %46, %10, %cst_21 {dimension_numbers = #tpu.dot_dimension_numbers<[1], [0], [0], [1], [0, 0, 1, 1], [], []>} : vector<8x128xbf16>, vector<128x384xbf16>, vector<8x384xf32> -> vector<8x384xf32>
    %48 = vector.extract_strided_slice %45 {offsets = [0, 0], sizes = [8, 256], strides = [1, 1]} : vector<8x384xf32> to vector<8x256xf32>
    %49 = vector.extract_strided_slice %47 {offsets = [0, 0], sizes = [8, 256], strides = [1, 1]} : vector<8x384xf32> to vector<8x256xf32>
    %50 = arith.addf %48, %49 : vector<8x256xf32>
    %51 = arith.negf %50 : vector<8x256xf32>
    %52 = math.exp %51 : vector<8x256xf32>
    %cst_22 = arith.constant 1.000000e+00 : f32
    %53 = vector.broadcast %cst_22 : f32 to vector<8x256xf32>
    %54 = arith.addf %53, %52 : vector<8x256xf32>
    %55 = arith.divf %53, %54 : vector<8x256xf32>
    %56 = vector.extract_strided_slice %55 {offsets = [0, 0], sizes = [8, 128], strides = [1, 1]} : vector<8x256xf32> to vector<8x128xf32>
    %57 = vector.extract_strided_slice %55 {offsets = [0, 128], sizes = [8, 128], strides = [1, 1]} : vector<8x256xf32> to vector<8x128xf32>
    %58 = vector.extract_strided_slice %45 {offsets = [0, 256], sizes = [8, 128], strides = [1, 1]} : vector<8x384xf32> to vector<8x128xf32>
    %59 = vector.extract_strided_slice %47 {offsets = [0, 256], sizes = [8, 128], strides = [1, 1]} : vector<8x384xf32> to vector<8x128xf32>
    %60 = arith.addf %59, %13 : vector<8x128xf32>
    %61 = arith.mulf %56, %60 : vector<8x128xf32>
    %62 = arith.addf %58, %61 : vector<8x128xf32>
    %63 = math.tanh %62 : vector<8x128xf32>
    %64 = arith.subf %39, %63 : vector<8x128xf32>
    %65 = arith.mulf %57, %64 : vector<8x128xf32>
    %66 = arith.addf %63, %65 : vector<8x128xf32>
    %67 = arith.index_cast %43 : i32 to index
    %c0_23 = arith.constant 0 : index
    %68 = vector.load %arg9[%67, %c0_23] : memref<64x128xf32, #tpu.memory_space<vmem>>, vector<8x128xf32>
    tpu.vector_store %arg9[%67, %c0_23], %66 {strides = array<i32>} : memref<64x128xf32, #tpu.memory_space<vmem>>, vector<8x128xf32>,
    %c2_i32 = arith.constant 2 : i32
    %c8_i32_24 = arith.constant 8 : i32
    %69 = arith.muli %c2_i32, %c8_i32_24 : i32
    %70 = tpu.assume_multiple %69, 8 : i32
    %71 = arith.index_cast %70 : i32 to index
    %c0_25 = arith.constant 0 : index
    %72 = vector.load %arg8[%71, %c0_25] : memref<64x384xf32, #tpu.memory_space<vmem>>, vector<8x384xf32>
    %73 = arith.truncf %66 : vector<8x128xf32> to vector<8x128xbf16>
    %cst_26 = arith.constant dense<0.000000e+00> : vector<8x384xf32>
    %74 = tpu.matmul %73, %10, %cst_26 {dimension_numbers = #tpu.dot_dimension_numbers<[1], [0], [0], [1], [0, 0, 1, 1], [], []>} : vector<8x128xbf16>, vector<128x384xbf16>, vector<8x384xf32> -> vector<8x384xf32>
    %75 = vector.extract_strided_slice %72 {offsets = [0, 0], sizes = [8, 256], strides = [1, 1]} : vector<8x384xf32> to vector<8x256xf32>
    %76 = vector.extract_strided_slice %74 {offsets = [0, 0], sizes = [8, 256], strides = [1, 1]} : vector<8x384xf32> to vector<8x256xf32>
    %77 = arith.addf %75, %76 : vector<8x256xf32>
    %78 = arith.negf %77 : vector<8x256xf32>
    %79 = math.exp %78 : vector<8x256xf32>
    %cst_27 = arith.constant 1.000000e+00 : f32
    %80 = vector.broadcast %cst_27 : f32 to vector<8x256xf32>
    %81 = arith.addf %80, %79 : vector<8x256xf32>
    %82 = arith.divf %80, %81 : vector<8x256xf32>
    %83 = vector.extract_strided_slice %82 {offsets = [0, 0], sizes = [8, 128], strides = [1, 1]} : vector<8x256xf32> to vector<8x128xf32>
    %84 = vector.extract_strided_slice %82 {offsets = [0, 128], sizes = [8, 128], strides = [1, 1]} : vector<8x256xf32> to vector<8x128xf32>
    %85 = vector.extract_strided_slice %72 {offsets = [0, 256], sizes = [8, 128], strides = [1, 1]} : vector<8x384xf32> to vector<8x128xf32>
    %86 = vector.extract_strided_slice %74 {offsets = [0, 256], sizes = [8, 128], strides = [1, 1]} : vector<8x384xf32> to vector<8x128xf32>
    %87 = arith.addf %86, %13 : vector<8x128xf32>
    %88 = arith.mulf %83, %87 : vector<8x128xf32>
    %89 = arith.addf %85, %88 : vector<8x128xf32>
    %90 = math.tanh %89 : vector<8x128xf32>
    %91 = arith.subf %66, %90 : vector<8x128xf32>
    %92 = arith.mulf %84, %91 : vector<8x128xf32>
    %93 = arith.addf %90, %92 : vector<8x128xf32>
    %94 = arith.index_cast %70 : i32 to index
    %c0_28 = arith.constant 0 : index
    %95 = vector.load %arg9[%94, %c0_28] : memref<64x128xf32, #tpu.memory_space<vmem>>, vector<8x128xf32>
    tpu.vector_store %arg9[%94, %c0_28], %93 {strides = array<i32>} : memref<64x128xf32, #tpu.memory_space<vmem>>, vector<8x128xf32>,
    %c3_i32 = arith.constant 3 : i32
    %c8_i32_29 = arith.constant 8 : i32
    %96 = arith.muli %c3_i32, %c8_i32_29 : i32
    %97 = tpu.assume_multiple %96, 8 : i32
    %98 = arith.index_cast %97 : i32 to index
    %c0_30 = arith.constant 0 : index
    %99 = vector.load %arg8[%98, %c0_30] : memref<64x384xf32, #tpu.memory_space<vmem>>, vector<8x384xf32>
    %100 = arith.truncf %93 : vector<8x128xf32> to vector<8x128xbf16>
    %cst_31 = arith.constant dense<0.000000e+00> : vector<8x384xf32>
    %101 = tpu.matmul %100, %10, %cst_31 {dimension_numbers = #tpu.dot_dimension_numbers<[1], [0], [0], [1], [0, 0, 1, 1], [], []>} : vector<8x128xbf16>, vector<128x384xbf16>, vector<8x384xf32> -> vector<8x384xf32>
    %102 = vector.extract_strided_slice %99 {offsets = [0, 0], sizes = [8, 256], strides = [1, 1]} : vector<8x384xf32> to vector<8x256xf32>
    %103 = vector.extract_strided_slice %101 {offsets = [0, 0], sizes = [8, 256], strides = [1, 1]} : vector<8x384xf32> to vector<8x256xf32>
    %104 = arith.addf %102, %103 : vector<8x256xf32>
    %105 = arith.negf %104 : vector<8x256xf32>
    %106 = math.exp %105 : vector<8x256xf32>
    %cst_32 = arith.constant 1.000000e+00 : f32
    %107 = vector.broadcast %cst_32 : f32 to vector<8x256xf32>
    %108 = arith.addf %107, %106 : vector<8x256xf32>
    %109 = arith.divf %107, %108 : vector<8x256xf32>
    %110 = vector.extract_strided_slice %109 {offsets = [0, 0], sizes = [8, 128], strides = [1, 1]} : vector<8x256xf32> to vector<8x128xf32>
    %111 = vector.extract_strided_slice %109 {offsets = [0, 128], sizes = [8, 128], strides = [1, 1]} : vector<8x256xf32> to vector<8x128xf32>
    %112 = vector.extract_strided_slice %99 {offsets = [0, 256], sizes = [8, 128], strides = [1, 1]} : vector<8x384xf32> to vector<8x128xf32>
    %113 = vector.extract_strided_slice %101 {offsets = [0, 256], sizes = [8, 128], strides = [1, 1]} : vector<8x384xf32> to vector<8x128xf32>
    %114 = arith.addf %113, %13 : vector<8x128xf32>
    %115 = arith.mulf %110, %114 : vector<8x128xf32>
    %116 = arith.addf %112, %115 : vector<8x128xf32>
    %117 = math.tanh %116 : vector<8x128xf32>
    %118 = arith.subf %93, %117 : vector<8x128xf32>
    %119 = arith.mulf %111, %118 : vector<8x128xf32>
    %120 = arith.addf %117, %119 : vector<8x128xf32>
    %121 = arith.index_cast %97 : i32 to index
    %c0_33 = arith.constant 0 : index
    %122 = vector.load %arg9[%121, %c0_33] : memref<64x128xf32, #tpu.memory_space<vmem>>, vector<8x128xf32>
    tpu.vector_store %arg9[%121, %c0_33], %120 {strides = array<i32>} : memref<64x128xf32, #tpu.memory_space<vmem>>, vector<8x128xf32>,
    %c4_i32 = arith.constant 4 : i32
    %c8_i32_34 = arith.constant 8 : i32
    %123 = arith.muli %c4_i32, %c8_i32_34 : i32
    %124 = tpu.assume_multiple %123, 8 : i32
    %125 = arith.index_cast %124 : i32 to index
    %c0_35 = arith.constant 0 : index
    %126 = vector.load %arg8[%125, %c0_35] : memref<64x384xf32, #tpu.memory_space<vmem>>, vector<8x384xf32>
    %127 = arith.truncf %120 : vector<8x128xf32> to vector<8x128xbf16>
    %cst_36 = arith.constant dense<0.000000e+00> : vector<8x384xf32>
    %128 = tpu.matmul %127, %10, %cst_36 {dimension_numbers = #tpu.dot_dimension_numbers<[1], [0], [0], [1], [0, 0, 1, 1], [], []>} : vector<8x128xbf16>, vector<128x384xbf16>, vector<8x384xf32> -> vector<8x384xf32>
    %129 = vector.extract_strided_slice %126 {offsets = [0, 0], sizes = [8, 256], strides = [1, 1]} : vector<8x384xf32> to vector<8x256xf32>
    %130 = vector.extract_strided_slice %128 {offsets = [0, 0], sizes = [8, 256], strides = [1, 1]} : vector<8x384xf32> to vector<8x256xf32>
    %131 = arith.addf %129, %130 : vector<8x256xf32>
    %132 = arith.negf %131 : vector<8x256xf32>
    %133 = math.exp %132 : vector<8x256xf32>
    %cst_37 = arith.constant 1.000000e+00 : f32
    %134 = vector.broadcast %cst_37 : f32 to vector<8x256xf32>
    %135 = arith.addf %134, %133 : vector<8x256xf32>
    %136 = arith.divf %134, %135 : vector<8x256xf32>
    %137 = vector.extract_strided_slice %136 {offsets = [0, 0], sizes = [8, 128], strides = [1, 1]} : vector<8x256xf32> to vector<8x128xf32>
    %138 = vector.extract_strided_slice %136 {offsets = [0, 128], sizes = [8, 128], strides = [1, 1]} : vector<8x256xf32> to vector<8x128xf32>
    %139 = vector.extract_strided_slice %126 {offsets = [0, 256], sizes = [8, 128], strides = [1, 1]} : vector<8x384xf32> to vector<8x128xf32>
    %140 = vector.extract_strided_slice %128 {offsets = [0, 256], sizes = [8, 128], strides = [1, 1]} : vector<8x384xf32> to vector<8x128xf32>
    %141 = arith.addf %140, %13 : vector<8x128xf32>
    %142 = arith.mulf %137, %141 : vector<8x128xf32>
    %143 = arith.addf %139, %142 : vector<8x128xf32>
    %144 = math.tanh %143 : vector<8x128xf32>
    %145 = arith.subf %120, %144 : vector<8x128xf32>
    %146 = arith.mulf %138, %145 : vector<8x128xf32>
    %147 = arith.addf %144, %146 : vector<8x128xf32>
    %148 = arith.index_cast %124 : i32 to index
    %c0_38 = arith.constant 0 : index
    %149 = vector.load %arg9[%148, %c0_38] : memref<64x128xf32, #tpu.memory_space<vmem>>, vector<8x128xf32>
    tpu.vector_store %arg9[%148, %c0_38], %147 {strides = array<i32>} : memref<64x128xf32, #tpu.memory_space<vmem>>, vector<8x128xf32>,
    %c5_i32 = arith.constant 5 : i32
    %c8_i32_39 = arith.constant 8 : i32
    %150 = arith.muli %c5_i32, %c8_i32_39 : i32
    %151 = tpu.assume_multiple %150, 8 : i32
    %152 = arith.index_cast %151 : i32 to index
    %c0_40 = arith.constant 0 : index
    %153 = vector.load %arg8[%152, %c0_40] : memref<64x384xf32, #tpu.memory_space<vmem>>, vector<8x384xf32>
    %154 = arith.truncf %147 : vector<8x128xf32> to vector<8x128xbf16>
    %cst_41 = arith.constant dense<0.000000e+00> : vector<8x384xf32>
    %155 = tpu.matmul %154, %10, %cst_41 {dimension_numbers = #tpu.dot_dimension_numbers<[1], [0], [0], [1], [0, 0, 1, 1], [], []>} : vector<8x128xbf16>, vector<128x384xbf16>, vector<8x384xf32> -> vector<8x384xf32>
    %156 = vector.extract_strided_slice %153 {offsets = [0, 0], sizes = [8, 256], strides = [1, 1]} : vector<8x384xf32> to vector<8x256xf32>
    %157 = vector.extract_strided_slice %155 {offsets = [0, 0], sizes = [8, 256], strides = [1, 1]} : vector<8x384xf32> to vector<8x256xf32>
    %158 = arith.addf %156, %157 : vector<8x256xf32>
    %159 = arith.negf %158 : vector<8x256xf32>
    %160 = math.exp %159 : vector<8x256xf32>
    %cst_42 = arith.constant 1.000000e+00 : f32
    %161 = vector.broadcast %cst_42 : f32 to vector<8x256xf32>
    %162 = arith.addf %161, %160 : vector<8x256xf32>
    %163 = arith.divf %161, %162 : vector<8x256xf32>
    %164 = vector.extract_strided_slice %163 {offsets = [0, 0], sizes = [8, 128], strides = [1, 1]} : vector<8x256xf32> to vector<8x128xf32>
    %165 = vector.extract_strided_slice %163 {offsets = [0, 128], sizes = [8, 128], strides = [1, 1]} : vector<8x256xf32> to vector<8x128xf32>
    %166 = vector.extract_strided_slice %153 {offsets = [0, 256], sizes = [8, 128], strides = [1, 1]} : vector<8x384xf32> to vector<8x128xf32>
    %167 = vector.extract_strided_slice %155 {offsets = [0, 256], sizes = [8, 128], strides = [1, 1]} : vector<8x384xf32> to vector<8x128xf32>
    %168 = arith.addf %167, %13 : vector<8x128xf32>
    %169 = arith.mulf %164, %168 : vector<8x128xf32>
    %170 = arith.addf %166, %169 : vector<8x128xf32>
    %171 = math.tanh %170 : vector<8x128xf32>
    %172 = arith.subf %147, %171 : vector<8x128xf32>
    %173 = arith.mulf %165, %172 : vector<8x128xf32>
    %174 = arith.addf %171, %173 : vector<8x128xf32>
    %175 = arith.index_cast %151 : i32 to index
    %c0_43 = arith.constant 0 : index
    %176 = vector.load %arg9[%175, %c0_43] : memref<64x128xf32, #tpu.memory_space<vmem>>, vector<8x128xf32>
    tpu.vector_store %arg9[%175, %c0_43], %174 {strides = array<i32>} : memref<64x128xf32, #tpu.memory_space<vmem>>, vector<8x128xf32>,
    %c6_i32 = arith.constant 6 : i32
    %c8_i32_44 = arith.constant 8 : i32
    %177 = arith.muli %c6_i32, %c8_i32_44 : i32
    %178 = tpu.assume_multiple %177, 8 : i32
    %179 = arith.index_cast %178 : i32 to index
    %c0_45 = arith.constant 0 : index
    %180 = vector.load %arg8[%179, %c0_45] : memref<64x384xf32, #tpu.memory_space<vmem>>, vector<8x384xf32>
    %181 = arith.truncf %174 : vector<8x128xf32> to vector<8x128xbf16>
    %cst_46 = arith.constant dense<0.000000e+00> : vector<8x384xf32>
    %182 = tpu.matmul %181, %10, %cst_46 {dimension_numbers = #tpu.dot_dimension_numbers<[1], [0], [0], [1], [0, 0, 1, 1], [], []>} : vector<8x128xbf16>, vector<128x384xbf16>, vector<8x384xf32> -> vector<8x384xf32>
    %183 = vector.extract_strided_slice %180 {offsets = [0, 0], sizes = [8, 256], strides = [1, 1]} : vector<8x384xf32> to vector<8x256xf32>
    %184 = vector.extract_strided_slice %182 {offsets = [0, 0], sizes = [8, 256], strides = [1, 1]} : vector<8x384xf32> to vector<8x256xf32>
    %185 = arith.addf %183, %184 : vector<8x256xf32>
    %186 = arith.negf %185 : vector<8x256xf32>
    %187 = math.exp %186 : vector<8x256xf32>
    %cst_47 = arith.constant 1.000000e+00 : f32
    %188 = vector.broadcast %cst_47 : f32 to vector<8x256xf32>
    %189 = arith.addf %188, %187 : vector<8x256xf32>
    %190 = arith.divf %188, %189 : vector<8x256xf32>
    %191 = vector.extract_strided_slice %190 {offsets = [0, 0], sizes = [8, 128], strides = [1, 1]} : vector<8x256xf32> to vector<8x128xf32>
    %192 = vector.extract_strided_slice %190 {offsets = [0, 128], sizes = [8, 128], strides = [1, 1]} : vector<8x256xf32> to vector<8x128xf32>
    %193 = vector.extract_strided_slice %180 {offsets = [0, 256], sizes = [8, 128], strides = [1, 1]} : vector<8x384xf32> to vector<8x128xf32>
    %194 = vector.extract_strided_slice %182 {offsets = [0, 256], sizes = [8, 128], strides = [1, 1]} : vector<8x384xf32> to vector<8x128xf32>
    %195 = arith.addf %194, %13 : vector<8x128xf32>
    %196 = arith.mulf %191, %195 : vector<8x128xf32>
    %197 = arith.addf %193, %196 : vector<8x128xf32>
    %198 = math.tanh %197 : vector<8x128xf32>
    %199 = arith.subf %174, %198 : vector<8x128xf32>
    %200 = arith.mulf %192, %199 : vector<8x128xf32>
    %201 = arith.addf %198, %200 : vector<8x128xf32>
    %202 = arith.index_cast %178 : i32 to index
    %c0_48 = arith.constant 0 : index
    %203 = vector.load %arg9[%202, %c0_48] : memref<64x128xf32, #tpu.memory_space<vmem>>, vector<8x128xf32>
    tpu.vector_store %arg9[%202, %c0_48], %201 {strides = array<i32>} : memref<64x128xf32, #tpu.memory_space<vmem>>, vector<8x128xf32>,
    %c7_i32 = arith.constant 7 : i32
    %c8_i32_49 = arith.constant 8 : i32
    %204 = arith.muli %c7_i32, %c8_i32_49 : i32
    %205 = tpu.assume_multiple %204, 8 : i32
    %206 = arith.index_cast %205 : i32 to index
    %c0_50 = arith.constant 0 : index
    %207 = vector.load %arg8[%206, %c0_50] : memref<64x384xf32, #tpu.memory_space<vmem>>, vector<8x384xf32>
    %208 = arith.truncf %201 : vector<8x128xf32> to vector<8x128xbf16>
    %cst_51 = arith.constant dense<0.000000e+00> : vector<8x384xf32>
    %209 = tpu.matmul %208, %10, %cst_51 {dimension_numbers = #tpu.dot_dimension_numbers<[1], [0], [0], [1], [0, 0, 1, 1], [], []>} : vector<8x128xbf16>, vector<128x384xbf16>, vector<8x384xf32> -> vector<8x384xf32>
    %210 = vector.extract_strided_slice %207 {offsets = [0, 0], sizes = [8, 256], strides = [1, 1]} : vector<8x384xf32> to vector<8x256xf32>
    %211 = vector.extract_strided_slice %209 {offsets = [0, 0], sizes = [8, 256], strides = [1, 1]} : vector<8x384xf32> to vector<8x256xf32>
    %212 = arith.addf %210, %211 : vector<8x256xf32>
    %213 = arith.negf %212 : vector<8x256xf32>
    %214 = math.exp %213 : vector<8x256xf32>
    %cst_52 = arith.constant 1.000000e+00 : f32
    %215 = vector.broadcast %cst_52 : f32 to vector<8x256xf32>
    %216 = arith.addf %215, %214 : vector<8x256xf32>
    %217 = arith.divf %215, %216 : vector<8x256xf32>
    %218 = vector.extract_strided_slice %217 {offsets = [0, 0], sizes = [8, 128], strides = [1, 1]} : vector<8x256xf32> to vector<8x128xf32>
    %219 = vector.extract_strided_slice %217 {offsets = [0, 128], sizes = [8, 128], strides = [1, 1]} : vector<8x256xf32> to vector<8x128xf32>
    %220 = vector.extract_strided_slice %207 {offsets = [0, 256], sizes = [8, 128], strides = [1, 1]} : vector<8x384xf32> to vector<8x128xf32>
    %221 = vector.extract_strided_slice %209 {offsets = [0, 256], sizes = [8, 128], strides = [1, 1]} : vector<8x384xf32> to vector<8x128xf32>
    %222 = arith.addf %221, %13 : vector<8x128xf32>
    %223 = arith.mulf %218, %222 : vector<8x128xf32>
    %224 = arith.addf %220, %223 : vector<8x128xf32>
    %225 = math.tanh %224 : vector<8x128xf32>
    %226 = arith.subf %201, %225 : vector<8x128xf32>
    %227 = arith.mulf %219, %226 : vector<8x128xf32>
    %228 = arith.addf %225, %227 : vector<8x128xf32>
    %229 = arith.index_cast %205 : i32 to index
    %c0_53 = arith.constant 0 : index
    %230 = vector.load %arg9[%229, %c0_53] : memref<64x128xf32, #tpu.memory_space<vmem>>, vector<8x128xf32>
    tpu.vector_store %arg9[%229, %c0_53], %228 {strides = array<i32>} : memref<64x128xf32, #tpu.memory_space<vmem>>, vector<8x128xf32>,
    %c8_i32_54 = arith.constant 8 : i32
    %c0_55 = arith.constant 0 : index
    %c0_56 = arith.constant 0 : index
    %231 = vector.load %arg7[%c0_55, %c0_56] : memref<8x128xf32, #tpu.memory_space<vmem>>, vector<8x128xf32>
    tpu.vector_store %arg7[%c0_55, %c0_56], %228 {strides = array<i32>} : memref<8x128xf32, #tpu.memory_space<vmem>>, vector<8x128xf32>,
    %c0_57 = arith.constant 0 : index
    %c0_58 = arith.constant 0 : index
    %232 = vector.load %arg9[%c0_57, %c0_58] : memref<64x128xf32, #tpu.memory_space<vmem>>, vector<64x128xf32>
    %233 = arith.truncf %232 : vector<64x128xf32> to vector<64x128xbf16>
    %c0_59 = arith.constant 0 : index
    %c0_60 = arith.constant 0 : index
    %234 = vector.load %arg6[%c0_59, %c0_60] : memref<64x128xbf16, #tpu.memory_space<vmem>>, vector<64x128xbf16>
    tpu.vector_store %arg6[%c0_59, %c0_60], %233 {strides = array<i32>} : memref<64x128xbf16, #tpu.memory_space<vmem>>, vector<64x128xbf16>,
    return
  }
  func.func @transform_0(%arg0: i32) -> (i32, i32) {
    %c0_i32 = arith.constant 0 : i32
    %c0_i32_0 = arith.constant 0 : i32
    return %arg0, %c0_i32 : i32, i32
  }
  func.func @transform_1(%arg0: i32) -> (i32, i32) {
    %c0_i32 = arith.constant 0 : i32
    %c0_i32_0 = arith.constant 0 : i32
    %c0_i32_1 = arith.constant 0 : i32
    return %c0_i32, %c0_i32_0 : i32, i32
  }
  func.func @transform_2(%arg0: i32) -> (i32, i32) {
    %c0_i32 = arith.constant 0 : i32
    %c0_i32_0 = arith.constant 0 : i32
    %c0_i32_1 = arith.constant 0 : i32
    return %c0_i32, %c0_i32_0 : i32, i32
  }
  func.func @transform_3(%arg0: i32) -> (i32, i32) {
    %c0_i32 = arith.constant 0 : i32
    %c0_i32_0 = arith.constant 0 : i32
    %c0_i32_1 = arith.constant 0 : i32
    return %c0_i32, %c0_i32_0 : i32, i32
  }
  func.func @transform_4(%arg0: i32) -> (i32, i32) {
    %c0_i32 = arith.constant 0 : i32
    %c0_i32_0 = arith.constant 0 : i32
    %c0_i32_1 = arith.constant 0 : i32
    return %c0_i32, %c0_i32_0 : i32, i32
  }
  func.func @transform_5(%arg0: i32) -> (i32, i32) {
    %c0_i32 = arith.constant 0 : i32
    %c0_i32_0 = arith.constant 0 : i32
    return %arg0, %c0_i32 : i32, i32
  }
}

</mosaic_0001>

<bundles_post_ra>
// kernel: tpu_custom_call.1
= control target key start
LH: loop header
LB: loop body
LE: loop exit
PB: predicated region body
PF: predicated region fallthrough
CT: control target
= control target key end

     0   :  { %7 = vsyncpa [#allocation3], 0  ;;  %s649_s0 = inlined_call_operand.hbm [shape: f32[16,128], index: 0, kind: input, shape index: {}]   ;;  %s650_s1 = inlined_call_operand.hbm [shape: f32[8,128], index: 1, kind: input, shape index: {}]   ;;  %s651_s2 = inlined_call_operand.hbm [shape: f32[16,128], index: 2, kind: output, shape index: {}]  }
   0x1   :  { %9 = vsyncpa [#allocation3 + $0x1], 0 }
   0x2   :  { %10 = vsyncpa [#allocation6], 0 }
   0x3   :  { %11 = vsyncpa [#allocation4], 0 }
   0x4   :  { %13 = vsyncpa [#allocation4 + $0x1], 0  ;;  %s483_s9 = smov 0   ;;  %s485_s10 = smov 0  }
   0x5   :  { %s487_s11 = smov 0   ;;  %s489_s12 = smov 0  }
   0x6 LB: > { %s504_s13 = sadd.s32 4294967295, %s463_s12   ;;  %s270_s14 = sadd.s32 4294967294, %s463_s12   ;;  %s463_s12 = sphi %s489_s12, %s674_s12   ;;  %s459_s11 = sphi %s487_s11, %s673_s11   ;;  %s455_s10 = sphi %s485_s10, %s672_s10   ;;  %s451_s9 = sphi %s483_s9, %s671_s9  }
   0x7   : > { %p39_p0 = scmp.ne.s32.totalorder %s455_s10, %s451_s9  ;;  %p652_p1 = scmp.eq.s32.totalorder %s504_s13, 0 }
   0x8   : > { %p90_p3 = scmp.eq.s32.totalorder %s270_s14, 1  ;;  %p271_p5 = scmp.ge.s32.totalorder %s463_s12, 1 }
   0x9   : > { %p513_p4 = por %p652_p1, %p39_p0  ;;  %p97_p7 = scmp.lt.s32.totalorder %s463_s12, 3 }
   0xa   : > { %p518_p6 = por %p90_p3, %p39_p0  ;;  %s465_s18 = smov [#allocation5]  }
   0xb   : > { %s656_s15 = scalar_select %p513_p4, 1, 0 }
   0xc   : > { %s657_s16 = scalar_select %p518_p6, 1, 0 }
   0xd   : > { %p523_p8 = pnand %p271_p5, %p97_p7  ;;  %s110_s19 = sshll.u32 %s465_s18, 4  ;;  %s111_s19 = int_to_ptr.vmem [resolvable:$true] %s110_s19 }
   0xe   : > { %s531_s20 = sadd.s32 1, %s463_s12   ;;  %s26_s24 = sadd.s32 1, %s459_s11 }
   0xf   : > { %s658_s17 = scalar_select %p523_p8, 1, 0 }
  0x10   : > { %p292_p10 = pneg %p523_p8  ;;  %s23_s22 = ssub.s32 %s463_s12, %s531_s20 }
  0x11   : > { %p541_p12 = scmp.eq.s32.totalorder %s23_s22, 0  ;;  %p33_p13 = scmp.ne.s32.totalorder %s459_s11, %s455_s10 }
  0x12   : > { %p535_p11 = pnand %p292_p10, %p652_p1  ;;  %s352_s25 = scalar_lea.vmem %s111_s19, 128 }
  0x13   : > { %p353_p3 = scmp.ne.s32.totalorder %s111_s19, %s352_s25  ;;  %p360_p9 = scmp.lt.s32.totalorder %s111_s19, %s111_s19 }
  0x14   : > { %p343_p0 = pneg %p535_p11  ;;  %p361_p2 = scmp.lt.s32.totalorder %s352_s25, %s352_s25 }
  0x16   : > { %p355_p5 = pnand %p353_p3, %p343_p0  ;;  %p362_p10 = por %p361_p2, %p360_p9 }
  0x18   : > { %p356_p7 = pneg %p355_p5 }
  0x1a   : > { %p363_p1 = pnand %p362_p10, %p356_p7 }
  0x1c   : > { %366 = shalt.err (!%p363_p1)
}
  0x1d   : > { %295 = dma.hbm_to_vmem [thread:$0]  (!%p535_p11), %s650_s1, 128, %s111_s19, [#allocation6]  }
  0x1e   : > { %s558_s28 = scalar_select %p541_p12, %s459_s11, %s26_s24  }
  0x1f   : > { %p34_p1 = scmp.eq.s32.totalorder %s463_s12, 0  ;;  %p661_p2 = scmp.eq.s32.totalorder %s504_s13, 1 }
  0x20   : > { %p305_p0 = scmp.lt.s32.totalorder %s463_s12, 2  ;;  %s121_s30 = sand.u32 1, %s459_s11  }
  0x21   : > { %p566_p9 = por %p661_p2, %p33_p13  ;;  %p35_p3 = por %p34_p1, %p33_p13 }
  0x22   : > { %s274_s3 = sshll.u32 %s121_s30, 3  ;;  %s275_s4 = sshll.u32 %s463_s12, 7 }
  0x23   : > { %s662_s29 = scalar_select %p566_p9, 1, 0 }
  0x24   : > { %s579_s7 = scalar_lea.hbm %s649_s0, %s275_s4  ;;  %s125_s8 = scalar_lea.vmem [#allocation2], %s274_s3 }
  0x25   : > { %s132_s14 = sshll.u32 %s125_s8, 4  ;;  %p581_p11 = pnand %p305_p0, %p35_p3  ;;  %s133_s14 = int_to_ptr.vmem [resolvable:$true] %s132_s14 }
  0x26   : > { %s122_s19 = scalar_lea.sflag [#allocation3], %s121_s30  ;;  %s367_s21 = scalar_lea.hbm %s579_s7, 128 }
  0x27   : > { %p368_p12 = scmp.ne.s32.totalorder %s579_s7, %s367_s21  ;;  %p369_p13 = pneg %p581_p11 }
  0x28   : > { %s372_s24 = scalar_lea.hbm %s649_s0, 256  ;;  %p373_p10 = scmp.lt.s32.totalorder %s579_s7, %s649_s0 }
  0x29   : > { %p370_p5 = pnand %p369_p13, %p368_p12  ;;  %p374_p1 = scmp.lt.s32.totalorder %s372_s24, %s367_s21 }
  0x2b   : > { %p371_p7 = pneg %p370_p5  ;;  %p375_p2 = por %p374_p1, %p373_p10 }
  0x2d   : > { %p376_p0 = pnand %p375_p2, %p371_p7 }
  0x2f   : > { %379 = shalt.err (!%p376_p0)
}
  0x30   : > { %s380_s27 = scalar_lea.vmem %s133_s14, 128  ;;  %s466_s30 = smov [#allocation2]  }
  0x31   : > { %p381_p3 = scmp.ne.s32.totalorder %s133_s14, %s380_s27  ;;  %s385_s3 = sshll.u32 %s466_s30, 4  ;;  %s386_s3 = int_to_ptr.vmem [resolvable:$false] %s385_s3 }
  0x32   : > { %s387_s4 = scalar_lea.vmem %s386_s3, 256  ;;  %p388_p12 = scmp.lt.s32.totalorder %s133_s14, %s386_s3 }
  0x33   : > { %p383_p6 = pnand %p381_p3, %p369_p13  ;;  %p389_p5 = scmp.lt.s32.totalorder %s387_s4, %s380_s27 }
  0x35   : > { %p384_p9 = pneg %p383_p6  ;;  %p390_p4 = por %p389_p5, %p388_p12 }
  0x37   : > { %p391_p8 = pnand %p390_p4, %p384_p9 }
  0x39   : > { %394 = shalt.err (!%p391_p8)
}
  0x3a   : > { %299 = dma.hbm_to_vmem [thread:$0]  (!%p581_p11), %s579_s7, 128, %s133_s14, %s122_s19  }
  0x3b   : > { %p664_p7 = scmp.ne.s32.totalorder %s658_s17, 0 }
  0x3c   : > { %s602_s5 = sand.u32 (!%p664_p7), 1, %s455_s10   ;;  %p665_p6 = scmp.ne.s32.totalorder (!%p664_p7), %s656_s15, 0 }
  0x3d   : > { %141 = sbr.rel (%p664_p7) target bundleno = 95 (0x5f), region = 28  ;;  %s277_s6 = sshll.u32 (!%p664_p7), %s602_s5, 3 }
  0x3e   : > { %s144_s8 = scalar_lea.sflag (!%p664_p7), [#allocation3], %s602_s5  ;;  %s147_s21 = scalar_lea.vmem (!%p664_p7), [#allocation2], %s277_s6 }
  0x42   : > { %438 = dma.done.wait (%p665_p6), %s144_s8, 128  }
  0x43   : > { %440 = vsyncadd (%p665_p6), %s144_s8, 4294967168  ;;  %p666_p4 = scmp.eq.s32.totalorder %s504_s13, 0 }
  0x45   : > { %442 = dma.done.wait (%p666_p4), [#allocation6], 128   ;;  %p667_p8 = pmov %p666_p4 }
  0x46   : > { %s171_s17 = scalar_lea.vmem [#allocation7], %s277_s6  ;;  %s281_s14 = sshll.u32 %s504_s13, 7  ;;  %v172_v0 = vld [vmem:[%s147_s21] sm:$0xff]  ;;  %v173_v1 = vld [vmem:[#allocation5] sm:$0xff] }
  0x47   : > { %444 = vsyncadd (%p667_p8), [#allocation6], 4294967168  ;;  %s190_s7 = sshll.u32 %s171_s17, 4  ;;  %v174_v2 = vadd.f32 %v173_v1, %v172_v0  ;;  %s188_s15 = scalar_lea.hbm %s651_s2, %s281_s14  ;;  %s191_s7 = int_to_ptr.vmem [resolvable:$true] %s190_s7 }
  0x48   : > { %s177_s22 = scalar_lea.sflag [#allocation4], %s602_s5  ;;  %s395_s23 = scalar_lea.vmem %s191_s7, 128 }
  0x49   : > { %175 = vst [vmem:[%s171_s17] sm:$0xff] %v174_v2  ;;  %p396_p9 = scmp.ne.s32.totalorder %s191_s7, %s395_s23  ;;  %p668_p11 = scmp.ne.s32.totalorder %s662_s29, 0 }
  0x4a   : > { %s467_s24 = smov [#allocation7]  }
  0x4b   : > { %p397_p13 = pnand %p396_p9, %p668_p11  ;;  %s399_s25 = sshll.u32 %s467_s24, 4  ;;  %s400_s25 = int_to_ptr.vmem [resolvable:$false] %s399_s25 }
  0x4c   : > { %s401_s26 = scalar_lea.vmem %s400_s25, 256  ;;  %p402_p1 = scmp.lt.s32.totalorder %s191_s7, %s400_s25 }
  0x4d   : > { %p398_p10 = pneg %p397_p13  ;;  %p403_p2 = scmp.lt.s32.totalorder %s401_s26, %s395_s23 }
  0x4f   : > { %p404_p0 = por %p403_p2, %p402_p1 }
  0x51   : > { %p405_p3 = pnand %p404_p0, %p398_p10 }
  0x53   : > { %408 = shalt.err (!%p405_p3)
}
  0x54   : > { %s409_s13 = scalar_lea.hbm %s188_s15, 128  ;;  %s413_s3 = scalar_lea.hbm %s651_s2, 256 }
  0x55   : > { %p410_p12 = scmp.ne.s32.totalorder %s188_s15, %s409_s13  ;;  %p414_p6 = scmp.lt.s32.totalorder %s188_s15, %s651_s2 }
  0x56   : > { %p415_p4 = scmp.lt.s32.totalorder %s413_s3, %s409_s13 }
  0x57   : > { %p411_p5 = pnand %p410_p12, %p668_p11 }
  0x58   : > { %p416_p8 = por %p415_p4, %p414_p6 }
  0x59   : > { %p412_p7 = pneg %p411_p5 }
  0x5b   : > { %p417_p9 = pnand %p416_p8, %p412_p7 }
  0x5d   : > { %420 = shalt.err (!%p417_p9)
}
  0x5e   : > { %290 = dma.vmem_to_hbm [thread:$0]  (%p668_p11), %s191_s7, 128, %s188_s15, %s177_s22  }
  0x5f PF: > { %s202_s6 = sand.u32 1, %s451_s9   ;;  %p669_p13 = scmp.ne.s32.totalorder %s657_s16, 0 }
  0x60   : > { %p670_p10 = scmp.ge.s32.totalorder %s463_s12, 2  ;;  %s203_s8 = scalar_lea.sflag [#allocation4], %s202_s6 }
  0x62   : > { %p301_p1 = pnand %p670_p10, %p669_p13 }
  0x64   : > { %p302_p2 = pneg %p301_p1 }
  0x66   : > { %446 = dma.done.wait (%p302_p2), %s203_s8, 128  }
  0x67   : > { %448 = vsyncadd (%p302_p2), %s203_s8, 4294967168  ;;  %p16_p0 = scmp.ge.s32.totalorder %s531_s20, 4   ;;  %s671_s9 = smov %s455_s10 }
  0x68   : > { %s672_s10 = smov %s459_s11  ;;  %s673_s11 = smov %s558_s28 }
  0x69   : > { %s674_s12 = smov %s531_s20  ;;  %18 = sbr.rel (!%p16_p0) target bundleno = 6 (0x6), region = 77 }
  0x6e   :  { %208 = vsyncpa [#allocation3], 1 }
  0x6f   :  { %210 = vsyncpa [#allocation3 + $0x1], 1 }
  0x70   :  { %211 = vsyncpa [#allocation6], 1 }
  0x71   :  { %212 = vsyncpa [#allocation4], 1 }
  0x72   :  { %214 = vsyncpa [#allocation4 + $0x1], 1 }

// kernel: rnn_model_forward.5
= control target key start
LH: loop header
LB: loop body
LE: loop exit
PB: predicated region body
PF: predicated region fallthrough
CT: control target
= control target key end

     0   :  { %v210_v0 = vmov 0.0   ;;  %vm211_vm0 = vmmov 0   ;;  %s268_s1 = inlined_call_operand.vmem [shape: bf16[128,128], index: 1, kind: input, shape index: {}]   ;;  %s269_s0 = inlined_call_operand.vmem [shape: bf16[16,128], index: 0, kind: input, shape index: {}]   ;;  %s270_s2 = inlined_call_operand.vmem [shape: f32[1,128], index: 2, kind: input, shape index: {}]   ;;  %s271_s3 = inlined_call_operand.vmem [shape: f32[16,128], index: 3, kind: output, shape index: {}]  }
   0x1   :  { %179 = vmatprep.subr.bf16.mxu0 %v210_v0  ;;  %v201_v1 = vld [vmem:[%s268_s1 + $0x38] sm:$0xff]   ;;  %195 = vmatprep.mubr.msk.bf16.mxu0 %vm211_vm0, %v210_v0  ;;  %v202_v2 = vld [vmem:[%s268_s1 + $0x30] sm:$0xff]   ;;  %v203_v3 = vld [vmem:[%s268_s1 + $0x28] sm:$0xff]  }
   0x2   :  { %180 = vmatpush3.bf16.msra.mxu0 %v201_v1  ;;  %v204_v4 = vld [vmem:[%s268_s1 + $0x20] sm:$0xff]   ;;  %v205_v5 = vld [vmem:[%s268_s1 + $0x18] sm:$0xff]   ;;  %v206_v6 = vld [vmem:[%s268_s1 + $0x10] sm:$0xff]  }
   0x3   :  { %181 = vmatprep.subr.bf16.mxu0 %v210_v0  ;;  %v207_v7 = vld [vmem:[%s268_s1 + $0x8] sm:$0xff]   ;;  %v208_v8 = vld [vmem:[%s268_s1] sm:$0xff]  }
   0x4   :  { %v209_v9 = vld [vmem:[%s269_s0] sm:$0xff]  }
   0x5   :  { %v169_v11 = vld [vmem:[%s270_s2] ss:$0 sm:$0xff] }
   0x6   :  { %182 = vmatpush3.bf16.msra.mxu0 %v202_v2 }
   0x7   :  { %183 = vmatprep.subr.bf16.mxu0 %v210_v0 }
   0xa   :  { %184 = vmatpush3.bf16.msra.mxu0 %v203_v3 }
   0xb   :  { %185 = vmatprep.subr.bf16.mxu0 %v210_v0 }
   0xe   :  { %186 = vmatpush3.bf16.msra.mxu0 %v204_v4 }
   0xf   :  { %187 = vmatprep.subr.bf16.mxu0 %v210_v0 }
  0x12   :  { %188 = vmatpush3.bf16.msra.mxu0 %v205_v5 }
  0x13   :  { %189 = vmatprep.subr.bf16.mxu0 %v210_v0 }
  0x16   :  { %190 = vmatpush3.bf16.msra.mxu0 %v206_v6 }
  0x17   :  { %191 = vmatprep.subr.bf16.mxu0 %v210_v0 }
  0x1a   :  { %192 = vmatpush3.bf16.msra.mxu0 %v207_v7 }
  0x1b   :  { %193 = vmatprep.subr.bf16.mxu0 %v210_v0 }
  0x1e   :  { %194 = vmatpush3.bf16.msra.mxu0 %v208_v8 }
  0x21   :  { %196 = vmatmul.mubr.bf16.vlgmr.msra.gmra.mxu0 %v209_v9 }
  0xe1   :  { %v129_v10 = vpop.f32.mrf.mxu0 }
  0xe2   :  { %v152_v13 = vadd.f32 %v169_v11, %v129_v10 }
  0xe3   :  { %v197_v12 = vpop.f32.mrf.mxu0 }
  0xe4   :  { %154 = vst [vmem:[%s271_s3] sm:$0xff] %v152_v13 }
  0xe5   :  { %v132_v14 = vpop.f32.mrf.mxu0 }
  0xe6   :  { %v153_v16 = vadd.f32 %v169_v11, %v132_v14 }
  0xe7   :  { %v198_v15 = vpop.f32.mrf.mxu0 }
  0xe8   :  { %155 = vst [vmem:[%s271_s3 + $0x8] sm:$0xff] %v153_v16 }

// kernel: rnn_model_forward.3
= control target key start
LH: loop header
LB: loop body
LE: loop exit
PB: predicated region body
PF: predicated region fallthrough
CT: control target
= control target key end

     0   :  { %10 = vsyncpa [#allocation6], 0  ;;  %s2100_s18 = smov [#allocation5]   ;;  %s2673_s0 = inlined_call_operand.vmem [shape: bf16[64,128], index: 0, kind: input, shape index: {}]   ;;  %s2674_s1 = inlined_call_operand.vmem [shape: bf16[128,384], index: 1, kind: input, shape index: {}]   ;;  %s2675_s2 = inlined_call_operand.hbm [shape: bf16[128,384], index: 2, kind: input, shape index: {}]   ;;  %s2676_s3 = inlined_call_operand.vmem [shape: f32[1,384], index: 3, kind: input, shape index: {}]   ;;  %s2677_s4 = inlined_call_operand.vmem [shape: f32[1,128], index: 4, kind: input, shape index: {}]   ;;  %s2678_s5 = inlined_call_operand.vmem [shape: bf16[64,128], index: 5, kind: output, shape index: {}]  }
   0x1   :  { %s20_s19 = sshll.u32 %s2100_s18, 4  ;;  %s21_s19 = int_to_ptr.vmem [resolvable:$true] %s20_s19 }
   0x2   :  { %s2086_s20 = scalar_lea.vmem %s21_s19, 3072  ;;  %p2091_p1 = scmp.lt.s32.totalorder %s21_s19, %s21_s19 }
   0x3   :  { %p2087_p0 = scmp.ne.s32.totalorder %s21_s19, %s2086_s20  ;;  %p2092_p2 = scmp.lt.s32.totalorder %s2086_s20, %s2086_s20 }
   0x5   :  { %p2093_p3 = por %p2092_p2, %p2091_p1 }
   0x7   :  { %p2094_p4 = pnand %p2093_p3, %p2087_p0 }
   0x9   :  { %2097 = shalt.err (!%p2094_p4)
}
   0xa   :  { %s2101_s21 = smov 192   ;;  %s2102_s22 = smov 12  }
   0xb   :  { %26 = dma.hbm_to_vmem [thread:$0]  %s2675_s2, 3072, %s21_s19, [#allocation6], %s2101_s21, %s2101_s21, %s2102_s22  }
   0xc   :  { %2098 = dma.done.wait [#allocation6], 3072  }
   0xd   :  { %2099 = vsyncadd [#allocation6], 4294964224  ;;  %v2679_v0 = vmov 0   ;;  %v1910_v1 = vld [vmem:[%s2674_s1 + $0xac] ss:$12 sps:$4 sm:$0xff]   ;;  %v1936_v12 = vld [vmem:[%s2673_s0] sm:$0xff]   ;;  %v82_v55 = vlaneseq }
   0xe   :  { %281 = vmatprep.mubr.bf16.mxu0 %v2679_v0  ;;  %v1912_v2 = vld [vmem:[%s2674_s1 + $0xa8] ss:$12 sps:$4 sm:$0xff]   ;;  %249 = vmatprep.subr.bf16.mxu0 %v1910_v1  ;;  %v1915_v4 = vld [vmem:[%s2674_s1 + $0x90] ss:$12 sps:$4 sm:$0xff]   ;;  %v1918_v6 = vld [vmem:[%s2674_s1 + $0x78] ss:$12 sps:$4 sm:$0xff]  }
   0xf   :  { %v1913_v3 = vld [vmem:[%s2674_s1 + $0x94] ss:$12 sps:$4 sm:$0xff]   ;;  %250 = vmatpush1.bf16.msra.mxu0 %v1912_v2  ;;  %v1916_v5 = vld [vmem:[%s2674_s1 + $0x7c] ss:$12 sps:$4 sm:$0xff]   ;;  %v1919_v7 = vld [vmem:[%s2674_s1 + $0x64] ss:$12 sps:$4 sm:$0xff]   ;;  %1735 = vmatprep.mubr.bf16.mxu1 %v1936_v12 }
  0x10   :  { %251 = vmatprep.subr.bf16.mxu0 %v1913_v3  ;;  %v1931_v8 = vld [vmem:[%s2674_s1 + $0xb0] ss:$12 sps:$4 sm:$0xff]   ;;  %v1921_v9 = vld [vmem:[%s2674_s1 + $0x60] ss:$12 sps:$4 sm:$0xff]   ;;  %v1935_v11 = vld [vmem:[%s2674_s1 + $0x98] ss:$12 sps:$4 sm:$0xff]  }
  0x11   :  { %v1922_v10 = vld [vmem:[%s2674_s1 + $0x4c] ss:$12 sps:$4 sm:$0xff]   ;;  %1719 = vmatprep.subr.bf16.mxu1 %v1931_v8  ;;  %v1924_v13 = vld [vmem:[%s2674_s1 + $0x48] ss:$12 sps:$4 sm:$0xff]   ;;  %v1927_v17 = vld [vmem:[%s2674_s1 + $0x30] ss:$12 sps:$4 sm:$0xff]  }
  0x12   :  { %1720 = vmatpush3.bf16.msra.mxu1 %v1931_v8  ;;  %v1940_v14 = vld [vmem:[%s2674_s1 + $0x80] ss:$12 sps:$4 sm:$0xff]   ;;  %v1944_v16 = vld [vmem:[%s2674_s1 + $0x68] ss:$12 sps:$4 sm:$0xff]   ;;  %v1949_v19 = vld [vmem:[%s2674_s1 + $0x50] ss:$12 sps:$4 sm:$0xff]  }
  0x13   :  { %252 = vmatpush1.bf16.msra.mxu0 %v1915_v4  ;;  %1721 = vmatprep.subr.bf16.mxu1 %v1935_v11  ;;  %v1925_v15 = vld [vmem:[%s2674_s1 + $0x34] ss:$12 sps:$4 sm:$0xff]   ;;  %v1928_v18 = vld [vmem:[%s2674_s1 + $0x1c] ss:$12 sps:$4 sm:$0xff]   ;;  %v1930_v20 = vld [vmem:[%s2674_s1 + $0x18] ss:$12 sps:$4 sm:$0xff]  }
  0x14   :  { %253 = vmatprep.subr.bf16.mxu0 %v1916_v5  ;;  %v1932_v21 = vld [vmem:[%s2674_s1 + $0x4] ss:$12 sps:$4 sm:$0xff]   ;;  %v1934_v23 = vld [vmem:[%s2674_s1] ss:$12 sps:$4 sm:$0xff]   ;;  %v2215_v26 = vld [vmem:[#allocation5 + $0xa8] ss:$12 sps:$4 sm:$0xff]  }
  0x15   :  { %v1953_v22 = vld [vmem:[%s2674_s1 + $0x38] ss:$12 sps:$4 sm:$0xff]   ;;  %v1958_v25 = vld [vmem:[%s2674_s1 + $0x20] ss:$12 sps:$4 sm:$0xff]   ;;  %v1962_v28 = vld [vmem:[%s2674_s1 + $0x8] ss:$12 sps:$4 sm:$0xff]  }
  0x16   :  { %1722 = vmatpush3.bf16.msra.mxu1 %v1935_v11  ;;  %v2210_v24 = vld [vmem:[#allocation5 + $0xac] ss:$12 sps:$4 sm:$0xff]   ;;  %v2218_v27 = vld [vmem:[#allocation5 + $0x94] ss:$12 sps:$4 sm:$0xff]   ;;  %v2224_v29 = vld [vmem:[#allocation5 + $0x90] ss:$12 sps:$4 sm:$0xff]  }
  0x17   :  { %254 = vmatpush1.bf16.msra.mxu0 %v1918_v6  ;;  %1723 = vmatprep.subr.bf16.mxu1 %v1940_v14  ;;  %v2228_v30 = vld [vmem:[#allocation5 + $0x7c] ss:$12 sps:$4 sm:$0xff]   ;;  %v2234_v32 = vld [vmem:[#allocation5 + $0x78] ss:$12 sps:$4 sm:$0xff]   ;;  %v2681_v35 = vmov 0.0   ;;  %v1954_v37 = vld [vmem:[%s2673_s0 + $0x10] sm:$0xff]  }
  0x18   :  { %255 = vmatprep.subr.bf16.mxu0 %v1919_v7  ;;  %v1945_v31 = vld [vmem:[%s2673_s0 + $0x8] sm:$0xff]   ;;  %v2237_v33 = vld [vmem:[#allocation5 + $0x64] ss:$12 sps:$4 sm:$0xff]   ;;  %v2260_v41 = vld [vmem:[#allocation5 + $0x34] ss:$12 sps:$4 sm:$0xff]   ;;  %vm2105_vm0 = vmmov 0  }
  0x19   :  { %v2239_v34 = vld [vmem:[#allocation5 + $0xb0] ss:$12 sps:$4 sm:$0xff]   ;;  %v2243_v36 = vld [vmem:[#allocation5 + $0x60] ss:$12 sps:$4 sm:$0xff]   ;;  %v2253_v39 = vld [vmem:[#allocation5 + $0x98] ss:$12 sps:$4 sm:$0xff]  }
  0x1a   :  { %1724 = vmatpush3.bf16.msra.mxu1 %v1940_v14  ;;  %v2250_v38 = vld [vmem:[#allocation5 + $0x4c] ss:$12 sps:$4 sm:$0xff]   ;;  %v2257_v40 = vld [vmem:[#allocation5 + $0x48] ss:$12 sps:$4 sm:$0xff]   ;;  %v2270_v44 = vld [vmem:[#allocation5 + $0x30] ss:$12 sps:$4 sm:$0xff]  }
  0x1b   :  { %256 = vmatpush1.bf16.msra.mxu0 %v1921_v9  ;;  %1725 = vmatprep.subr.bf16.mxu1 %v1944_v16  ;;  %v2263_v42 = vld [vmem:[#allocation5 + $0x80] ss:$12 sps:$4 sm:$0xff]   ;;  %v1963_v43 = vld [vmem:[%s2673_s0 + $0x18] sm:$0xff]   ;;  %v2277_v46 = vld [vmem:[#allocation5 + $0x68] ss:$12 sps:$4 sm:$0xff]   ;;  %v2106_v53 = vmov 0.0|0.0  }
  0x1c   :  { %257 = vmatprep.subr.bf16.mxu0 %v1922_v10  ;;  %v2274_v45 = vld [vmem:[#allocation5 + $0x1c] ss:$12 sps:$4 sm:$0xff]   ;;  %v2283_v47 = vld [vmem:[#allocation5 + $0x18] ss:$12 sps:$4 sm:$0xff]   ;;  %v2293_v50 = vld [vmem:[#allocation5] ss:$12 sps:$4 sm:$0xff]  }
  0x1d   :  { %v2286_v48 = vld [vmem:[#allocation5 + $0x4] ss:$12 sps:$4 sm:$0xff]   ;;  %v2304_v52 = vld [vmem:[#allocation5 + $0x20] ss:$12 sps:$4 sm:$0xff]   ;;  %v2311_v54 = vld [vmem:[#allocation5 + $0x8] ss:$12 sps:$4 sm:$0xff]  }
  0x1e   :  { %1726 = vmatpush3.bf16.msra.mxu1 %v1944_v16  ;;  %v2289_v49 = vld [vmem:[#allocation5 + $0x50] ss:$12 sps:$4 sm:$0xff]   ;;  %v2298_v51 = vld [vmem:[#allocation5 + $0x38] ss:$12 sps:$4 sm:$0xff]   ;;  %v83_v56 = vshrl.u32 %v82_v55, 7 }
  0x1f   :  { %258 = vmatpush1.bf16.msra.mxu0 %v1924_v13  ;;  %1727 = vmatprep.subr.bf16.mxu1 %v1949_v19  ;;  %v80_v58 = vld [vmem:[%s2676_s3] sm:$0x7] }
  0x20   :  { %259 = vmatprep.subr.bf16.mxu0 %v1925_v15  ;;  %v84_v57 = vsub.s32 0, %v83_v56  ;;  %v88_v60 = vsub.s32 1, %v83_v56  ;;  %v92_v63 = vsub.s32 2, %v83_v56 }
  0x22   :  { %1728 = vmatpush3.bf16.msra.mxu1 %v1949_v19  ;;  %v85_v62 = vrot.slane %v80_v58, %v84_v57  ;;  %v89_v2 = vrot.slane %v80_v58, %v88_v60  ;;  %v2355_v6 = vrot.slane %v80_v58, %v92_v63 }
  0x23   :  { %260 = vmatpush1.bf16.msra.mxu0 %v1927_v17  ;;  %1729 = vmatprep.subr.bf16.mxu1 %v1953_v22 }
  0x24   :  { %261 = vmatprep.subr.bf16.mxu0 %v1928_v18 }
  0x26   :  { %1730 = vmatpush3.bf16.msra.mxu1 %v1953_v22 }
  0x27   :  { %262 = vmatpush1.bf16.msra.mxu0 %v1930_v20  ;;  %1731 = vmatprep.subr.bf16.mxu1 %v1958_v25 }
  0x28   :  { %263 = vmatprep.subr.bf16.mxu0 %v1932_v21 }
  0x2a   :  { %1732 = vmatpush3.bf16.msra.mxu1 %v1958_v25 }
  0x2b   :  { %264 = vmatpush1.bf16.msra.mxu0 %v1934_v23  ;;  %1733 = vmatprep.subr.bf16.mxu1 %v1962_v28 }
  0x2c   :  { %586 = vmatprep.subr.bf16.mxu0 %v2210_v24 }
  0x2e   :  { %282 = vmatmul.mubr.bf16.vlgmr.msra.gmra.mxu0 %v1936_v12  ;;  %1734 = vmatpush3.bf16.msra.mxu1 %v1962_v28 }
  0x2f   :  { %587 = vmatpush1.bf16.msra.mxu0 %v2215_v26  ;;  %291 = vmatprep.mubr.bf16.mxu0 %v2679_v0 }
  0x30   :  { %588 = vmatprep.subr.bf16.mxu0 %v2218_v27  ;;  %1743 = vmatprep.subr.bf16.mxu1 %v2681_v35 }
  0x31   :  { %1736 = vmatmul.mubr.bf16.vlgmr.msra.gmra.mxu1 %v1945_v31 }
  0x32   :  { %1744 = vmatpush3.bf16.msra.mxu1 %v2239_v34  ;;  %1739 = vmatprep.mubr.bf16.mxu1 %v1954_v37 }
  0x33   :  { %589 = vmatpush1.bf16.msra.mxu0 %v2224_v29  ;;  %1745 = vmatprep.subr.bf16.mxu1 %v2681_v35 }
  0x34   :  { %590 = vmatprep.subr.bf16.mxu0 %v2228_v30 }
  0x36   :  { %292 = vmatmul.mubr.bf16.gmra.mxu0 %v1945_v31  ;;  %1746 = vmatpush3.bf16.msra.mxu1 %v2253_v39 }
  0x37   :  { %591 = vmatpush1.bf16.msra.mxu0 %v2234_v32  ;;  %301 = vmatprep.mubr.bf16.mxu0 %v2679_v0 }
  0x38   :  { %592 = vmatprep.subr.bf16.mxu0 %v2237_v33  ;;  %1747 = vmatprep.subr.bf16.mxu1 %v2681_v35 }
  0x39   :  { %1740 = vmatmul.mubr.bf16.gmra.mxu1 %v1963_v43 }
  0x3a   :  { %1748 = vmatpush3.bf16.msra.mxu1 %v2263_v42  ;;  %1759 = vmatprep.mubr.msk.bf16.mxu1 %vm2105_vm0, %v2681_v35 }
  0x3b   :  { %593 = vmatpush1.bf16.msra.mxu0 %v2243_v36  ;;  %1749 = vmatprep.subr.bf16.mxu1 %v2681_v35 }
  0x3c   :  { %594 = vmatprep.subr.bf16.mxu0 %v2250_v38 }
  0x3e   :  { %302 = vmatmul.mubr.bf16.gmra.mxu0 %v1954_v37  ;;  %1750 = vmatpush3.bf16.msra.mxu1 %v2277_v46 }
  0x3f   :  { %595 = vmatpush1.bf16.msra.mxu0 %v2257_v40  ;;  %311 = vmatprep.mubr.bf16.mxu0 %v2679_v0 }
  0x40   :  { %596 = vmatprep.subr.bf16.mxu0 %v2260_v41  ;;  %1751 = vmatprep.subr.bf16.mxu1 %v2681_v35 }
  0x42   :  { %1752 = vmatpush3.bf16.msra.mxu1 %v2289_v49 }
  0x43   :  { %597 = vmatpush1.bf16.msra.mxu0 %v2270_v44  ;;  %1753 = vmatprep.subr.bf16.mxu1 %v2681_v35 }
  0x44   :  { %598 = vmatprep.subr.bf16.mxu0 %v2274_v45 }
  0x46   :  { %312 = vmatmul.mubr.bf16.gmra.mxu0 %v1963_v43  ;;  %1754 = vmatpush3.bf16.msra.mxu1 %v2298_v51 }
  0x47   :  { %599 = vmatpush1.bf16.msra.mxu0 %v2283_v47  ;;  %618 = vmatprep.mubr.bf16.mxu0 %v2679_v0 }
  0x48   :  { %600 = vmatprep.subr.bf16.mxu0 %v2286_v48  ;;  %1755 = vmatprep.subr.bf16.mxu1 %v2681_v35 }
  0x4a   :  { %1756 = vmatpush3.bf16.msra.mxu1 %v2304_v52 }
  0x4b   :  { %601 = vmatpush1.bf16.msra.mxu0 %v2293_v50  ;;  %1757 = vmatprep.subr.bf16.mxu1 %v2681_v35 }
  0x4c   :  { %696 = vmatprep.subr.bf16.mxu0 %v2210_v24 }
  0x4e   :  { %619 = vmatmul.mubr.bf16.vlgmr.msra.gmra.mxu0 %v2106_v53  ;;  %1758 = vmatpush3.bf16.msra.mxu1 %v2311_v54 }
  0x4f   :  { %697 = vmatpush1.bf16.msra.mxu0 %v2215_v26  ;;  %728 = vmatprep.mubr.bf16.mxu0 %v2679_v0 }
  0x50   :  { %698 = vmatprep.subr.bf16.mxu0 %v2218_v27  ;;  %1763 = vmatprep.subr.bf16.mxu1 %v2681_v35 }
  0x51   :  { %1760 = vmatmul.mubr.bf16.vlgmr.msra.gmra.mxu1 %v2106_v53 }
  0x52   :  { %1764 = vmatpush3.bf16.msra.mxu1 %v2239_v34  ;;  %1779 = vmatprep.mubr.msk.bf16.mxu1 %vm2105_vm0, %v2681_v35 }
  0x53   :  { %699 = vmatpush1.bf16.msra.mxu0 %v2224_v29  ;;  %1765 = vmatprep.subr.bf16.mxu1 %v2681_v35 }
  0x54   :  { %700 = vmatprep.subr.bf16.mxu0 %v2228_v30 }
  0x56   :  { %1766 = vmatpush3.bf16.msra.mxu1 %v2253_v39 }
  0x57   :  { %701 = vmatpush1.bf16.msra.mxu0 %v2234_v32  ;;  %1767 = vmatprep.subr.bf16.mxu1 %v2681_v35 }
  0x58   :  { %702 = vmatprep.subr.bf16.mxu0 %v2237_v33 }
  0x5a   :  { %1768 = vmatpush3.bf16.msra.mxu1 %v2263_v42 }
  0x5b   :  { %703 = vmatpush1.bf16.msra.mxu0 %v2243_v36  ;;  %1769 = vmatprep.subr.bf16.mxu1 %v2681_v35 }
  0x5c   :  { %704 = vmatprep.subr.bf16.mxu0 %v2250_v38 }
  0x5e   :  { %1770 = vmatpush3.bf16.msra.mxu1 %v2277_v46 }
  0x5f   :  { %705 = vmatpush1.bf16.msra.mxu0 %v2257_v40  ;;  %1771 = vmatprep.subr.bf16.mxu1 %v2681_v35 }
  0x60   :  { %706 = vmatprep.subr.bf16.mxu0 %v2260_v41 }
  0x62   :  { %1772 = vmatpush3.bf16.msra.mxu1 %v2289_v49 }
  0x63   :  { %707 = vmatpush1.bf16.msra.mxu0 %v2270_v44  ;;  %1773 = vmatprep.subr.bf16.mxu1 %v2681_v35 }
  0x64   :  { %708 = vmatprep.subr.bf16.mxu0 %v2274_v45 }
  0x66   :  { %1774 = vmatpush3.bf16.msra.mxu1 %v2298_v51 }
  0x67   :  { %709 = vmatpush1.bf16.msra.mxu0 %v2283_v47  ;;  %1775 = vmatprep.subr.bf16.mxu1 %v2681_v35 }
  0x68   :  { %710 = vmatprep.subr.bf16.mxu0 %v2286_v48 }
  0x6a   :  { %1776 = vmatpush3.bf16.msra.mxu1 %v2304_v52 }
  0x6b   :  { %711 = vmatpush1.bf16.msra.mxu0 %v2293_v50  ;;  %1777 = vmatprep.subr.bf16.mxu1 %v2681_v35 }
  0x6c   :  { %807 = vmatprep.subr.bf16.mxu0 %v2210_v24 }
  0x6e   :  { %1778 = vmatpush3.bf16.msra.mxu1 %v2311_v54 }
  0x6f   :  { %1783 = vmatprep.subr.bf16.mxu1 %v2681_v35 }
  0xee   :  { %v283_v59 = vpop.f32.mrf.mxu0 }
  0xf0   :  { %v285_v61 = vpop.f32.mrf.mxu0 }
  0xf1   :  { %v1737_v10 = vpop.f32.mrf.mxu1  ;;  %v286_v0 = vadd.f32 %v285_v61, %v89_v2 }
  0xf2   :  { %v287_v1 = vpop.f32.mrf.mxu0  ;;  %v2362_v12 = vadd.f32 %v1737_v10, %v2355_v6 }
  0xf3   :  { %v2351_v3 = vadd.f32 %v287_v1, %v85_v62  ;;  %v356_v14 = vpop.f32.mrf.mxu1 }
  0xf4   :  { %v289_v4 = vpop.f32.mrf.mxu0  ;;  %v357_v61 = vadd.f32 %v356_v14, %v2355_v6  ;;  %v2688_v14 = vmov 0  }
  0xf5   :  { %v2353_v5 = vadd.f32 %v289_v4, %v89_v2  ;;  %v1738_v17 = vpop.f32.mrf.mxu1 }
  0xf6   :  { %v293_v7 = vpop.f32.mrf.mxu0  ;;  %v2369_v19 = vadd.f32 %v1738_v17, %v2355_v6 }
  0xf7   :  { %v2357_v8 = vadd.f32 %v293_v7, %v85_v62  ;;  %v359_v21 = vpop.f32.mrf.mxu1 }
  0xf8   :  { %v295_v9 = vpop.f32.mrf.mxu0  ;;  %v2374_v23 = vadd.f32 %v359_v21, %v2355_v6  ;;  %v284_v21 = vadd.f32 %v283_v59, %v85_v62  ;;  %v2405_v59 = vld [vmem:[%s2677_s4] ss:$0 sm:$0xff] }
  0xf9   :  { %v2359_v11 = vadd.f32 %v295_v9, %v89_v2  ;;  %v1741_v28 = vpop.f32.mrf.mxu1 }
  0xfa   :  { %v297_v13 = vpop.f32.mrf.mxu0  ;;  %v2379_v37 = vadd.f32 %v1741_v28, %v2355_v6 }
  0xfb   :  { %v2364_v15 = vadd.f32 %v297_v13, %v85_v62  ;;  %v372_v53 = vpop.f32.mrf.mxu1 }
  0xfc   :  { %v299_v16 = vpop.f32.mrf.mxu0  ;;  %2683 = vst [vmem:[#allocation8_spill] sm:$0xff] %v2379_v37  ;;  %v2384_v56 = vadd.f32 %v372_v53, %v2355_v6 }
  0xfd   :  { %v2366_v18 = vadd.f32 %v299_v16, %v89_v2  ;;  %v1742_v58 = vpop.f32.mrf.mxu1 }
  0xfe   :  { %v303_v20 = vpop.f32.mrf.mxu0  ;;  %v2389_v63 = vadd.f32 %v1742_v58, %v2355_v6 }
  0xff   :  { %v2371_v22 = vadd.f32 %v303_v20, %v85_v62  ;;  %v375_v4 = vpop.f32.mrf.mxu1 }
 0x100   :  { %v305_v25 = vpop.f32.mrf.mxu0  ;;  %2684 = vst [vmem:[#allocation9_spill] sm:$0xff] %v2389_v63  ;;  %v2394_v9 = vadd.f32 %v375_v4, %v2355_v6  ;;  %v2687_v6 = vmov 0.0  }
 0x101   :  { %v2376_v31 = vadd.f32 %v305_v25, %v89_v2 }
 0x102   :  { %v307_v43 = vpop.f32.mrf.mxu0 }
 0x103   :  { %v2381_v55 = vadd.f32 %v307_v43, %v85_v62 }
 0x104   :  { %v309_v57 = vpop.f32.mrf.mxu0 }
 0x105   :  { %v2386_v60 = vadd.f32 %v309_v57, %v89_v2 }
 0x106   :  { %v313_v1 = vpop.f32.mrf.mxu0 }
 0x107   :  { %v2391_v7 = vadd.f32 %v313_v1, %v85_v62 }
 0x108   :  { %v315_v10 = vpop.f32.mrf.mxu0 }
 0x109   :  { %v2396_v13 = vadd.f32 %v315_v10, %v89_v2 }
 0x10a   :  { %v317_v16 = vpop.f32.mrf.mxu0 }
 0x10b   :  { %2685 = vst [vmem:[#allocation10_spill] sm:$0xff] %v2396_v13  ;;  %v2398_v17 = vadd.f32 %v317_v16, %v85_v62 }
 0x10c   :  { %v319_v20 = vpop.f32.mrf.mxu0 }
 0x10d   :  { %2686 = vst [vmem:[#allocation11_spill] sm:$0xff] %v2398_v17  ;;  %v2400_v25 = vadd.f32 %v319_v20, %v89_v2 }
 0x10e   :  { %v620_v28 = vpop.f32.mrf.mxu0 }
 0x10f   :  { %v667_v43 = vadd.f32 %v620_v28, %v284_v21 }
 0x110   :  { %v622_v53 = vpop.f32.mrf.mxu0 }
 0x111   :  { %v1580_v57 = vmul.f32 -1.442695, %v667_v43  ;;  %v661_v4 = vpop.f32.mrf.mxu1  ;;  %v668_v35 = vadd.f32 %v622_v53, %v286_v0 }
 0x112   :  { %v624_v58 = vpop.f32.mrf.mxu0  ;;  %v681_v62 = vadd.f32 %v2405_v59, %v661_v4 }
 0x113   :  { %1978 = vpow2.f32 %v1580_v57  ;;  %v1761_v63 = vpop.f32.mrf.mxu1  ;;  %v1581_v37 = vmul.f32 -1.442695, %v668_v35 }
 0x114   :  { %v625_v1 = vpop.f32.mrf.mxu0 }
 0x115   :  { %v664_v10 = vpop.f32.mrf.mxu1  ;;  %1980 = vpow2.f32 %v1581_v37 }
 0x117   :  { %v1762_v13 = vpop.f32.mrf.mxu1 }
 0x120   :  { %v1979_v16 = vpop.eup %1978 }
 0x121   :  { %v675_v17 = vadd.f32 1.0, %v1979_v16 }
 0x122   :  { %v1981_v20 = vpop.eup %1980 }
 0x123   :  { %1982 = vrcp.f32 %v675_v17  ;;  %v676_v2 = vadd.f32 1.0, %v1981_v20 }
 0x130   :  { %v1983_v21 = vpop.eup %1982 }
 0x131   :  { %v682_v0 = vmul.f32 %v1983_v21, %v681_v62 }
 0x133   :  { %v683_v63 = vadd.f32 %v682_v0, %v357_v61 }
 0x135   :  { %1984 = vtanh.f32 %v683_v63 }
 0x136   :  { %1986 = vrcp.f32 %v676_v2 }
 0x142   :  { %v1985_v35 = vpop.eup %1984 }
 0x143   :  { %v685_v13 = vsub.f32 0.0, %v1985_v35  ;;  %v1987_v37 = vpop.eup %1986 }
 0x145   :  { %v686_v17 = vmul.f32 %v1987_v37, %v685_v13 }
 0x147   :  { %v2409_v28 = vadd.f32 %v1985_v35, %v686_v17 }
 0x149   :  { %v695_v43 = vpack.c.bf16 %v2409_v28, %v2409_v28 }
 0x14b   :  { %729 = vmatmul.mubr.bf16.vlgmr.msra.gmra.mxu0 %v695_v43  ;;  %1780 = vmatmul.mubr.bf16.vlgmr.msra.gmra.mxu1 %v695_v43 }
 0x14c   :  { %808 = vmatpush1.bf16.msra.mxu0 %v2215_v26  ;;  %1784 = vmatpush3.bf16.msra.mxu1 %v2239_v34 }
 0x14d   :  { %809 = vmatprep.subr.bf16.mxu0 %v2218_v27  ;;  %1785 = vmatprep.subr.bf16.mxu1 %v2687_v6 }
 0x14e   :  { %839 = vmatprep.mubr.bf16.mxu0 %v2688_v14  ;;  %1799 = vmatprep.mubr.msk.bf16.mxu1 %vm2105_vm0, %v2687_v6 }
 0x150   :  { %810 = vmatpush1.bf16.msra.mxu0 %v2224_v29  ;;  %1786 = vmatpush3.bf16.msra.mxu1 %v2253_v39 }
 0x151   :  { %811 = vmatprep.subr.bf16.mxu0 %v2228_v30  ;;  %1787 = vmatprep.subr.bf16.mxu1 %v2687_v6 }
 0x154   :  { %812 = vmatpush1.bf16.msra.mxu0 %v2234_v32  ;;  %1788 = vmatpush3.bf16.msra.mxu1 %v2263_v42 }
 0x155   :  { %813 = vmatprep.subr.bf16.mxu0 %v2237_v33  ;;  %1789 = vmatprep.subr.bf16.mxu1 %v2687_v6 }
 0x158   :  { %814 = vmatpush1.bf16.msra.mxu0 %v2243_v36  ;;  %1790 = vmatpush3.bf16.msra.mxu1 %v2277_v46 }
 0x159   :  { %815 = vmatprep.subr.bf16.mxu0 %v2250_v38  ;;  %1791 = vmatprep.subr.bf16.mxu1 %v2687_v6 }
 0x15c   :  { %816 = vmatpush1.bf16.msra.mxu0 %v2257_v40  ;;  %1792 = vmatpush3.bf16.msra.mxu1 %v2289_v49 }
 0x15d   :  { %817 = vmatprep.subr.bf16.mxu0 %v2260_v41  ;;  %1793 = vmatprep.subr.bf16.mxu1 %v2687_v6 }
 0x160   :  { %818 = vmatpush1.bf16.msra.mxu0 %v2270_v44  ;;  %1794 = vmatpush3.bf16.msra.mxu1 %v2298_v51 }
 0x161   :  { %819 = vmatprep.subr.bf16.mxu0 %v2274_v45  ;;  %1795 = vmatprep.subr.bf16.mxu1 %v2687_v6 }
 0x164   :  { %820 = vmatpush1.bf16.msra.mxu0 %v2283_v47  ;;  %1796 = vmatpush3.bf16.msra.mxu1 %v2304_v52 }
 0x165   :  { %821 = vmatprep.subr.bf16.mxu0 %v2286_v48  ;;  %1797 = vmatprep.subr.bf16.mxu1 %v2687_v6 }
 0x168   :  { %822 = vmatpush1.bf16.msra.mxu0 %v2293_v50  ;;  %1798 = vmatpush3.bf16.msra.mxu1 %v2311_v54 }
 0x169   :  { %918 = vmatprep.subr.bf16.mxu0 %v2210_v24  ;;  %1803 = vmatprep.subr.bf16.mxu1 %v2687_v6 }
 0x20b   :  { %v730_v53 = vpop.f32.mrf.mxu0  ;;  %v771_v57 = vpop.f32.mrf.mxu1 }
 0x20c   :  { %v777_v58 = vadd.f32 %v730_v53, %v2351_v3  ;;  %v791_v13 = vadd.f32 %v2405_v59, %v771_v57 }
 0x20d   :  { %v732_v1 = vpop.f32.mrf.mxu0  ;;  %v1781_v4 = vpop.f32.mrf.mxu1 }
 0x20e   :  { %v1582_v10 = vmul.f32 -1.442695, %v777_v58  ;;  %v778_v61 = vadd.f32 %v732_v1, %v2353_v5 }
 0x20f   :  { %v734_v16 = vpop.f32.mrf.mxu0  ;;  %v774_v62 = vpop.f32.mrf.mxu1 }
 0x210   :  { %1988 = vpow2.f32 %v1582_v10  ;;  %v1583_v0 = vmul.f32 -1.442695, %v778_v61 }
 0x211   :  { %v735_v20 = vpop.f32.mrf.mxu0  ;;  %v1782_v21 = vpop.f32.mrf.mxu1 }
 0x212   :  { %1990 = vpow2.f32 %v1583_v0 }
 0x21d   :  { %v1989_v2 = vpop.eup %1988 }
 0x21e   :  { %v785_v63 = vadd.f32 1.0, %v1989_v2 }
 0x21f   :  { %v1991_v35 = vpop.eup %1990 }
 0x220   :  { %1992 = vrcp.f32 %v785_v63  ;;  %v786_v43 = vadd.f32 1.0, %v1991_v35 }
 0x22d   :  { %v1993_v37 = vpop.eup %1992 }
 0x22e   :  { %v792_v3 = vmul.f32 %v1993_v37, %v791_v13 }
 0x230   :  { %v793_v17 = vadd.f32 %v792_v3, %v2374_v23 }
 0x232   :  { %1994 = vtanh.f32 %v793_v17 }
 0x233   :  { %1996 = vrcp.f32 %v786_v43 }
 0x23f   :  { %v1995_v53 = vpop.eup %1994 }
 0x240   :  { %v795_v58 = vsub.f32 %v2409_v28, %v1995_v53  ;;  %v1997_v4 = vpop.eup %1996 }
 0x242   :  { %v796_v5 = vmul.f32 %v1997_v4, %v795_v58 }
 0x244   :  { %v2453_v1 = vadd.f32 %v1995_v53, %v796_v5 }
 0x246   :  { %v806_v10 = vpack.c.bf16 %v2453_v1, %v2453_v1  ;;  %v1615_v57 = vpack.c.bf16 %v2453_v1, %v2409_v28 }
 0x248   :  { %840 = vmatmul.mubr.bf16.vlgmr.msra.gmra.mxu0 %v806_v10  ;;  %1616 = vst [vmem:[%s2678_s5] sm:$0xff] %v1615_v57   ;;  %1800 = vmatmul.mubr.bf16.vlgmr.msra.gmra.mxu1 %v806_v10 }
 0x249   :  { %919 = vmatpush1.bf16.msra.mxu0 %v2215_v26  ;;  %1804 = vmatpush3.bf16.msra.mxu1 %v2239_v34 }
 0x24a   :  { %920 = vmatprep.subr.bf16.mxu0 %v2218_v27  ;;  %1805 = vmatprep.subr.bf16.mxu1 %v2687_v6 }
 0x24b   :  { %950 = vmatprep.mubr.bf16.mxu0 %v2688_v14  ;;  %1819 = vmatprep.mubr.msk.bf16.mxu1 %vm2105_vm0, %v2687_v6 }
 0x24d   :  { %921 = vmatpush1.bf16.msra.mxu0 %v2224_v29  ;;  %1806 = vmatpush3.bf16.msra.mxu1 %v2253_v39 }
 0x24e   :  { %922 = vmatprep.subr.bf16.mxu0 %v2228_v30  ;;  %1807 = vmatprep.subr.bf16.mxu1 %v2687_v6 }
 0x251   :  { %923 = vmatpush1.bf16.msra.mxu0 %v2234_v32  ;;  %1808 = vmatpush3.bf16.msra.mxu1 %v2263_v42 }
 0x252   :  { %924 = vmatprep.subr.bf16.mxu0 %v2237_v33  ;;  %1809 = vmatprep.subr.bf16.mxu1 %v2687_v6 }
 0x255   :  { %925 = vmatpush1.bf16.msra.mxu0 %v2243_v36  ;;  %1810 = vmatpush3.bf16.msra.mxu1 %v2277_v46 }
 0x256   :  { %926 = vmatprep.subr.bf16.mxu0 %v2250_v38  ;;  %1811 = vmatprep.subr.bf16.mxu1 %v2687_v6 }
 0x259   :  { %927 = vmatpush1.bf16.msra.mxu0 %v2257_v40  ;;  %1812 = vmatpush3.bf16.msra.mxu1 %v2289_v49 }
 0x25a   :  { %928 = vmatprep.subr.bf16.mxu0 %v2260_v41  ;;  %1813 = vmatprep.subr.bf16.mxu1 %v2687_v6 }
 0x25d   :  { %929 = vmatpush1.bf16.msra.mxu0 %v2270_v44  ;;  %1814 = vmatpush3.bf16.msra.mxu1 %v2298_v51 }
 0x25e   :  { %930 = vmatprep.subr.bf16.mxu0 %v2274_v45  ;;  %1815 = vmatprep.subr.bf16.mxu1 %v2687_v6 }
 0x261   :  { %931 = vmatpush1.bf16.msra.mxu0 %v2283_v47  ;;  %1816 = vmatpush3.bf16.msra.mxu1 %v2304_v52 }
 0x262   :  { %932 = vmatprep.subr.bf16.mxu0 %v2286_v48  ;;  %1817 = vmatprep.subr.bf16.mxu1 %v2687_v6 }
 0x265   :  { %933 = vmatpush1.bf16.msra.mxu0 %v2293_v50  ;;  %1818 = vmatpush3.bf16.msra.mxu1 %v2311_v54 }
 0x266   :  { %1029 = vmatprep.subr.bf16.mxu0 %v2210_v24  ;;  %1823 = vmatprep.subr.bf16.mxu1 %v2687_v6 }
 0x308   :  { %v841_v23 = vpop.f32.mrf.mxu0  ;;  %v882_v28 = vpop.f32.mrf.mxu1 }
 0x309   :  { %v888_v16 = vadd.f32 %v841_v23, %v2357_v8  ;;  %v902_v43 = vadd.f32 %v2405_v59, %v882_v28 }
 0x30a   :  { %v843_v62 = vpop.f32.mrf.mxu0  ;;  %v1801_v20 = vpop.f32.mrf.mxu1 }
 0x30b   :  { %v1584_v21 = vmul.f32 -1.442695, %v888_v16  ;;  %v889_v35 = vadd.f32 %v843_v62, %v2359_v11 }
 0x30c   :  { %v845_v61 = vpop.f32.mrf.mxu0  ;;  %v885_v0 = vpop.f32.mrf.mxu1 }
 0x30d   :  { %1998 = vpow2.f32 %v1584_v21  ;;  %v1585_v13 = vmul.f32 -1.442695, %v889_v35 }
 0x30e   :  { %v846_v2 = vpop.f32.mrf.mxu0  ;;  %v1802_v63 = vpop.f32.mrf.mxu1 }
 0x30f   :  { %2000 = vpow2.f32 %v1585_v13 }
 0x31a   :  { %v1999_v37 = vpop.eup %1998 }
 0x31b   :  { %v896_v3 = vadd.f32 1.0, %v1999_v37 }
 0x31c   :  { %v2001_v17 = vpop.eup %2000 }
 0x31d   :  { %2002 = vrcp.f32 %v896_v3  ;;  %v897_v4 = vadd.f32 1.0, %v2001_v17 }
 0x32a   :  { %v2003_v53 = vpop.eup %2002 }
 0x32b   :  { %v903_v8 = vmul.f32 %v2003_v53, %v902_v43 }
 0x32d   :  { %v904_v58 = vadd.f32 %v903_v8, %v2362_v12 }
 0x32f   :  { %2004 = vtanh.f32 %v904_v58 }
 0x330   :  { %2006 = vrcp.f32 %v897_v4 }
 0x33c   :  { %v2005_v5 = vpop.eup %2004 }
 0x33d   :  { %v906_v10 = vsub.f32 %v2453_v1, %v2005_v5  ;;  %v2007_v57 = vpop.eup %2006 }
 0x33f   :  { %v907_v11 = vmul.f32 %v2007_v57, %v906_v10 }
 0x341   :  { %v2502_v23 = vadd.f32 %v2005_v5, %v907_v11 }
 0x343   :  { %v917_v16 = vpack.c.bf16 %v2502_v23, %v2502_v23 }
 0x345   :  { %951 = vmatmul.mubr.bf16.vlgmr.msra.gmra.mxu0 %v917_v16  ;;  %1820 = vmatmul.mubr.bf16.vlgmr.msra.gmra.mxu1 %v917_v16 }
 0x346   :  { %1030 = vmatpush1.bf16.msra.mxu0 %v2215_v26  ;;  %1824 = vmatpush3.bf16.msra.mxu1 %v2239_v34 }
 0x347   :  { %1031 = vmatprep.subr.bf16.mxu0 %v2218_v27  ;;  %1825 = vmatprep.subr.bf16.mxu1 %v2687_v6 }
 0x348   :  { %1061 = vmatprep.mubr.bf16.mxu0 %v2688_v14  ;;  %1839 = vmatprep.mubr.msk.bf16.mxu1 %vm2105_vm0, %v2687_v6 }
 0x34a   :  { %1032 = vmatpush1.bf16.msra.mxu0 %v2224_v29  ;;  %1826 = vmatpush3.bf16.msra.mxu1 %v2253_v39 }
 0x34b   :  { %1033 = vmatprep.subr.bf16.mxu0 %v2228_v30  ;;  %1827 = vmatprep.subr.bf16.mxu1 %v2687_v6 }
 0x34e   :  { %1034 = vmatpush1.bf16.msra.mxu0 %v2234_v32  ;;  %1828 = vmatpush3.bf16.msra.mxu1 %v2263_v42 }
 0x34f   :  { %1035 = vmatprep.subr.bf16.mxu0 %v2237_v33  ;;  %1829 = vmatprep.subr.bf16.mxu1 %v2687_v6 }
 0x352   :  { %1036 = vmatpush1.bf16.msra.mxu0 %v2243_v36  ;;  %1830 = vmatpush3.bf16.msra.mxu1 %v2277_v46 }
 0x353   :  { %1037 = vmatprep.subr.bf16.mxu0 %v2250_v38  ;;  %1831 = vmatprep.subr.bf16.mxu1 %v2687_v6 }
 0x356   :  { %1038 = vmatpush1.bf16.msra.mxu0 %v2257_v40  ;;  %1832 = vmatpush3.bf16.msra.mxu1 %v2289_v49 }
 0x357   :  { %1039 = vmatprep.subr.bf16.mxu0 %v2260_v41  ;;  %1833 = vmatprep.subr.bf16.mxu1 %v2687_v6 }
 0x35a   :  { %1040 = vmatpush1.bf16.msra.mxu0 %v2270_v44  ;;  %1834 = vmatpush3.bf16.msra.mxu1 %v2298_v51 }
 0x35b   :  { %1041 = vmatprep.subr.bf16.mxu0 %v2274_v45  ;;  %1835 = vmatprep.subr.bf16.mxu1 %v2687_v6 }
 0x35e   :  { %1042 = vmatpush1.bf16.msra.mxu0 %v2283_v47  ;;  %1836 = vmatpush3.bf16.msra.mxu1 %v2304_v52 }
 0x35f   :  { %1043 = vmatprep.subr.bf16.mxu0 %v2286_v48  ;;  %1837 = vmatprep.subr.bf16.mxu1 %v2687_v6 }
 0x362   :  { %1044 = vmatpush1.bf16.msra.mxu0 %v2293_v50  ;;  %1838 = vmatpush3.bf16.msra.mxu1 %v2311_v54 }
 0x363   :  { %1140 = vmatprep.subr.bf16.mxu0 %v2210_v24  ;;  %1843 = vmatprep.subr.bf16.mxu1 %v2687_v6 }
 0x405   :  { %v952_v12 = vpop.f32.mrf.mxu0  ;;  %v993_v1 = vpop.f32.mrf.mxu1 }
 0x406   :  { %v999_v28 = vadd.f32 %v952_v12, %v2364_v15  ;;  %v1013_v43 = vadd.f32 %v2405_v59, %v993_v1 }
 0x407   :  { %v954_v62 = vpop.f32.mrf.mxu0  ;;  %v1821_v20 = vpop.f32.mrf.mxu1 }
 0x408   :  { %v1586_v21 = vmul.f32 -1.442695, %v999_v28  ;;  %v1000_v35 = vadd.f32 %v954_v62, %v2366_v18 }
 0x409   :  { %v956_v61 = vpop.f32.mrf.mxu0  ;;  %v996_v0 = vpop.f32.mrf.mxu1 }
 0x40a   :  { %2008 = vpow2.f32 %v1586_v21  ;;  %v1587_v13 = vmul.f32 -1.442695, %v1000_v35 }
 0x40b   :  { %v957_v2 = vpop.f32.mrf.mxu0  ;;  %v1822_v63 = vpop.f32.mrf.mxu1 }
 0x40c   :  { %2010 = vpow2.f32 %v1587_v13 }
 0x417   :  { %v2009_v37 = vpop.eup %2008 }
 0x418   :  { %v1007_v3 = vadd.f32 1.0, %v2009_v37 }
 0x419   :  { %v2011_v17 = vpop.eup %2010 }
 0x41a   :  { %2012 = vrcp.f32 %v1007_v3  ;;  %v1008_v58 = vadd.f32 1.0, %v2011_v17 }
 0x427   :  { %v2013_v53 = vpop.eup %2012 }
 0x428   :  { %v1014_v15 = vmul.f32 %v2013_v53, %v1013_v43 }
 0x42a   :  { %v1015_v8 = vadd.f32 %v1014_v15, %v2369_v19 }
 0x42c   :  { %2014 = vtanh.f32 %v1015_v8 }
 0x42d   :  { %2016 = vrcp.f32 %v1008_v58 }
 0x439   :  { %v2015_v4 = vpop.eup %2014 }
 0x43a   :  { %v1017_v5 = vsub.f32 %v2502_v23, %v2015_v4  ;;  %v2017_v10 = vpop.eup %2016 }
 0x43c   :  { %v1018_v18 = vmul.f32 %v2017_v10, %v1017_v5 }
 0x43e   :  { %v2546_v57 = vadd.f32 %v2015_v4, %v1018_v18 }
 0x440   :  { %v1028_v11 = vpack.c.bf16 %v2546_v57, %v2546_v57  ;;  %v1620_v16 = vpack.c.bf16 %v2546_v57, %v2502_v23 }
 0x442   :  { %1062 = vmatmul.mubr.bf16.vlgmr.msra.gmra.mxu0 %v1028_v11  ;;  %1632 = vst [vmem:[%s2678_s5 + $0x8] sm:$0xff] %v1620_v16   ;;  %1840 = vmatmul.mubr.bf16.vlgmr.msra.gmra.mxu1 %v1028_v11 }
 0x443   :  { %1141 = vmatpush1.bf16.msra.mxu0 %v2215_v26  ;;  %1844 = vmatpush3.bf16.msra.mxu1 %v2239_v34 }
 0x444   :  { %1142 = vmatprep.subr.bf16.mxu0 %v2218_v27  ;;  %1845 = vmatprep.subr.bf16.mxu1 %v2687_v6 }
 0x445   :  { %1172 = vmatprep.mubr.bf16.mxu0 %v2688_v14  ;;  %1859 = vmatprep.mubr.msk.bf16.mxu1 %vm2105_vm0, %v2687_v6 }
 0x447   :  { %1143 = vmatpush1.bf16.msra.mxu0 %v2224_v29  ;;  %1846 = vmatpush3.bf16.msra.mxu1 %v2253_v39 }
 0x448   :  { %1144 = vmatprep.subr.bf16.mxu0 %v2228_v30  ;;  %1847 = vmatprep.subr.bf16.mxu1 %v2687_v6 }
 0x44b   :  { %1145 = vmatpush1.bf16.msra.mxu0 %v2234_v32  ;;  %1848 = vmatpush3.bf16.msra.mxu1 %v2263_v42 }
 0x44c   :  { %1146 = vmatprep.subr.bf16.mxu0 %v2237_v33  ;;  %1849 = vmatprep.subr.bf16.mxu1 %v2687_v6 }
 0x44f   :  { %1147 = vmatpush1.bf16.msra.mxu0 %v2243_v36  ;;  %1850 = vmatpush3.bf16.msra.mxu1 %v2277_v46 }
 0x450   :  { %1148 = vmatprep.subr.bf16.mxu0 %v2250_v38  ;;  %1851 = vmatprep.subr.bf16.mxu1 %v2687_v6 }
 0x453   :  { %1149 = vmatpush1.bf16.msra.mxu0 %v2257_v40  ;;  %1852 = vmatpush3.bf16.msra.mxu1 %v2289_v49 }
 0x454   :  { %1150 = vmatprep.subr.bf16.mxu0 %v2260_v41  ;;  %1853 = vmatprep.subr.bf16.mxu1 %v2687_v6 }
 0x457   :  { %1151 = vmatpush1.bf16.msra.mxu0 %v2270_v44  ;;  %1854 = vmatpush3.bf16.msra.mxu1 %v2298_v51 }
 0x458   :  { %1152 = vmatprep.subr.bf16.mxu0 %v2274_v45  ;;  %1855 = vmatprep.subr.bf16.mxu1 %v2687_v6 }
 0x45b   :  { %1153 = vmatpush1.bf16.msra.mxu0 %v2283_v47  ;;  %1856 = vmatpush3.bf16.msra.mxu1 %v2304_v52 }
 0x45c   :  { %1154 = vmatprep.subr.bf16.mxu0 %v2286_v48  ;;  %1857 = vmatprep.subr.bf16.mxu1 %v2687_v6 }
 0x45f   :  { %1155 = vmatpush1.bf16.msra.mxu0 %v2293_v50  ;;  %1858 = vmatpush3.bf16.msra.mxu1 %v2311_v54 }
 0x460   :  { %1251 = vmatprep.subr.bf16.mxu0 %v2210_v24  ;;  %1863 = vmatprep.subr.bf16.mxu1 %v2687_v6 }
 0x502   :  { %v1063_v19 = vpop.f32.mrf.mxu0  ;;  %v1104_v23 = vpop.f32.mrf.mxu1 }
 0x503   :  { %v1110_v12 = vadd.f32 %v1063_v19, %v2371_v22  ;;  %v1124_v37 = vadd.f32 %v2405_v59, %v1104_v23  ;;  %v2060_v19 = vld [vmem:[#allocation5 + $0xb0] ss:$12 sps:$4 sm:$0xff]   ;;  %v2061_v23 = vld [vmem:[#allocation5 + $0x94] ss:$12 sps:$4 sm:$0xff]  }
 0x504   :  { %v1065_v1 = vpop.f32.mrf.mxu0  ;;  %v1841_v28 = vpop.f32.mrf.mxu1 }
 0x505   :  { %v1588_v62 = vmul.f32 -1.442695, %v1110_v12  ;;  %v1111_v2 = vadd.f32 %v1065_v1, %v2376_v31  ;;  %v2062_v12 = vld [vmem:[#allocation5 + $0x90] ss:$12 sps:$4 sm:$0xff]   ;;  %v2063_v1 = vld [vmem:[#allocation5 + $0x98] ss:$12 sps:$4 sm:$0xff]  }
 0x506   :  { %v1067_v20 = vpop.f32.mrf.mxu0  ;;  %v1107_v21 = vpop.f32.mrf.mxu1  ;;  %v2064_v28 = vld [vmem:[#allocation5 + $0x7c] ss:$12 sps:$4 sm:$0xff]  }
 0x507   :  { %2018 = vpow2.f32 %v1588_v62  ;;  %v1589_v63 = vmul.f32 -1.442695, %v1111_v2  ;;  %v2065_v62 = vld [vmem:[#allocation5 + $0x78] ss:$12 sps:$4 sm:$0xff]   ;;  %v2066_v20 = vld [vmem:[#allocation5 + $0x80] ss:$12 sps:$4 sm:$0xff]  }
 0x508   :  { %v1068_v61 = vpop.f32.mrf.mxu0  ;;  %v1842_v0 = vpop.f32.mrf.mxu1  ;;  %v2067_v21 = vld [vmem:[#allocation5 + $0x64] ss:$12 sps:$4 sm:$0xff]   ;;  %v2071_v2 = vld [vmem:[#allocation5 + $0x48] ss:$12 sps:$4 sm:$0xff]  }
 0x509   :  { %2020 = vpow2.f32 %v1589_v63  ;;  %v2069_v61 = vld [vmem:[#allocation5 + $0x68] ss:$12 sps:$4 sm:$0xff]   ;;  %v2070_v0 = vld [vmem:[#allocation5 + $0x4c] ss:$12 sps:$4 sm:$0xff]  }
 0x50a   :  { %v2072_v63 = vld [vmem:[#allocation5 + $0x34] ss:$12 sps:$4 sm:$0xff]  }
 0x514   :  { %v2019_v35 = vpop.eup %2018 }
 0x515   :  { %v1118_v13 = vadd.f32 1.0, %v2019_v35  ;;  %v2073_v35 = vld [vmem:[#allocation5 + $0x30] ss:$12 sps:$4 sm:$0xff]  }
 0x516   :  { %v2021_v24 = vpop.eup %2020 }
 0x517   :  { %2022 = vrcp.f32 %v1118_v13  ;;  %v1119_v43 = vadd.f32 1.0, %v2021_v24  ;;  %v2074_v13 = vld [vmem:[#allocation5 + $0x1c] ss:$12 sps:$4 sm:$0xff]   ;;  %v2075_v24 = vld [vmem:[#allocation5 + $0x18] ss:$12 sps:$4 sm:$0xff]  }
 0x524   :  { %v2023_v3 = vpop.eup %2022 }
 0x525   :  { %v1125_v22 = vmul.f32 %v2023_v3, %v1124_v37  ;;  %v2076_v37 = vld [vmem:[#allocation5 + $0x4] ss:$12 sps:$4 sm:$0xff]  }
 0x527   :  { %v1126_v17 = vadd.f32 %v1125_v22, %v2384_v56 }
 0x529   :  { %2024 = vtanh.f32 %v1126_v17 }
 0x52a   :  { %2026 = vrcp.f32 %v1119_v43 }
 0x536   :  { %v2025_v53 = vpop.eup %2024 }
 0x537   :  { %v1128_v15 = vsub.f32 %v2546_v57, %v2025_v53  ;;  %v2027_v8 = vpop.eup %2026 }
 0x539   :  { %v1129_v31 = vmul.f32 %v2027_v8, %v1128_v15 }
 0x53b   :  { %v2595_v58 = vadd.f32 %v2025_v53, %v1129_v31 }
 0x53d   :  { %v1139_v4 = vpack.c.bf16 %v2595_v58, %v2595_v58 }
 0x53f   :  { %1173 = vmatmul.mubr.bf16.vlgmr.msra.gmra.mxu0 %v1139_v4  ;;  %1860 = vmatmul.mubr.bf16.vlgmr.msra.gmra.mxu1 %v1139_v4 }
 0x540   :  { %1252 = vmatpush1.bf16.msra.mxu0 %v2215_v26  ;;  %1864 = vmatpush3.bf16.msra.mxu1 %v2239_v34  ;;  %v2058_v26 = vld [vmem:[#allocation5 + $0xac] ss:$12 sps:$4 sm:$0xff]  }
 0x541   :  { %1253 = vmatprep.subr.bf16.mxu0 %v2218_v27  ;;  %1865 = vmatprep.subr.bf16.mxu1 %v2687_v6 }
 0x542   :  { %1283 = vmatprep.mubr.bf16.mxu0 %v2688_v14  ;;  %1879 = vmatprep.mubr.msk.bf16.mxu1 %vm2105_vm0, %v2687_v6 }
 0x544   :  { %1254 = vmatpush1.bf16.msra.mxu0 %v2224_v29  ;;  %1866 = vmatpush3.bf16.msra.mxu1 %v2253_v39 }
 0x545   :  { %1255 = vmatprep.subr.bf16.mxu0 %v2228_v30  ;;  %1867 = vmatprep.subr.bf16.mxu1 %v2687_v6 }
 0x548   :  { %1256 = vmatpush1.bf16.msra.mxu0 %v2234_v32  ;;  %1868 = vmatpush3.bf16.msra.mxu1 %v2263_v42 }
 0x549   :  { %1257 = vmatprep.subr.bf16.mxu0 %v2237_v33  ;;  %1869 = vmatprep.subr.bf16.mxu1 %v2687_v6 }
 0x54c   :  { %1258 = vmatpush1.bf16.msra.mxu0 %v2243_v36  ;;  %1870 = vmatpush3.bf16.msra.mxu1 %v2277_v46 }
 0x54d   :  { %1259 = vmatprep.subr.bf16.mxu0 %v2250_v38  ;;  %1871 = vmatprep.subr.bf16.mxu1 %v2687_v6 }
 0x550   :  { %1260 = vmatpush1.bf16.msra.mxu0 %v2257_v40  ;;  %1872 = vmatpush3.bf16.msra.mxu1 %v2289_v49 }
 0x551   :  { %1261 = vmatprep.subr.bf16.mxu0 %v2260_v41  ;;  %1873 = vmatprep.subr.bf16.mxu1 %v2687_v6 }
 0x554   :  { %1262 = vmatpush1.bf16.msra.mxu0 %v2270_v44  ;;  %1874 = vmatpush3.bf16.msra.mxu1 %v2298_v51 }
 0x555   :  { %1263 = vmatprep.subr.bf16.mxu0 %v2274_v45  ;;  %1875 = vmatprep.subr.bf16.mxu1 %v2687_v6 }
 0x558   :  { %1264 = vmatpush1.bf16.msra.mxu0 %v2283_v47  ;;  %1876 = vmatpush3.bf16.msra.mxu1 %v2304_v52 }
 0x559   :  { %1265 = vmatprep.subr.bf16.mxu0 %v2286_v48  ;;  %1877 = vmatprep.subr.bf16.mxu1 %v2687_v6 }
 0x55c   :  { %1266 = vmatpush1.bf16.msra.mxu0 %v2293_v50  ;;  %1878 = vmatpush3.bf16.msra.mxu1 %v2311_v54 }
 0x55d   :  { %1362 = vmatprep.subr.bf16.mxu0 %v2058_v26  ;;  %1883 = vmatprep.subr.bf16.mxu1 %v2687_v6 }
 0x5ff   :  { %v1174_v27 = vpop.f32.mrf.mxu0  ;;  %v1215_v29 = vpop.f32.mrf.mxu1 }
 0x600   :  { %v1221_v30 = vadd.f32 %v1174_v27, %v2381_v55  ;;  %v1235_v47 = vadd.f32 %v2405_v59, %v1215_v29 }
 0x601   :  { %v1176_v32 = vpop.f32.mrf.mxu0  ;;  %v1861_v33 = vpop.f32.mrf.mxu1 }
 0x602   :  { %v1590_v34 = vmul.f32 -1.442695, %v1221_v30  ;;  %v1222_v41 = vadd.f32 %v1176_v32, %v2386_v60  ;;  %v2690_v32 = vld [vmem:[#allocation8_spill] sm:$0xff] }
 0x603   :  { %v1178_v36 = vpop.f32.mrf.mxu0  ;;  %v1218_v38 = vpop.f32.mrf.mxu1 }
 0x604   :  { %2028 = vpow2.f32 %v1590_v34  ;;  %v1591_v42 = vmul.f32 -1.442695, %v1222_v41 }
 0x605   :  { %v1179_v39 = vpop.f32.mrf.mxu0  ;;  %v1862_v40 = vpop.f32.mrf.mxu1 }
 0x606   :  { %2030 = vpow2.f32 %v1591_v42 }
 0x611   :  { %v2029_v44 = vpop.eup %2028 }
 0x612   :  { %v1229_v45 = vadd.f32 1.0, %v2029_v44 }
 0x613   :  { %v2031_v46 = vpop.eup %2030 }
 0x614   :  { %2032 = vrcp.f32 %v1229_v45  ;;  %v1230_v56 = vadd.f32 1.0, %v2031_v46  ;;  %v2691_v46 = vld [vmem:[#allocation11_spill] sm:$0xff] }
 0x621   :  { %v2033_v48 = vpop.eup %2032 }
 0x622   :  { %v1236_v50 = vmul.f32 %v2033_v48, %v1235_v47 }
 0x624   :  { %v1237_v55 = vadd.f32 %v1236_v50, %v2394_v9  ;;  %v2059_v9 = vld [vmem:[#allocation5 + $0xa8] ss:$12 sps:$4 sm:$0xff]  }
 0x626   :  { %2034 = vtanh.f32 %v1237_v55 }
 0x627   :  { %2036 = vrcp.f32 %v1230_v56 }
 0x633   :  { %v2035_v5 = vpop.eup %2034 }
 0x634   :  { %v1239_v10 = vsub.f32 %v2595_v58, %v2035_v5  ;;  %v2037_v18 = vpop.eup %2036 }
 0x636   :  { %v1240_v60 = vmul.f32 %v2037_v18, %v1239_v10 }
 0x638   :  { %v2638_v57 = vadd.f32 %v2035_v5, %v1240_v60 }
 0x63a   :  { %v1250_v11 = vpack.c.bf16 %v2638_v57, %v2638_v57  ;;  %v1625_v16 = vpack.c.bf16 %v2638_v57, %v2595_v58  ;;  %v2689_v58 = vld [vmem:[#allocation10_spill] sm:$0xff] }
 0x63c   :  { %1284 = vmatmul.mubr.bf16.vlgmr.msra.gmra.mxu0 %v1250_v11  ;;  %1633 = vst [vmem:[%s2678_s5 + $0x10] sm:$0xff] %v1625_v16   ;;  %1880 = vmatmul.mubr.bf16.vlgmr.msra.gmra.mxu1 %v1250_v11 }
 0x63d   :  { %1363 = vmatpush1.bf16.msra.mxu0 %v2059_v9  ;;  %1884 = vmatpush3.bf16.msra.mxu1 %v2060_v19 }
 0x63e   :  { %1364 = vmatprep.subr.bf16.mxu0 %v2061_v23  ;;  %1885 = vmatprep.subr.bf16.mxu1 %v2687_v6 }
 0x63f   :  { %1394 = vmatprep.mubr.bf16.mxu0 %v2688_v14  ;;  %1899 = vmatprep.mubr.msk.bf16.mxu1 %vm2105_vm0, %v2687_v6  ;;  %v2068_v14 = vld [vmem:[#allocation5 + $0x60] ss:$12 sps:$4 sm:$0xff]  }
 0x641   :  { %1365 = vmatpush1.bf16.msra.mxu0 %v2062_v12  ;;  %1886 = vmatpush3.bf16.msra.mxu1 %v2063_v1  ;;  %v2692_v1 = vld [vmem:[#allocation9_spill] sm:$0xff] }
 0x642   :  { %1366 = vmatprep.subr.bf16.mxu0 %v2064_v28  ;;  %1887 = vmatprep.subr.bf16.mxu1 %v2687_v6 }
 0x645   :  { %1367 = vmatpush1.bf16.msra.mxu0 %v2065_v62  ;;  %1888 = vmatpush3.bf16.msra.mxu1 %v2066_v20 }
 0x646   :  { %1368 = vmatprep.subr.bf16.mxu0 %v2067_v21  ;;  %1889 = vmatprep.subr.bf16.mxu1 %v2687_v6 }
 0x649   :  { %1369 = vmatpush1.bf16.msra.mxu0 %v2068_v14  ;;  %1890 = vmatpush3.bf16.msra.mxu1 %v2069_v61 }
 0x64a   :  { %1370 = vmatprep.subr.bf16.mxu0 %v2070_v0  ;;  %1891 = vmatprep.subr.bf16.mxu1 %v2687_v6 }
 0x64d   :  { %1371 = vmatpush1.bf16.msra.mxu0 %v2071_v2  ;;  %1892 = vmatpush3.bf16.msra.mxu1 %v2289_v49  ;;  %v2077_v49 = vld [vmem:[#allocation5] ss:$12 sps:$4 sm:$0xff]  }
 0x64e   :  { %1372 = vmatprep.subr.bf16.mxu0 %v2072_v63  ;;  %1893 = vmatprep.subr.bf16.mxu1 %v2687_v6 }
 0x651   :  { %1373 = vmatpush1.bf16.msra.mxu0 %v2073_v35  ;;  %1894 = vmatpush3.bf16.msra.mxu1 %v2298_v51 }
 0x652   :  { %1374 = vmatprep.subr.bf16.mxu0 %v2074_v13  ;;  %1895 = vmatprep.subr.bf16.mxu1 %v2687_v6 }
 0x655   :  { %1375 = vmatpush1.bf16.msra.mxu0 %v2075_v24  ;;  %1896 = vmatpush3.bf16.msra.mxu1 %v2304_v52 }
 0x656   :  { %1376 = vmatprep.subr.bf16.mxu0 %v2076_v37  ;;  %1897 = vmatprep.subr.bf16.mxu1 %v2687_v6 }
 0x659   :  { %1377 = vmatpush1.bf16.msra.mxu0 %v2077_v49  ;;  %1898 = vmatpush3.bf16.msra.mxu1 %v2311_v54 }
 0x6fc   :  { %v1285_v3 = vpop.f32.mrf.mxu0  ;;  %v1326_v22 = vpop.f32.mrf.mxu1 }
 0x6fd   :  { %v1332_v51 = vadd.f32 %v1285_v3, %v2391_v7  ;;  %v1346_v29 = vadd.f32 %v2405_v59, %v1326_v22 }
 0x6fe   :  { %v1287_v17 = vpop.f32.mrf.mxu0  ;;  %v1881_v43 = vpop.f32.mrf.mxu1 }
 0x6ff   :  { %v1592_v53 = vmul.f32 -1.442695, %v1332_v51  ;;  %v1333_v4 = vadd.f32 %v1287_v17, %v2689_v58 }
 0x700   :  { %v1289_v15 = vpop.f32.mrf.mxu0  ;;  %v1329_v8 = vpop.f32.mrf.mxu1 }
 0x701   :  { %2038 = vpow2.f32 %v1592_v53  ;;  %v1593_v26 = vmul.f32 -1.442695, %v1333_v4 }
 0x702   :  { %v1290_v31 = vpop.f32.mrf.mxu0  ;;  %v1882_v52 = vpop.f32.mrf.mxu1 }
 0x703   :  { %2040 = vpow2.f32 %v1593_v26 }
 0x70e   :  { %v2039_v6 = vpop.eup %2038 }
 0x70f   :  { %v1340_v27 = vadd.f32 1.0, %v2039_v6 }
 0x710   :  { %v2041_v54 = vpop.eup %2040 }
 0x711   :  { %2042 = vrcp.f32 %v1340_v27  ;;  %v1341_v34 = vadd.f32 1.0, %v2041_v54 }
 0x71e   :  { %v2043_v30 = vpop.eup %2042 }
 0x71f   :  { %v1347_v7 = vmul.f32 %v2043_v30, %v1346_v29 }
 0x721   :  { %v1348_v33 = vadd.f32 %v1347_v7, %v2690_v32 }
 0x723   :  { %2044 = vtanh.f32 %v1348_v33 }
 0x724   :  { %2046 = vrcp.f32 %v1341_v34 }
 0x730   :  { %v2045_v36 = vpop.eup %2044 }
 0x731   :  { %v1350_v38 = vsub.f32 %v2638_v57, %v2045_v36  ;;  %v2047_v39 = vpop.eup %2046 }
 0x733   :  { %v1351_v40 = vmul.f32 %v2047_v39, %v1350_v38 }
 0x735   :  { %v1352_v41 = vadd.f32 %v2045_v36, %v1351_v40 }
 0x737   :  { %v1361_v42 = vpack.c.bf16 %v1352_v41, %v1352_v41 }
 0x739   :  { %1395 = vmatmul.mubr.bf16.vlgmr.msra.gmra.mxu0 %v1361_v42  ;;  %1900 = vmatmul.mubr.bf16.vlgmr.msra.gmra.mxu1 %v1361_v42 }
 0x7f9   :  { %v1396_v44 = vpop.f32.mrf.mxu0  ;;  %v1437_v45 = vpop.f32.mrf.mxu1 }
 0x7fa   :  { %v1443_v47 = vadd.f32 %v1396_v44, %v2691_v46  ;;  %v1457_v19 = vadd.f32 %v2405_v59, %v1437_v45 }
 0x7fb   :  { %v1398_v48 = vpop.f32.mrf.mxu0  ;;  %v1901_v50 = vpop.f32.mrf.mxu1 }
 0x7fc   :  { %v1594_v55 = vmul.f32 -1.442695, %v1443_v47  ;;  %v1444_v60 = vadd.f32 %v1398_v48, %v2400_v25 }
 0x7fd   :  { %v1400_v56 = vpop.f32.mrf.mxu0  ;;  %v1440_v5 = vpop.f32.mrf.mxu1 }
 0x7fe   :  { %2048 = vpow2.f32 %v1594_v55  ;;  %v1595_v57 = vmul.f32 -1.442695, %v1444_v60 }
 0x7ff   :  { %v1401_v10 = vpop.f32.mrf.mxu0  ;;  %v1902_v18 = vpop.f32.mrf.mxu1 }
 0x800   :  { %2050 = vpow2.f32 %v1595_v57 }
 0x80b   :  { %v2049_v11 = vpop.eup %2048 }
 0x80c   :  { %v1451_v16 = vadd.f32 1.0, %v2049_v11 }
 0x80d   :  { %v2051_v9 = vpop.eup %2050 }
 0x80e   :  { %2052 = vrcp.f32 %v1451_v16  ;;  %v1452_v62 = vadd.f32 1.0, %v2051_v9 }
 0x81b   :  { %v2053_v23 = vpop.eup %2052 }
 0x81c   :  { %v1458_v12 = vmul.f32 %v2053_v23, %v1457_v19 }
 0x81e   :  { %v1459_v28 = vadd.f32 %v1458_v12, %v2692_v1 }
 0x820   :  { %2054 = vtanh.f32 %v1459_v28 }
 0x821   :  { %2056 = vrcp.f32 %v1452_v62 }
 0x82d   :  { %v2055_v20 = vpop.eup %2054 }
 0x82e   :  { %v1461_v21 = vsub.f32 %v1352_v41, %v2055_v20  ;;  %v2057_v14 = vpop.eup %2056 }
 0x830   :  { %v1462_v61 = vmul.f32 %v2057_v14, %v1461_v21 }
 0x832   :  { %v1463_v25 = vadd.f32 %v2055_v20, %v1462_v61 }
 0x834   :  { %v1630_v0 = vpack.c.bf16 %v1463_v25, %v1352_v41 }
 0x836   :  { %1634 = vst [vmem:[%s2678_s5 + $0x18] sm:$0xff] %v1630_v0  }
 0x837   :  { %1519 = vsyncpa [#allocation6], 1 }

// kernel: rnn_model_forward.4
= control target key start
LH: loop header
LB: loop body
LE: loop exit
PB: predicated region body
PF: predicated region fallthrough
CT: control target
= control target key end

     0   :  { %v2765_v1 = vmov 0   ;;  %v2767_v35 = vmov 0.0   ;;  %vm2062_vm0 = vmmov 0   ;;  %v2063_v53 = vmov 0.0|0.0   ;;  %s2759_s1 = inlined_call_operand.vmem [shape: bf16[128,384], index: 1, kind: input, shape index: {}]   ;;  %s2760_s0 = inlined_call_operand.vmem [shape: bf16[64,128], index: 0, kind: input, shape index: {}]   ;;  %s2761_s2 = inlined_call_operand.vmem [shape: bf16[128,384], index: 2, kind: input, shape index: {}]   ;;  %s2762_s3 = inlined_call_operand.vmem [shape: f32[1,384], index: 3, kind: input, shape index: {}]   ;;  %s2763_s4 = inlined_call_operand.vmem [shape: f32[1,128], index: 4, kind: input, shape index: {}]   ;;  %s2764_s5 = inlined_call_operand.vmem [shape: bf16[64,128], index: 5, kind: output, shape index: {}]  }
   0x1   :  { %v1892_v0 = vld [vmem:[%s2759_s1 + $0xac] ss:$12 sps:$4 sm:$0xff]   ;;  %267 = vmatprep.mubr.bf16.mxu0 %v2765_v1  ;;  %v1894_v2 = vld [vmem:[%s2759_s1 + $0xa8] ss:$12 sps:$4 sm:$0xff]   ;;  %v1897_v4 = vld [vmem:[%s2759_s1 + $0x90] ss:$12 sps:$4 sm:$0xff]   ;;  %v68_v55 = vlaneseq }
   0x2   :  { %235 = vmatprep.subr.bf16.mxu0 %v1892_v0  ;;  %v1895_v3 = vld [vmem:[%s2759_s1 + $0x94] ss:$12 sps:$4 sm:$0xff]   ;;  %v1898_v5 = vld [vmem:[%s2759_s1 + $0x7c] ss:$12 sps:$4 sm:$0xff]   ;;  %v1900_v6 = vld [vmem:[%s2759_s1 + $0x78] ss:$12 sps:$4 sm:$0xff]  }
   0x3   :  { %236 = vmatpush1.bf16.msra.mxu0 %v1894_v2  ;;  %v1901_v7 = vld [vmem:[%s2759_s1 + $0x64] ss:$12 sps:$4 sm:$0xff]   ;;  %v1903_v9 = vld [vmem:[%s2759_s1 + $0x60] ss:$12 sps:$4 sm:$0xff]   ;;  %v1906_v13 = vld [vmem:[%s2759_s1 + $0x48] ss:$12 sps:$4 sm:$0xff]  }
   0x4   :  { %237 = vmatprep.subr.bf16.mxu0 %v1895_v3  ;;  %v1913_v8 = vld [vmem:[%s2759_s1 + $0xb0] ss:$12 sps:$4 sm:$0xff]   ;;  %v1904_v10 = vld [vmem:[%s2759_s1 + $0x4c] ss:$12 sps:$4 sm:$0xff]   ;;  %v1918_v12 = vld [vmem:[%s2760_s0] sm:$0xff]   ;;  %v69_v56 = vshrl.u32 %v68_v55, 7 }
   0x5   :  { %1704 = vmatprep.subr.bf16.mxu1 %v1913_v8  ;;  %v1917_v11 = vld [vmem:[%s2759_s1 + $0x98] ss:$12 sps:$4 sm:$0xff]   ;;  %v1922_v14 = vld [vmem:[%s2759_s1 + $0x80] ss:$12 sps:$4 sm:$0xff]   ;;  %1720 = vmatprep.mubr.bf16.mxu1 %v1918_v12  ;;  %v1926_v16 = vld [vmem:[%s2759_s1 + $0x68] ss:$12 sps:$4 sm:$0xff]  }
   0x6   :  { %1705 = vmatpush3.bf16.msra.mxu1 %v1913_v8  ;;  %v1907_v15 = vld [vmem:[%s2759_s1 + $0x34] ss:$12 sps:$4 sm:$0xff]   ;;  %v1909_v17 = vld [vmem:[%s2759_s1 + $0x30] ss:$12 sps:$4 sm:$0xff]   ;;  %v1912_v20 = vld [vmem:[%s2759_s1 + $0x18] ss:$12 sps:$4 sm:$0xff]  }
   0x7   :  { %238 = vmatpush1.bf16.msra.mxu0 %v1897_v4  ;;  %1706 = vmatprep.subr.bf16.mxu1 %v1917_v11  ;;  %v1910_v18 = vld [vmem:[%s2759_s1 + $0x1c] ss:$12 sps:$4 sm:$0xff]   ;;  %v1914_v21 = vld [vmem:[%s2759_s1 + $0x4] ss:$12 sps:$4 sm:$0xff]   ;;  %v1916_v23 = vld [vmem:[%s2759_s1] ss:$12 sps:$4 sm:$0xff]  }
   0x8   :  { %239 = vmatprep.subr.bf16.mxu0 %v1898_v5  ;;  %v1931_v19 = vld [vmem:[%s2759_s1 + $0x50] ss:$12 sps:$4 sm:$0xff]   ;;  %v1935_v22 = vld [vmem:[%s2759_s1 + $0x38] ss:$12 sps:$4 sm:$0xff]   ;;  %v1940_v25 = vld [vmem:[%s2759_s1 + $0x20] ss:$12 sps:$4 sm:$0xff]  }
   0x9   :  { %v2167_v24 = vld [vmem:[%s2761_s2 + $0xac] ss:$12 sps:$4 sm:$0xff]   ;;  %v2175_v26 = vld [vmem:[%s2761_s2 + $0xa8] ss:$12 sps:$4 sm:$0xff]   ;;  %v2190_v29 = vld [vmem:[%s2761_s2 + $0x90] ss:$12 sps:$4 sm:$0xff]  }
   0xa   :  { %1707 = vmatpush3.bf16.msra.mxu1 %v1917_v11  ;;  %v2181_v27 = vld [vmem:[%s2761_s2 + $0x94] ss:$12 sps:$4 sm:$0xff]   ;;  %v2197_v30 = vld [vmem:[%s2761_s2 + $0x7c] ss:$12 sps:$4 sm:$0xff]   ;;  %v2206_v32 = vld [vmem:[%s2761_s2 + $0x78] ss:$12 sps:$4 sm:$0xff]  }
   0xb   :  { %240 = vmatpush1.bf16.msra.mxu0 %v1900_v6  ;;  %1708 = vmatprep.subr.bf16.mxu1 %v1922_v14  ;;  %v1944_v28 = vld [vmem:[%s2759_s1 + $0x8] ss:$12 sps:$4 sm:$0xff]   ;;  %v2212_v33 = vld [vmem:[%s2761_s2 + $0x64] ss:$12 sps:$4 sm:$0xff]   ;;  %v2224_v36 = vld [vmem:[%s2761_s2 + $0x60] ss:$12 sps:$4 sm:$0xff]  }
   0xc   :  { %241 = vmatprep.subr.bf16.mxu0 %v1901_v7  ;;  %v1927_v31 = vld [vmem:[%s2760_s0 + $0x8] sm:$0xff]   ;;  %v2217_v34 = vld [vmem:[%s2761_s2 + $0xb0] ss:$12 sps:$4 sm:$0xff]   ;;  %v2240_v39 = vld [vmem:[%s2761_s2 + $0x98] ss:$12 sps:$4 sm:$0xff]   ;;  %v70_v57 = vsub.s32 0, %v69_v56 }
   0xd   :  { %v1936_v37 = vld [vmem:[%s2760_s0 + $0x10] sm:$0xff]   ;;  %v2234_v38 = vld [vmem:[%s2761_s2 + $0x4c] ss:$12 sps:$4 sm:$0xff]   ;;  %v2276_v45 = vld [vmem:[%s2761_s2 + $0x1c] ss:$12 sps:$4 sm:$0xff]   ;;  %v74_v60 = vsub.s32 1, %v69_v56 }
   0xe   :  { %1709 = vmatpush3.bf16.msra.mxu1 %v1922_v14  ;;  %v2247_v40 = vld [vmem:[%s2761_s2 + $0x48] ss:$12 sps:$4 sm:$0xff]   ;;  %v2259_v42 = vld [vmem:[%s2761_s2 + $0x80] ss:$12 sps:$4 sm:$0xff]   ;;  %v1945_v43 = vld [vmem:[%s2760_s0 + $0x18] sm:$0xff]   ;;  %v78_v63 = vsub.s32 2, %v69_v56 }
   0xf   :  { %242 = vmatpush1.bf16.msra.mxu0 %v1903_v9  ;;  %1710 = vmatprep.subr.bf16.mxu1 %v1926_v16  ;;  %v2253_v41 = vld [vmem:[%s2761_s2 + $0x34] ss:$12 sps:$4 sm:$0xff]   ;;  %v2269_v44 = vld [vmem:[%s2761_s2 + $0x30] ss:$12 sps:$4 sm:$0xff]   ;;  %v2291_v47 = vld [vmem:[%s2761_s2 + $0x18] ss:$12 sps:$4 sm:$0xff]  }
  0x10   :  { %243 = vmatprep.subr.bf16.mxu0 %v1904_v10  ;;  %v2282_v46 = vld [vmem:[%s2761_s2 + $0x68] ss:$12 sps:$4 sm:$0xff]   ;;  %v2297_v48 = vld [vmem:[%s2761_s2 + $0x4] ss:$12 sps:$4 sm:$0xff]   ;;  %v2310_v50 = vld [vmem:[%s2761_s2] ss:$12 sps:$4 sm:$0xff]  }
  0x11   :  { %v2303_v49 = vld [vmem:[%s2761_s2 + $0x50] ss:$12 sps:$4 sm:$0xff]   ;;  %v2318_v51 = vld [vmem:[%s2761_s2 + $0x38] ss:$12 sps:$4 sm:$0xff]   ;;  %v2327_v52 = vld [vmem:[%s2761_s2 + $0x20] ss:$12 sps:$4 sm:$0xff]  }
  0x12   :  { %1711 = vmatpush3.bf16.msra.mxu1 %v1926_v16  ;;  %v2337_v54 = vld [vmem:[%s2761_s2 + $0x8] ss:$12 sps:$4 sm:$0xff]   ;;  %v66_v58 = vld [vmem:[%s2762_s3] sm:$0x7] }
  0x13   :  { %244 = vmatpush1.bf16.msra.mxu0 %v1906_v13  ;;  %1712 = vmatprep.subr.bf16.mxu1 %v1931_v19  ;;  %v71_v62 = vrot.slane %v66_v58, %v70_v57  ;;  %v75_v2 = vrot.slane %v66_v58, %v74_v60  ;;  %v2381_v6 = vrot.slane %v66_v58, %v78_v63 }
  0x14   :  { %245 = vmatprep.subr.bf16.mxu0 %v1907_v15 }
  0x16   :  { %1713 = vmatpush3.bf16.msra.mxu1 %v1931_v19 }
  0x17   :  { %246 = vmatpush1.bf16.msra.mxu0 %v1909_v17  ;;  %1714 = vmatprep.subr.bf16.mxu1 %v1935_v22 }
  0x18   :  { %247 = vmatprep.subr.bf16.mxu0 %v1910_v18 }
  0x1a   :  { %1715 = vmatpush3.bf16.msra.mxu1 %v1935_v22 }
  0x1b   :  { %248 = vmatpush1.bf16.msra.mxu0 %v1912_v20  ;;  %1716 = vmatprep.subr.bf16.mxu1 %v1940_v25 }
  0x1c   :  { %249 = vmatprep.subr.bf16.mxu0 %v1914_v21 }
  0x1e   :  { %1717 = vmatpush3.bf16.msra.mxu1 %v1940_v25 }
  0x1f   :  { %250 = vmatpush1.bf16.msra.mxu0 %v1916_v23  ;;  %1718 = vmatprep.subr.bf16.mxu1 %v1944_v28 }
  0x20   :  { %572 = vmatprep.subr.bf16.mxu0 %v2167_v24 }
  0x22   :  { %268 = vmatmul.mubr.bf16.vlgmr.msra.gmra.mxu0 %v1918_v12  ;;  %1719 = vmatpush3.bf16.msra.mxu1 %v1944_v28 }
  0x23   :  { %573 = vmatpush1.bf16.msra.mxu0 %v2175_v26  ;;  %277 = vmatprep.mubr.bf16.mxu0 %v2765_v1 }
  0x24   :  { %574 = vmatprep.subr.bf16.mxu0 %v2181_v27  ;;  %1728 = vmatprep.subr.bf16.mxu1 %v2767_v35 }
  0x25   :  { %1721 = vmatmul.mubr.bf16.vlgmr.msra.gmra.mxu1 %v1927_v31 }
  0x26   :  { %1729 = vmatpush3.bf16.msra.mxu1 %v2217_v34  ;;  %1724 = vmatprep.mubr.bf16.mxu1 %v1936_v37 }
  0x27   :  { %575 = vmatpush1.bf16.msra.mxu0 %v2190_v29  ;;  %1730 = vmatprep.subr.bf16.mxu1 %v2767_v35 }
  0x28   :  { %576 = vmatprep.subr.bf16.mxu0 %v2197_v30 }
  0x2a   :  { %278 = vmatmul.mubr.bf16.gmra.mxu0 %v1927_v31  ;;  %1731 = vmatpush3.bf16.msra.mxu1 %v2240_v39 }
  0x2b   :  { %577 = vmatpush1.bf16.msra.mxu0 %v2206_v32  ;;  %287 = vmatprep.mubr.bf16.mxu0 %v2765_v1 }
  0x2c   :  { %578 = vmatprep.subr.bf16.mxu0 %v2212_v33  ;;  %1732 = vmatprep.subr.bf16.mxu1 %v2767_v35 }
  0x2d   :  { %1725 = vmatmul.mubr.bf16.gmra.mxu1 %v1945_v43 }
  0x2e   :  { %1733 = vmatpush3.bf16.msra.mxu1 %v2259_v42  ;;  %1744 = vmatprep.mubr.msk.bf16.mxu1 %vm2062_vm0, %v2767_v35 }
  0x2f   :  { %579 = vmatpush1.bf16.msra.mxu0 %v2224_v36  ;;  %1734 = vmatprep.subr.bf16.mxu1 %v2767_v35 }
  0x30   :  { %580 = vmatprep.subr.bf16.mxu0 %v2234_v38 }
  0x32   :  { %288 = vmatmul.mubr.bf16.gmra.mxu0 %v1936_v37  ;;  %1735 = vmatpush3.bf16.msra.mxu1 %v2282_v46 }
  0x33   :  { %581 = vmatpush1.bf16.msra.mxu0 %v2247_v40  ;;  %297 = vmatprep.mubr.bf16.mxu0 %v2765_v1 }
  0x34   :  { %582 = vmatprep.subr.bf16.mxu0 %v2253_v41  ;;  %1736 = vmatprep.subr.bf16.mxu1 %v2767_v35 }
  0x36   :  { %1737 = vmatpush3.bf16.msra.mxu1 %v2303_v49 }
  0x37   :  { %583 = vmatpush1.bf16.msra.mxu0 %v2269_v44  ;;  %1738 = vmatprep.subr.bf16.mxu1 %v2767_v35 }
  0x38   :  { %584 = vmatprep.subr.bf16.mxu0 %v2276_v45 }
  0x3a   :  { %298 = vmatmul.mubr.bf16.gmra.mxu0 %v1945_v43  ;;  %1739 = vmatpush3.bf16.msra.mxu1 %v2318_v51 }
  0x3b   :  { %585 = vmatpush1.bf16.msra.mxu0 %v2291_v47  ;;  %604 = vmatprep.mubr.bf16.mxu0 %v2765_v1 }
  0x3c   :  { %586 = vmatprep.subr.bf16.mxu0 %v2297_v48  ;;  %1740 = vmatprep.subr.bf16.mxu1 %v2767_v35 }
  0x3e   :  { %1741 = vmatpush3.bf16.msra.mxu1 %v2327_v52 }
  0x3f   :  { %587 = vmatpush1.bf16.msra.mxu0 %v2310_v50  ;;  %1742 = vmatprep.subr.bf16.mxu1 %v2767_v35 }
  0x40   :  { %682 = vmatprep.subr.bf16.mxu0 %v2167_v24 }
  0x42   :  { %605 = vmatmul.mubr.bf16.vlgmr.msra.gmra.mxu0 %v2063_v53  ;;  %1743 = vmatpush3.bf16.msra.mxu1 %v2337_v54 }
  0x43   :  { %683 = vmatpush1.bf16.msra.mxu0 %v2175_v26  ;;  %714 = vmatprep.mubr.bf16.mxu0 %v2765_v1 }
  0x44   :  { %684 = vmatprep.subr.bf16.mxu0 %v2181_v27  ;;  %1748 = vmatprep.subr.bf16.mxu1 %v2767_v35 }
  0x45   :  { %1745 = vmatmul.mubr.bf16.vlgmr.msra.gmra.mxu1 %v2063_v53 }
  0x46   :  { %1749 = vmatpush3.bf16.msra.mxu1 %v2217_v34  ;;  %1764 = vmatprep.mubr.msk.bf16.mxu1 %vm2062_vm0, %v2767_v35 }
  0x47   :  { %685 = vmatpush1.bf16.msra.mxu0 %v2190_v29  ;;  %1750 = vmatprep.subr.bf16.mxu1 %v2767_v35 }
  0x48   :  { %686 = vmatprep.subr.bf16.mxu0 %v2197_v30 }
  0x4a   :  { %1751 = vmatpush3.bf16.msra.mxu1 %v2240_v39 }
  0x4b   :  { %687 = vmatpush1.bf16.msra.mxu0 %v2206_v32  ;;  %1752 = vmatprep.subr.bf16.mxu1 %v2767_v35 }
  0x4c   :  { %688 = vmatprep.subr.bf16.mxu0 %v2212_v33 }
  0x4e   :  { %1753 = vmatpush3.bf16.msra.mxu1 %v2259_v42 }
  0x4f   :  { %689 = vmatpush1.bf16.msra.mxu0 %v2224_v36  ;;  %1754 = vmatprep.subr.bf16.mxu1 %v2767_v35 }
  0x50   :  { %690 = vmatprep.subr.bf16.mxu0 %v2234_v38 }
  0x52   :  { %1755 = vmatpush3.bf16.msra.mxu1 %v2282_v46 }
  0x53   :  { %691 = vmatpush1.bf16.msra.mxu0 %v2247_v40  ;;  %1756 = vmatprep.subr.bf16.mxu1 %v2767_v35 }
  0x54   :  { %692 = vmatprep.subr.bf16.mxu0 %v2253_v41 }
  0x56   :  { %1757 = vmatpush3.bf16.msra.mxu1 %v2303_v49 }
  0x57   :  { %693 = vmatpush1.bf16.msra.mxu0 %v2269_v44  ;;  %1758 = vmatprep.subr.bf16.mxu1 %v2767_v35 }
  0x58   :  { %694 = vmatprep.subr.bf16.mxu0 %v2276_v45 }
  0x5a   :  { %1759 = vmatpush3.bf16.msra.mxu1 %v2318_v51 }
  0x5b   :  { %695 = vmatpush1.bf16.msra.mxu0 %v2291_v47  ;;  %1760 = vmatprep.subr.bf16.mxu1 %v2767_v35 }
  0x5c   :  { %696 = vmatprep.subr.bf16.mxu0 %v2297_v48 }
  0x5e   :  { %1761 = vmatpush3.bf16.msra.mxu1 %v2327_v52 }
  0x5f   :  { %697 = vmatpush1.bf16.msra.mxu0 %v2310_v50  ;;  %1762 = vmatprep.subr.bf16.mxu1 %v2767_v35 }
  0x60   :  { %793 = vmatprep.subr.bf16.mxu0 %v2167_v24 }
  0x62   :  { %1763 = vmatpush3.bf16.msra.mxu1 %v2337_v54 }
  0x63   :  { %1768 = vmatprep.subr.bf16.mxu1 %v2767_v35 }
  0xe2   :  { %v269_v59 = vpop.f32.mrf.mxu0 }
  0xe4   :  { %v271_v61 = vpop.f32.mrf.mxu0 }
  0xe5   :  { %v1722_v10 = vpop.f32.mrf.mxu1  ;;  %v272_v1 = vadd.f32 %v271_v61, %v75_v2 }
  0xe6   :  { %v273_v0 = vpop.f32.mrf.mxu0  ;;  %v2388_v12 = vadd.f32 %v1722_v10, %v2381_v6 }
  0xe7   :  { %v2377_v3 = vadd.f32 %v273_v0, %v71_v62  ;;  %v342_v14 = vpop.f32.mrf.mxu1 }
  0xe8   :  { %v275_v4 = vpop.f32.mrf.mxu0  ;;  %v343_v61 = vadd.f32 %v342_v14, %v2381_v6  ;;  %v2774_v14 = vmov 0  }
  0xe9   :  { %v2379_v5 = vadd.f32 %v275_v4, %v75_v2  ;;  %v1723_v17 = vpop.f32.mrf.mxu1 }
  0xea   :  { %v279_v7 = vpop.f32.mrf.mxu0  ;;  %v2395_v19 = vadd.f32 %v1723_v17, %v2381_v6 }
  0xeb   :  { %v2383_v8 = vadd.f32 %v279_v7, %v71_v62  ;;  %v345_v21 = vpop.f32.mrf.mxu1 }
  0xec   :  { %v281_v9 = vpop.f32.mrf.mxu0  ;;  %v2400_v23 = vadd.f32 %v345_v21, %v2381_v6  ;;  %v270_v21 = vadd.f32 %v269_v59, %v71_v62  ;;  %v2431_v59 = vld [vmem:[%s2763_s4] ss:$0 sm:$0xff] }
  0xed   :  { %v2385_v11 = vadd.f32 %v281_v9, %v75_v2  ;;  %v1726_v28 = vpop.f32.mrf.mxu1 }
  0xee   :  { %v283_v13 = vpop.f32.mrf.mxu0  ;;  %v2405_v37 = vadd.f32 %v1726_v28, %v2381_v6 }
  0xef   :  { %v2390_v15 = vadd.f32 %v283_v13, %v71_v62  ;;  %v358_v53 = vpop.f32.mrf.mxu1 }
  0xf0   :  { %v285_v16 = vpop.f32.mrf.mxu0  ;;  %2769 = vst [vmem:[#allocation5_spill] sm:$0xff] %v2405_v37  ;;  %v2410_v56 = vadd.f32 %v358_v53, %v2381_v6 }
  0xf1   :  { %v2392_v18 = vadd.f32 %v285_v16, %v75_v2  ;;  %v1727_v58 = vpop.f32.mrf.mxu1 }
  0xf2   :  { %v289_v20 = vpop.f32.mrf.mxu0  ;;  %v2415_v63 = vadd.f32 %v1727_v58, %v2381_v6 }
  0xf3   :  { %v2397_v22 = vadd.f32 %v289_v20, %v71_v62  ;;  %v361_v4 = vpop.f32.mrf.mxu1 }
  0xf4   :  { %v291_v25 = vpop.f32.mrf.mxu0  ;;  %2770 = vst [vmem:[#allocation6_spill] sm:$0xff] %v2415_v63  ;;  %v2420_v9 = vadd.f32 %v361_v4, %v2381_v6  ;;  %v2773_v6 = vmov 0.0  }
  0xf5   :  { %v2402_v31 = vadd.f32 %v291_v25, %v75_v2 }
  0xf6   :  { %v293_v43 = vpop.f32.mrf.mxu0 }
  0xf7   :  { %v2407_v55 = vadd.f32 %v293_v43, %v71_v62 }
  0xf8   :  { %v295_v57 = vpop.f32.mrf.mxu0 }
  0xf9   :  { %v2412_v60 = vadd.f32 %v295_v57, %v75_v2 }
  0xfa   :  { %v299_v0 = vpop.f32.mrf.mxu0 }
  0xfb   :  { %v2417_v7 = vadd.f32 %v299_v0, %v71_v62 }
  0xfc   :  { %v301_v10 = vpop.f32.mrf.mxu0 }
  0xfd   :  { %v2422_v13 = vadd.f32 %v301_v10, %v75_v2 }
  0xfe   :  { %v303_v16 = vpop.f32.mrf.mxu0 }
  0xff   :  { %2771 = vst [vmem:[#allocation7_spill] sm:$0xff] %v2422_v13  ;;  %v2424_v17 = vadd.f32 %v303_v16, %v71_v62 }
 0x100   :  { %v305_v20 = vpop.f32.mrf.mxu0 }
 0x101   :  { %2772 = vst [vmem:[#allocation8_spill] sm:$0xff] %v2424_v17  ;;  %v2426_v25 = vadd.f32 %v305_v20, %v75_v2 }
 0x102   :  { %v606_v28 = vpop.f32.mrf.mxu0 }
 0x103   :  { %v653_v43 = vadd.f32 %v606_v28, %v270_v21 }
 0x104   :  { %v608_v53 = vpop.f32.mrf.mxu0 }
 0x105   :  { %v1565_v57 = vmul.f32 -1.442695, %v653_v43  ;;  %v647_v4 = vpop.f32.mrf.mxu1  ;;  %v654_v35 = vadd.f32 %v608_v53, %v272_v1 }
 0x106   :  { %v610_v58 = vpop.f32.mrf.mxu0  ;;  %v667_v62 = vadd.f32 %v2431_v59, %v647_v4 }
 0x107   :  { %1960 = vpow2.f32 %v1565_v57  ;;  %v1746_v63 = vpop.f32.mrf.mxu1  ;;  %v1566_v37 = vmul.f32 -1.442695, %v654_v35 }
 0x108   :  { %v611_v0 = vpop.f32.mrf.mxu0 }
 0x109   :  { %v650_v10 = vpop.f32.mrf.mxu1  ;;  %1962 = vpow2.f32 %v1566_v37 }
 0x10b   :  { %v1747_v13 = vpop.f32.mrf.mxu1 }
 0x114   :  { %v1961_v16 = vpop.eup %1960 }
 0x115   :  { %v661_v17 = vadd.f32 1.0, %v1961_v16 }
 0x116   :  { %v1963_v20 = vpop.eup %1962 }
 0x117   :  { %1964 = vrcp.f32 %v661_v17  ;;  %v662_v2 = vadd.f32 1.0, %v1963_v20 }
 0x124   :  { %v1965_v21 = vpop.eup %1964 }
 0x125   :  { %v668_v1 = vmul.f32 %v1965_v21, %v667_v62 }
 0x127   :  { %v669_v63 = vadd.f32 %v668_v1, %v343_v61 }
 0x129   :  { %1966 = vtanh.f32 %v669_v63 }
 0x12a   :  { %1968 = vrcp.f32 %v662_v2 }
 0x136   :  { %v1967_v35 = vpop.eup %1966 }
 0x137   :  { %v671_v13 = vsub.f32 0.0, %v1967_v35  ;;  %v1969_v37 = vpop.eup %1968 }
 0x139   :  { %v672_v17 = vmul.f32 %v1969_v37, %v671_v13 }
 0x13b   :  { %v2435_v28 = vadd.f32 %v1967_v35, %v672_v17 }
 0x13d   :  { %v681_v43 = vpack.c.bf16 %v2435_v28, %v2435_v28 }
 0x13f   :  { %715 = vmatmul.mubr.bf16.vlgmr.msra.gmra.mxu0 %v681_v43  ;;  %1765 = vmatmul.mubr.bf16.vlgmr.msra.gmra.mxu1 %v681_v43 }
 0x140   :  { %794 = vmatpush1.bf16.msra.mxu0 %v2175_v26  ;;  %1769 = vmatpush3.bf16.msra.mxu1 %v2217_v34 }
 0x141   :  { %795 = vmatprep.subr.bf16.mxu0 %v2181_v27  ;;  %1770 = vmatprep.subr.bf16.mxu1 %v2773_v6 }
 0x142   :  { %825 = vmatprep.mubr.bf16.mxu0 %v2774_v14  ;;  %1784 = vmatprep.mubr.msk.bf16.mxu1 %vm2062_vm0, %v2773_v6 }
 0x144   :  { %796 = vmatpush1.bf16.msra.mxu0 %v2190_v29  ;;  %1771 = vmatpush3.bf16.msra.mxu1 %v2240_v39 }
 0x145   :  { %797 = vmatprep.subr.bf16.mxu0 %v2197_v30  ;;  %1772 = vmatprep.subr.bf16.mxu1 %v2773_v6 }
 0x148   :  { %798 = vmatpush1.bf16.msra.mxu0 %v2206_v32  ;;  %1773 = vmatpush3.bf16.msra.mxu1 %v2259_v42 }
 0x149   :  { %799 = vmatprep.subr.bf16.mxu0 %v2212_v33  ;;  %1774 = vmatprep.subr.bf16.mxu1 %v2773_v6 }
 0x14c   :  { %800 = vmatpush1.bf16.msra.mxu0 %v2224_v36  ;;  %1775 = vmatpush3.bf16.msra.mxu1 %v2282_v46 }
 0x14d   :  { %801 = vmatprep.subr.bf16.mxu0 %v2234_v38  ;;  %1776 = vmatprep.subr.bf16.mxu1 %v2773_v6 }
 0x150   :  { %802 = vmatpush1.bf16.msra.mxu0 %v2247_v40  ;;  %1777 = vmatpush3.bf16.msra.mxu1 %v2303_v49 }
 0x151   :  { %803 = vmatprep.subr.bf16.mxu0 %v2253_v41  ;;  %1778 = vmatprep.subr.bf16.mxu1 %v2773_v6 }
 0x154   :  { %804 = vmatpush1.bf16.msra.mxu0 %v2269_v44  ;;  %1779 = vmatpush3.bf16.msra.mxu1 %v2318_v51 }
 0x155   :  { %805 = vmatprep.subr.bf16.mxu0 %v2276_v45  ;;  %1780 = vmatprep.subr.bf16.mxu1 %v2773_v6 }
 0x158   :  { %806 = vmatpush1.bf16.msra.mxu0 %v2291_v47  ;;  %1781 = vmatpush3.bf16.msra.mxu1 %v2327_v52 }
 0x159   :  { %807 = vmatprep.subr.bf16.mxu0 %v2297_v48  ;;  %1782 = vmatprep.subr.bf16.mxu1 %v2773_v6 }
 0x15c   :  { %808 = vmatpush1.bf16.msra.mxu0 %v2310_v50  ;;  %1783 = vmatpush3.bf16.msra.mxu1 %v2337_v54 }
 0x15d   :  { %904 = vmatprep.subr.bf16.mxu0 %v2167_v24  ;;  %1788 = vmatprep.subr.bf16.mxu1 %v2773_v6 }
 0x1ff   :  { %v716_v53 = vpop.f32.mrf.mxu0  ;;  %v757_v57 = vpop.f32.mrf.mxu1 }
 0x200   :  { %v763_v58 = vadd.f32 %v716_v53, %v2377_v3  ;;  %v777_v13 = vadd.f32 %v2431_v59, %v757_v57 }
 0x201   :  { %v718_v0 = vpop.f32.mrf.mxu0  ;;  %v1766_v4 = vpop.f32.mrf.mxu1 }
 0x202   :  { %v1567_v10 = vmul.f32 -1.442695, %v763_v58  ;;  %v764_v61 = vadd.f32 %v718_v0, %v2379_v5 }
 0x203   :  { %v720_v16 = vpop.f32.mrf.mxu0  ;;  %v760_v62 = vpop.f32.mrf.mxu1 }
 0x204   :  { %1970 = vpow2.f32 %v1567_v10  ;;  %v1568_v1 = vmul.f32 -1.442695, %v764_v61 }
 0x205   :  { %v721_v20 = vpop.f32.mrf.mxu0  ;;  %v1767_v21 = vpop.f32.mrf.mxu1 }
 0x206   :  { %1972 = vpow2.f32 %v1568_v1 }
 0x211   :  { %v1971_v2 = vpop.eup %1970 }
 0x212   :  { %v771_v63 = vadd.f32 1.0, %v1971_v2 }
 0x213   :  { %v1973_v35 = vpop.eup %1972 }
 0x214   :  { %1974 = vrcp.f32 %v771_v63  ;;  %v772_v43 = vadd.f32 1.0, %v1973_v35 }
 0x221   :  { %v1975_v37 = vpop.eup %1974 }
 0x222   :  { %v778_v3 = vmul.f32 %v1975_v37, %v777_v13 }
 0x224   :  { %v779_v17 = vadd.f32 %v778_v3, %v2400_v23 }
 0x226   :  { %1976 = vtanh.f32 %v779_v17 }
 0x227   :  { %1978 = vrcp.f32 %v772_v43 }
 0x233   :  { %v1977_v53 = vpop.eup %1976 }
 0x234   :  { %v781_v58 = vsub.f32 %v2435_v28, %v1977_v53  ;;  %v1979_v4 = vpop.eup %1978 }
 0x236   :  { %v782_v5 = vmul.f32 %v1979_v4, %v781_v58 }
 0x238   :  { %v2479_v0 = vadd.f32 %v1977_v53, %v782_v5 }
 0x23a   :  { %v792_v10 = vpack.c.bf16 %v2479_v0, %v2479_v0  ;;  %v1600_v57 = vpack.c.bf16 %v2479_v0, %v2435_v28 }
 0x23c   :  { %826 = vmatmul.mubr.bf16.vlgmr.msra.gmra.mxu0 %v792_v10  ;;  %1601 = vst [vmem:[%s2764_s5] sm:$0xff] %v1600_v57   ;;  %1785 = vmatmul.mubr.bf16.vlgmr.msra.gmra.mxu1 %v792_v10 }
 0x23d   :  { %905 = vmatpush1.bf16.msra.mxu0 %v2175_v26  ;;  %1789 = vmatpush3.bf16.msra.mxu1 %v2217_v34 }
 0x23e   :  { %906 = vmatprep.subr.bf16.mxu0 %v2181_v27  ;;  %1790 = vmatprep.subr.bf16.mxu1 %v2773_v6 }
 0x23f   :  { %936 = vmatprep.mubr.bf16.mxu0 %v2774_v14  ;;  %1804 = vmatprep.mubr.msk.bf16.mxu1 %vm2062_vm0, %v2773_v6 }
 0x241   :  { %907 = vmatpush1.bf16.msra.mxu0 %v2190_v29  ;;  %1791 = vmatpush3.bf16.msra.mxu1 %v2240_v39 }
 0x242   :  { %908 = vmatprep.subr.bf16.mxu0 %v2197_v30  ;;  %1792 = vmatprep.subr.bf16.mxu1 %v2773_v6 }
 0x245   :  { %909 = vmatpush1.bf16.msra.mxu0 %v2206_v32  ;;  %1793 = vmatpush3.bf16.msra.mxu1 %v2259_v42 }
 0x246   :  { %910 = vmatprep.subr.bf16.mxu0 %v2212_v33  ;;  %1794 = vmatprep.subr.bf16.mxu1 %v2773_v6 }
 0x249   :  { %911 = vmatpush1.bf16.msra.mxu0 %v2224_v36  ;;  %1795 = vmatpush3.bf16.msra.mxu1 %v2282_v46 }
 0x24a   :  { %912 = vmatprep.subr.bf16.mxu0 %v2234_v38  ;;  %1796 = vmatprep.subr.bf16.mxu1 %v2773_v6 }
 0x24d   :  { %913 = vmatpush1.bf16.msra.mxu0 %v2247_v40  ;;  %1797 = vmatpush3.bf16.msra.mxu1 %v2303_v49 }
 0x24e   :  { %914 = vmatprep.subr.bf16.mxu0 %v2253_v41  ;;  %1798 = vmatprep.subr.bf16.mxu1 %v2773_v6 }
 0x251   :  { %915 = vmatpush1.bf16.msra.mxu0 %v2269_v44  ;;  %1799 = vmatpush3.bf16.msra.mxu1 %v2318_v51 }
 0x252   :  { %916 = vmatprep.subr.bf16.mxu0 %v2276_v45  ;;  %1800 = vmatprep.subr.bf16.mxu1 %v2773_v6 }
 0x255   :  { %917 = vmatpush1.bf16.msra.mxu0 %v2291_v47  ;;  %1801 = vmatpush3.bf16.msra.mxu1 %v2327_v52 }
 0x256   :  { %918 = vmatprep.subr.bf16.mxu0 %v2297_v48  ;;  %1802 = vmatprep.subr.bf16.mxu1 %v2773_v6 }
 0x259   :  { %919 = vmatpush1.bf16.msra.mxu0 %v2310_v50  ;;  %1803 = vmatpush3.bf16.msra.mxu1 %v2337_v54 }
 0x25a   :  { %1015 = vmatprep.subr.bf16.mxu0 %v2167_v24  ;;  %1808 = vmatprep.subr.bf16.mxu1 %v2773_v6 }
 0x2fc   :  { %v827_v23 = vpop.f32.mrf.mxu0  ;;  %v868_v28 = vpop.f32.mrf.mxu1 }
 0x2fd   :  { %v874_v16 = vadd.f32 %v827_v23, %v2383_v8  ;;  %v888_v43 = vadd.f32 %v2431_v59, %v868_v28 }
 0x2fe   :  { %v829_v62 = vpop.f32.mrf.mxu0  ;;  %v1786_v20 = vpop.f32.mrf.mxu1 }
 0x2ff   :  { %v1569_v21 = vmul.f32 -1.442695, %v874_v16  ;;  %v875_v35 = vadd.f32 %v829_v62, %v2385_v11 }
 0x300   :  { %v831_v61 = vpop.f32.mrf.mxu0  ;;  %v871_v1 = vpop.f32.mrf.mxu1 }
 0x301   :  { %1980 = vpow2.f32 %v1569_v21  ;;  %v1570_v13 = vmul.f32 -1.442695, %v875_v35 }
 0x302   :  { %v832_v2 = vpop.f32.mrf.mxu0  ;;  %v1787_v63 = vpop.f32.mrf.mxu1 }
 0x303   :  { %1982 = vpow2.f32 %v1570_v13 }
 0x30e   :  { %v1981_v37 = vpop.eup %1980 }
 0x30f   :  { %v882_v3 = vadd.f32 1.0, %v1981_v37 }
 0x310   :  { %v1983_v17 = vpop.eup %1982 }
 0x311   :  { %1984 = vrcp.f32 %v882_v3  ;;  %v883_v4 = vadd.f32 1.0, %v1983_v17 }
 0x31e   :  { %v1985_v53 = vpop.eup %1984 }
 0x31f   :  { %v889_v8 = vmul.f32 %v1985_v53, %v888_v43 }
 0x321   :  { %v890_v58 = vadd.f32 %v889_v8, %v2388_v12 }
 0x323   :  { %1986 = vtanh.f32 %v890_v58 }
 0x324   :  { %1988 = vrcp.f32 %v883_v4 }
 0x330   :  { %v1987_v5 = vpop.eup %1986 }
 0x331   :  { %v892_v10 = vsub.f32 %v2479_v0, %v1987_v5  ;;  %v1989_v57 = vpop.eup %1988 }
 0x333   :  { %v893_v11 = vmul.f32 %v1989_v57, %v892_v10 }
 0x335   :  { %v2528_v23 = vadd.f32 %v1987_v5, %v893_v11 }
 0x337   :  { %v903_v16 = vpack.c.bf16 %v2528_v23, %v2528_v23 }
 0x339   :  { %937 = vmatmul.mubr.bf16.vlgmr.msra.gmra.mxu0 %v903_v16  ;;  %1805 = vmatmul.mubr.bf16.vlgmr.msra.gmra.mxu1 %v903_v16 }
 0x33a   :  { %1016 = vmatpush1.bf16.msra.mxu0 %v2175_v26  ;;  %1809 = vmatpush3.bf16.msra.mxu1 %v2217_v34 }
 0x33b   :  { %1017 = vmatprep.subr.bf16.mxu0 %v2181_v27  ;;  %1810 = vmatprep.subr.bf16.mxu1 %v2773_v6 }
 0x33c   :  { %1047 = vmatprep.mubr.bf16.mxu0 %v2774_v14  ;;  %1824 = vmatprep.mubr.msk.bf16.mxu1 %vm2062_vm0, %v2773_v6 }
 0x33e   :  { %1018 = vmatpush1.bf16.msra.mxu0 %v2190_v29  ;;  %1811 = vmatpush3.bf16.msra.mxu1 %v2240_v39 }
 0x33f   :  { %1019 = vmatprep.subr.bf16.mxu0 %v2197_v30  ;;  %1812 = vmatprep.subr.bf16.mxu1 %v2773_v6 }
 0x342   :  { %1020 = vmatpush1.bf16.msra.mxu0 %v2206_v32  ;;  %1813 = vmatpush3.bf16.msra.mxu1 %v2259_v42 }
 0x343   :  { %1021 = vmatprep.subr.bf16.mxu0 %v2212_v33  ;;  %1814 = vmatprep.subr.bf16.mxu1 %v2773_v6 }
 0x346   :  { %1022 = vmatpush1.bf16.msra.mxu0 %v2224_v36  ;;  %1815 = vmatpush3.bf16.msra.mxu1 %v2282_v46 }
 0x347   :  { %1023 = vmatprep.subr.bf16.mxu0 %v2234_v38  ;;  %1816 = vmatprep.subr.bf16.mxu1 %v2773_v6 }
 0x34a   :  { %1024 = vmatpush1.bf16.msra.mxu0 %v2247_v40  ;;  %1817 = vmatpush3.bf16.msra.mxu1 %v2303_v49 }
 0x34b   :  { %1025 = vmatprep.subr.bf16.mxu0 %v2253_v41  ;;  %1818 = vmatprep.subr.bf16.mxu1 %v2773_v6 }
 0x34e   :  { %1026 = vmatpush1.bf16.msra.mxu0 %v2269_v44  ;;  %1819 = vmatpush3.bf16.msra.mxu1 %v2318_v51 }
 0x34f   :  { %1027 = vmatprep.subr.bf16.mxu0 %v2276_v45  ;;  %1820 = vmatprep.subr.bf16.mxu1 %v2773_v6 }
 0x352   :  { %1028 = vmatpush1.bf16.msra.mxu0 %v2291_v47  ;;  %1821 = vmatpush3.bf16.msra.mxu1 %v2327_v52 }
 0x353   :  { %1029 = vmatprep.subr.bf16.mxu0 %v2297_v48  ;;  %1822 = vmatprep.subr.bf16.mxu1 %v2773_v6 }
 0x356   :  { %1030 = vmatpush1.bf16.msra.mxu0 %v2310_v50  ;;  %1823 = vmatpush3.bf16.msra.mxu1 %v2337_v54 }
 0x357   :  { %1126 = vmatprep.subr.bf16.mxu0 %v2167_v24  ;;  %1828 = vmatprep.subr.bf16.mxu1 %v2773_v6 }
 0x3f9   :  { %v938_v12 = vpop.f32.mrf.mxu0  ;;  %v979_v0 = vpop.f32.mrf.mxu1 }
 0x3fa   :  { %v985_v28 = vadd.f32 %v938_v12, %v2390_v15  ;;  %v999_v43 = vadd.f32 %v2431_v59, %v979_v0 }
 0x3fb   :  { %v940_v62 = vpop.f32.mrf.mxu0  ;;  %v1806_v20 = vpop.f32.mrf.mxu1 }
 0x3fc   :  { %v1571_v21 = vmul.f32 -1.442695, %v985_v28  ;;  %v986_v35 = vadd.f32 %v940_v62, %v2392_v18 }
 0x3fd   :  { %v942_v61 = vpop.f32.mrf.mxu0  ;;  %v982_v1 = vpop.f32.mrf.mxu1 }
 0x3fe   :  { %1990 = vpow2.f32 %v1571_v21  ;;  %v1572_v13 = vmul.f32 -1.442695, %v986_v35 }
 0x3ff   :  { %v943_v2 = vpop.f32.mrf.mxu0  ;;  %v1807_v63 = vpop.f32.mrf.mxu1 }
 0x400   :  { %1992 = vpow2.f32 %v1572_v13 }
 0x40b   :  { %v1991_v37 = vpop.eup %1990 }
 0x40c   :  { %v993_v3 = vadd.f32 1.0, %v1991_v37 }
 0x40d   :  { %v1993_v17 = vpop.eup %1992 }
 0x40e   :  { %1994 = vrcp.f32 %v993_v3  ;;  %v994_v58 = vadd.f32 1.0, %v1993_v17 }
 0x41b   :  { %v1995_v53 = vpop.eup %1994 }
 0x41c   :  { %v1000_v15 = vmul.f32 %v1995_v53, %v999_v43 }
 0x41e   :  { %v1001_v8 = vadd.f32 %v1000_v15, %v2395_v19 }
 0x420   :  { %1996 = vtanh.f32 %v1001_v8 }
 0x421   :  { %1998 = vrcp.f32 %v994_v58 }
 0x42d   :  { %v1997_v4 = vpop.eup %1996 }
 0x42e   :  { %v1003_v5 = vsub.f32 %v2528_v23, %v1997_v4  ;;  %v1999_v10 = vpop.eup %1998 }
 0x430   :  { %v1004_v18 = vmul.f32 %v1999_v10, %v1003_v5 }
 0x432   :  { %v2572_v57 = vadd.f32 %v1997_v4, %v1004_v18 }
 0x434   :  { %v1014_v11 = vpack.c.bf16 %v2572_v57, %v2572_v57  ;;  %v1605_v16 = vpack.c.bf16 %v2572_v57, %v2528_v23 }
 0x436   :  { %1048 = vmatmul.mubr.bf16.vlgmr.msra.gmra.mxu0 %v1014_v11  ;;  %1617 = vst [vmem:[%s2764_s5 + $0x8] sm:$0xff] %v1605_v16   ;;  %1825 = vmatmul.mubr.bf16.vlgmr.msra.gmra.mxu1 %v1014_v11 }
 0x437   :  { %1127 = vmatpush1.bf16.msra.mxu0 %v2175_v26  ;;  %1829 = vmatpush3.bf16.msra.mxu1 %v2217_v34 }
 0x438   :  { %1128 = vmatprep.subr.bf16.mxu0 %v2181_v27  ;;  %1830 = vmatprep.subr.bf16.mxu1 %v2773_v6 }
 0x439   :  { %1158 = vmatprep.mubr.bf16.mxu0 %v2774_v14  ;;  %1844 = vmatprep.mubr.msk.bf16.mxu1 %vm2062_vm0, %v2773_v6 }
 0x43b   :  { %1129 = vmatpush1.bf16.msra.mxu0 %v2190_v29  ;;  %1831 = vmatpush3.bf16.msra.mxu1 %v2240_v39 }
 0x43c   :  { %1130 = vmatprep.subr.bf16.mxu0 %v2197_v30  ;;  %1832 = vmatprep.subr.bf16.mxu1 %v2773_v6 }
 0x43f   :  { %1131 = vmatpush1.bf16.msra.mxu0 %v2206_v32  ;;  %1833 = vmatpush3.bf16.msra.mxu1 %v2259_v42 }
 0x440   :  { %1132 = vmatprep.subr.bf16.mxu0 %v2212_v33  ;;  %1834 = vmatprep.subr.bf16.mxu1 %v2773_v6 }
 0x443   :  { %1133 = vmatpush1.bf16.msra.mxu0 %v2224_v36  ;;  %1835 = vmatpush3.bf16.msra.mxu1 %v2282_v46 }
 0x444   :  { %1134 = vmatprep.subr.bf16.mxu0 %v2234_v38  ;;  %1836 = vmatprep.subr.bf16.mxu1 %v2773_v6 }
 0x447   :  { %1135 = vmatpush1.bf16.msra.mxu0 %v2247_v40  ;;  %1837 = vmatpush3.bf16.msra.mxu1 %v2303_v49 }
 0x448   :  { %1136 = vmatprep.subr.bf16.mxu0 %v2253_v41  ;;  %1838 = vmatprep.subr.bf16.mxu1 %v2773_v6 }
 0x44b   :  { %1137 = vmatpush1.bf16.msra.mxu0 %v2269_v44  ;;  %1839 = vmatpush3.bf16.msra.mxu1 %v2318_v51 }
 0x44c   :  { %1138 = vmatprep.subr.bf16.mxu0 %v2276_v45  ;;  %1840 = vmatprep.subr.bf16.mxu1 %v2773_v6 }
 0x44f   :  { %1139 = vmatpush1.bf16.msra.mxu0 %v2291_v47  ;;  %1841 = vmatpush3.bf16.msra.mxu1 %v2327_v52 }
 0x450   :  { %1140 = vmatprep.subr.bf16.mxu0 %v2297_v48  ;;  %1842 = vmatprep.subr.bf16.mxu1 %v2773_v6 }
 0x453   :  { %1141 = vmatpush1.bf16.msra.mxu0 %v2310_v50  ;;  %1843 = vmatpush3.bf16.msra.mxu1 %v2337_v54 }
 0x454   :  { %1237 = vmatprep.subr.bf16.mxu0 %v2167_v24  ;;  %1848 = vmatprep.subr.bf16.mxu1 %v2773_v6 }
 0x4f6   :  { %v1049_v19 = vpop.f32.mrf.mxu0  ;;  %v1090_v23 = vpop.f32.mrf.mxu1 }
 0x4f7   :  { %v1096_v12 = vadd.f32 %v1049_v19, %v2397_v22  ;;  %v1110_v37 = vadd.f32 %v2431_v59, %v1090_v23  ;;  %v2042_v19 = vld [vmem:[%s2761_s2 + $0xb0] ss:$12 sps:$4 sm:$0xff]   ;;  %v2043_v23 = vld [vmem:[%s2761_s2 + $0x94] ss:$12 sps:$4 sm:$0xff]  }
 0x4f8   :  { %v1051_v0 = vpop.f32.mrf.mxu0  ;;  %v1826_v28 = vpop.f32.mrf.mxu1 }
 0x4f9   :  { %v1573_v62 = vmul.f32 -1.442695, %v1096_v12  ;;  %v1097_v2 = vadd.f32 %v1051_v0, %v2402_v31  ;;  %v2044_v12 = vld [vmem:[%s2761_s2 + $0x90] ss:$12 sps:$4 sm:$0xff]   ;;  %v2045_v0 = vld [vmem:[%s2761_s2 + $0x98] ss:$12 sps:$4 sm:$0xff]  }
 0x4fa   :  { %v1053_v20 = vpop.f32.mrf.mxu0  ;;  %v1093_v21 = vpop.f32.mrf.mxu1  ;;  %v2046_v28 = vld [vmem:[%s2761_s2 + $0x7c] ss:$12 sps:$4 sm:$0xff]  }
 0x4fb   :  { %2000 = vpow2.f32 %v1573_v62  ;;  %v1574_v63 = vmul.f32 -1.442695, %v1097_v2  ;;  %v2048_v62 = vld [vmem:[%s2761_s2 + $0x80] ss:$12 sps:$4 sm:$0xff]   ;;  %v2049_v20 = vld [vmem:[%s2761_s2 + $0x64] ss:$12 sps:$4 sm:$0xff]  }
 0x4fc   :  { %v1054_v61 = vpop.f32.mrf.mxu0  ;;  %v1827_v1 = vpop.f32.mrf.mxu1  ;;  %v2050_v21 = vld [vmem:[%s2761_s2 + $0x60] ss:$12 sps:$4 sm:$0xff]   ;;  %v2053_v2 = vld [vmem:[%s2761_s2 + $0x48] ss:$12 sps:$4 sm:$0xff]  }
 0x4fd   :  { %2002 = vpow2.f32 %v1574_v63  ;;  %v2051_v61 = vld [vmem:[%s2761_s2 + $0x68] ss:$12 sps:$4 sm:$0xff]   ;;  %v2052_v1 = vld [vmem:[%s2761_s2 + $0x4c] ss:$12 sps:$4 sm:$0xff]  }
 0x4fe   :  { %v2054_v63 = vld [vmem:[%s2761_s2 + $0x34] ss:$12 sps:$4 sm:$0xff]  }
 0x508   :  { %v2001_v35 = vpop.eup %2000 }
 0x509   :  { %v1104_v13 = vadd.f32 1.0, %v2001_v35  ;;  %v2055_v35 = vld [vmem:[%s2761_s2 + $0x30] ss:$12 sps:$4 sm:$0xff]  }
 0x50a   :  { %v2003_v24 = vpop.eup %2002 }
 0x50b   :  { %2004 = vrcp.f32 %v1104_v13  ;;  %v1105_v43 = vadd.f32 1.0, %v2003_v24  ;;  %v2056_v13 = vld [vmem:[%s2761_s2 + $0x1c] ss:$12 sps:$4 sm:$0xff]   ;;  %v2058_v24 = vld [vmem:[%s2761_s2 + $0x4] ss:$12 sps:$4 sm:$0xff]  }
 0x518   :  { %v2005_v3 = vpop.eup %2004 }
 0x519   :  { %v1111_v22 = vmul.f32 %v2005_v3, %v1110_v37 }
 0x51b   :  { %v1112_v17 = vadd.f32 %v1111_v22, %v2410_v56 }
 0x51d   :  { %2006 = vtanh.f32 %v1112_v17 }
 0x51e   :  { %2008 = vrcp.f32 %v1105_v43 }
 0x52a   :  { %v2007_v53 = vpop.eup %2006 }
 0x52b   :  { %v1114_v15 = vsub.f32 %v2572_v57, %v2007_v53  ;;  %v2009_v8 = vpop.eup %2008 }
 0x52d   :  { %v1115_v31 = vmul.f32 %v2009_v8, %v1114_v15 }
 0x52f   :  { %v2621_v58 = vadd.f32 %v2007_v53, %v1115_v31 }
 0x531   :  { %v1125_v4 = vpack.c.bf16 %v2621_v58, %v2621_v58 }
 0x533   :  { %1159 = vmatmul.mubr.bf16.vlgmr.msra.gmra.mxu0 %v1125_v4  ;;  %1845 = vmatmul.mubr.bf16.vlgmr.msra.gmra.mxu1 %v1125_v4 }
 0x534   :  { %1238 = vmatpush1.bf16.msra.mxu0 %v2175_v26  ;;  %1849 = vmatpush3.bf16.msra.mxu1 %v2217_v34  ;;  %v2040_v26 = vld [vmem:[%s2761_s2 + $0xac] ss:$12 sps:$4 sm:$0xff]  }
 0x535   :  { %1239 = vmatprep.subr.bf16.mxu0 %v2181_v27  ;;  %1850 = vmatprep.subr.bf16.mxu1 %v2773_v6 }
 0x536   :  { %1269 = vmatprep.mubr.bf16.mxu0 %v2774_v14  ;;  %1864 = vmatprep.mubr.msk.bf16.mxu1 %vm2062_vm0, %v2773_v6 }
 0x538   :  { %1240 = vmatpush1.bf16.msra.mxu0 %v2190_v29  ;;  %1851 = vmatpush3.bf16.msra.mxu1 %v2240_v39 }
 0x539   :  { %1241 = vmatprep.subr.bf16.mxu0 %v2197_v30  ;;  %1852 = vmatprep.subr.bf16.mxu1 %v2773_v6 }
 0x53c   :  { %1242 = vmatpush1.bf16.msra.mxu0 %v2206_v32  ;;  %1853 = vmatpush3.bf16.msra.mxu1 %v2259_v42 }
 0x53d   :  { %1243 = vmatprep.subr.bf16.mxu0 %v2212_v33  ;;  %1854 = vmatprep.subr.bf16.mxu1 %v2773_v6 }
 0x540   :  { %1244 = vmatpush1.bf16.msra.mxu0 %v2224_v36  ;;  %1855 = vmatpush3.bf16.msra.mxu1 %v2282_v46 }
 0x541   :  { %1245 = vmatprep.subr.bf16.mxu0 %v2234_v38  ;;  %1856 = vmatprep.subr.bf16.mxu1 %v2773_v6 }
 0x544   :  { %1246 = vmatpush1.bf16.msra.mxu0 %v2247_v40  ;;  %1857 = vmatpush3.bf16.msra.mxu1 %v2303_v49 }
 0x545   :  { %1247 = vmatprep.subr.bf16.mxu0 %v2253_v41  ;;  %1858 = vmatprep.subr.bf16.mxu1 %v2773_v6 }
 0x548   :  { %1248 = vmatpush1.bf16.msra.mxu0 %v2269_v44  ;;  %1859 = vmatpush3.bf16.msra.mxu1 %v2318_v51 }
 0x549   :  { %1249 = vmatprep.subr.bf16.mxu0 %v2276_v45  ;;  %1860 = vmatprep.subr.bf16.mxu1 %v2773_v6 }
 0x54c   :  { %1250 = vmatpush1.bf16.msra.mxu0 %v2291_v47  ;;  %1861 = vmatpush3.bf16.msra.mxu1 %v2327_v52 }
 0x54d   :  { %1251 = vmatprep.subr.bf16.mxu0 %v2297_v48  ;;  %1862 = vmatprep.subr.bf16.mxu1 %v2773_v6 }
 0x550   :  { %1252 = vmatpush1.bf16.msra.mxu0 %v2310_v50  ;;  %1863 = vmatpush3.bf16.msra.mxu1 %v2337_v54 }
 0x551   :  { %1348 = vmatprep.subr.bf16.mxu0 %v2040_v26  ;;  %1868 = vmatprep.subr.bf16.mxu1 %v2773_v6 }
 0x5f3   :  { %v1160_v27 = vpop.f32.mrf.mxu0  ;;  %v1201_v29 = vpop.f32.mrf.mxu1 }
 0x5f4   :  { %v1207_v30 = vadd.f32 %v1160_v27, %v2407_v55  ;;  %v1221_v47 = vadd.f32 %v2431_v59, %v1201_v29 }
 0x5f5   :  { %v1162_v32 = vpop.f32.mrf.mxu0  ;;  %v1846_v33 = vpop.f32.mrf.mxu1 }
 0x5f6   :  { %v1575_v34 = vmul.f32 -1.442695, %v1207_v30  ;;  %v1208_v41 = vadd.f32 %v1162_v32, %v2412_v60  ;;  %v2776_v32 = vld [vmem:[#allocation5_spill] sm:$0xff] }
 0x5f7   :  { %v1164_v36 = vpop.f32.mrf.mxu0  ;;  %v1204_v38 = vpop.f32.mrf.mxu1 }
 0x5f8   :  { %2010 = vpow2.f32 %v1575_v34  ;;  %v1576_v42 = vmul.f32 -1.442695, %v1208_v41 }
 0x5f9   :  { %v1165_v39 = vpop.f32.mrf.mxu0  ;;  %v1847_v40 = vpop.f32.mrf.mxu1 }
 0x5fa   :  { %2012 = vpow2.f32 %v1576_v42 }
 0x605   :  { %v2011_v44 = vpop.eup %2010 }
 0x606   :  { %v1215_v45 = vadd.f32 1.0, %v2011_v44 }
 0x607   :  { %v2013_v46 = vpop.eup %2012 }
 0x608   :  { %2014 = vrcp.f32 %v1215_v45  ;;  %v1216_v56 = vadd.f32 1.0, %v2013_v46  ;;  %v2777_v46 = vld [vmem:[#allocation8_spill] sm:$0xff] }
 0x615   :  { %v2015_v48 = vpop.eup %2014 }
 0x616   :  { %v1222_v50 = vmul.f32 %v2015_v48, %v1221_v47 }
 0x618   :  { %v1223_v55 = vadd.f32 %v1222_v50, %v2420_v9  ;;  %v2041_v9 = vld [vmem:[%s2761_s2 + $0xa8] ss:$12 sps:$4 sm:$0xff]  }
 0x61a   :  { %2016 = vtanh.f32 %v1223_v55 }
 0x61b   :  { %2018 = vrcp.f32 %v1216_v56 }
 0x627   :  { %v2017_v5 = vpop.eup %2016 }
 0x628   :  { %v1225_v10 = vsub.f32 %v2621_v58, %v2017_v5  ;;  %v2019_v18 = vpop.eup %2018 }
 0x62a   :  { %v1226_v60 = vmul.f32 %v2019_v18, %v1225_v10 }
 0x62c   :  { %v2667_v57 = vadd.f32 %v2017_v5, %v1226_v60 }
 0x62e   :  { %v1236_v11 = vpack.c.bf16 %v2667_v57, %v2667_v57  ;;  %v1610_v16 = vpack.c.bf16 %v2667_v57, %v2621_v58 }
 0x630   :  { %1270 = vmatmul.mubr.bf16.vlgmr.msra.gmra.mxu0 %v1236_v11  ;;  %1618 = vst [vmem:[%s2764_s5 + $0x10] sm:$0xff] %v1610_v16   ;;  %1865 = vmatmul.mubr.bf16.vlgmr.msra.gmra.mxu1 %v1236_v11 }
 0x631   :  { %1349 = vmatpush1.bf16.msra.mxu0 %v2041_v9  ;;  %1869 = vmatpush3.bf16.msra.mxu1 %v2042_v19 }
 0x632   :  { %1350 = vmatprep.subr.bf16.mxu0 %v2043_v23  ;;  %1870 = vmatprep.subr.bf16.mxu1 %v2773_v6 }
 0x633   :  { %1380 = vmatprep.mubr.bf16.mxu0 %v2774_v14  ;;  %1884 = vmatprep.mubr.msk.bf16.mxu1 %vm2062_vm0, %v2773_v6  ;;  %v2047_v14 = vld [vmem:[%s2761_s2 + $0x78] ss:$12 sps:$4 sm:$0xff]  }
 0x635   :  { %1351 = vmatpush1.bf16.msra.mxu0 %v2044_v12  ;;  %1871 = vmatpush3.bf16.msra.mxu1 %v2045_v0  ;;  %v2778_v0 = vld [vmem:[#allocation6_spill] sm:$0xff] }
 0x636   :  { %1352 = vmatprep.subr.bf16.mxu0 %v2046_v28  ;;  %1872 = vmatprep.subr.bf16.mxu1 %v2773_v6 }
 0x639   :  { %1353 = vmatpush1.bf16.msra.mxu0 %v2047_v14  ;;  %1873 = vmatpush3.bf16.msra.mxu1 %v2048_v62 }
 0x63a   :  { %1354 = vmatprep.subr.bf16.mxu0 %v2049_v20  ;;  %1874 = vmatprep.subr.bf16.mxu1 %v2773_v6 }
 0x63d   :  { %1355 = vmatpush1.bf16.msra.mxu0 %v2050_v21  ;;  %1875 = vmatpush3.bf16.msra.mxu1 %v2051_v61 }
 0x63e   :  { %1356 = vmatprep.subr.bf16.mxu0 %v2052_v1  ;;  %1876 = vmatprep.subr.bf16.mxu1 %v2773_v6 }
 0x641   :  { %1357 = vmatpush1.bf16.msra.mxu0 %v2053_v2  ;;  %1877 = vmatpush3.bf16.msra.mxu1 %v2303_v49  ;;  %v2057_v49 = vld [vmem:[%s2761_s2 + $0x18] ss:$12 sps:$4 sm:$0xff]  }
 0x642   :  { %1358 = vmatprep.subr.bf16.mxu0 %v2054_v63  ;;  %1878 = vmatprep.subr.bf16.mxu1 %v2773_v6 }
 0x645   :  { %1359 = vmatpush1.bf16.msra.mxu0 %v2055_v35  ;;  %1879 = vmatpush3.bf16.msra.mxu1 %v2318_v51  ;;  %v2059_v51 = vld [vmem:[%s2761_s2] ss:$12 sps:$4 sm:$0xff]  }
 0x646   :  { %1360 = vmatprep.subr.bf16.mxu0 %v2056_v13  ;;  %1880 = vmatprep.subr.bf16.mxu1 %v2773_v6 }
 0x649   :  { %1361 = vmatpush1.bf16.msra.mxu0 %v2057_v49  ;;  %1881 = vmatpush3.bf16.msra.mxu1 %v2327_v52 }
 0x64a   :  { %1362 = vmatprep.subr.bf16.mxu0 %v2058_v24  ;;  %1882 = vmatprep.subr.bf16.mxu1 %v2773_v6  ;;  %v2775_v6 = vld [vmem:[#allocation7_spill] sm:$0xff] }
 0x64d   :  { %1363 = vmatpush1.bf16.msra.mxu0 %v2059_v51  ;;  %1883 = vmatpush3.bf16.msra.mxu1 %v2337_v54 }
 0x6f0   :  { %v1271_v37 = vpop.f32.mrf.mxu0  ;;  %v1312_v3 = vpop.f32.mrf.mxu1 }
 0x6f1   :  { %v1318_v22 = vadd.f32 %v1271_v37, %v2417_v7  ;;  %v1332_v29 = vadd.f32 %v2431_v59, %v1312_v3 }
 0x6f2   :  { %v1273_v17 = vpop.f32.mrf.mxu0  ;;  %v1866_v52 = vpop.f32.mrf.mxu1 }
 0x6f3   :  { %v1577_v43 = vmul.f32 -1.442695, %v1318_v22  ;;  %v1319_v58 = vadd.f32 %v1273_v17, %v2775_v6 }
 0x6f4   :  { %v1275_v53 = vpop.f32.mrf.mxu0  ;;  %v1315_v15 = vpop.f32.mrf.mxu1 }
 0x6f5   :  { %2020 = vpow2.f32 %v1577_v43  ;;  %v1578_v4 = vmul.f32 -1.442695, %v1319_v58 }
 0x6f6   :  { %v1276_v8 = vpop.f32.mrf.mxu0  ;;  %v1867_v31 = vpop.f32.mrf.mxu1 }
 0x6f7   :  { %2022 = vpow2.f32 %v1578_v4 }
 0x702   :  { %v2021_v26 = vpop.eup %2020 }
 0x703   :  { %v1326_v27 = vadd.f32 1.0, %v2021_v26 }
 0x704   :  { %v2023_v54 = vpop.eup %2022 }
 0x705   :  { %2024 = vrcp.f32 %v1326_v27  ;;  %v1327_v34 = vadd.f32 1.0, %v2023_v54 }
 0x712   :  { %v2025_v30 = vpop.eup %2024 }
 0x713   :  { %v1333_v7 = vmul.f32 %v2025_v30, %v1332_v29 }
 0x715   :  { %v1334_v33 = vadd.f32 %v1333_v7, %v2776_v32 }
 0x717   :  { %2026 = vtanh.f32 %v1334_v33 }
 0x718   :  { %2028 = vrcp.f32 %v1327_v34 }
 0x724   :  { %v2027_v36 = vpop.eup %2026 }
 0x725   :  { %v1336_v38 = vsub.f32 %v2667_v57, %v2027_v36  ;;  %v2029_v39 = vpop.eup %2028 }
 0x727   :  { %v1337_v40 = vmul.f32 %v2029_v39, %v1336_v38 }
 0x729   :  { %v1338_v41 = vadd.f32 %v2027_v36, %v1337_v40 }
 0x72b   :  { %v1347_v42 = vpack.c.bf16 %v1338_v41, %v1338_v41 }
 0x72d   :  { %1381 = vmatmul.mubr.bf16.vlgmr.msra.gmra.mxu0 %v1347_v42  ;;  %1885 = vmatmul.mubr.bf16.vlgmr.msra.gmra.mxu1 %v1347_v42 }
 0x7ed   :  { %v1382_v44 = vpop.f32.mrf.mxu0  ;;  %v1423_v45 = vpop.f32.mrf.mxu1 }
 0x7ee   :  { %v1429_v47 = vadd.f32 %v1382_v44, %v2777_v46  ;;  %v1443_v19 = vadd.f32 %v2431_v59, %v1423_v45 }
 0x7ef   :  { %v1384_v48 = vpop.f32.mrf.mxu0  ;;  %v1886_v50 = vpop.f32.mrf.mxu1 }
 0x7f0   :  { %v1579_v55 = vmul.f32 -1.442695, %v1429_v47  ;;  %v1430_v60 = vadd.f32 %v1384_v48, %v2426_v25 }
 0x7f1   :  { %v1386_v56 = vpop.f32.mrf.mxu0  ;;  %v1426_v5 = vpop.f32.mrf.mxu1 }
 0x7f2   :  { %2030 = vpow2.f32 %v1579_v55  ;;  %v1580_v57 = vmul.f32 -1.442695, %v1430_v60 }
 0x7f3   :  { %v1387_v10 = vpop.f32.mrf.mxu0  ;;  %v1887_v18 = vpop.f32.mrf.mxu1 }
 0x7f4   :  { %2032 = vpow2.f32 %v1580_v57 }
 0x7ff   :  { %v2031_v11 = vpop.eup %2030 }
 0x800   :  { %v1437_v16 = vadd.f32 1.0, %v2031_v11 }
 0x801   :  { %v2033_v9 = vpop.eup %2032 }
 0x802   :  { %2034 = vrcp.f32 %v1437_v16  ;;  %v1438_v14 = vadd.f32 1.0, %v2033_v9 }
 0x80f   :  { %v2035_v23 = vpop.eup %2034 }
 0x810   :  { %v1444_v12 = vmul.f32 %v2035_v23, %v1443_v19 }
 0x812   :  { %v1445_v28 = vadd.f32 %v1444_v12, %v2778_v0 }
 0x814   :  { %2036 = vtanh.f32 %v1445_v28 }
 0x815   :  { %2038 = vrcp.f32 %v1438_v14 }
 0x821   :  { %v2037_v62 = vpop.eup %2036 }
 0x822   :  { %v1447_v20 = vsub.f32 %v1338_v41, %v2037_v62  ;;  %v2039_v21 = vpop.eup %2038 }
 0x824   :  { %v1448_v61 = vmul.f32 %v2039_v21, %v1447_v20 }
 0x826   :  { %v1449_v25 = vadd.f32 %v2037_v62, %v1448_v61 }
 0x828   :  { %v1615_v1 = vpack.c.bf16 %v1449_v25, %v1338_v41 }
 0x82a   :  { %1619 = vst [vmem:[%s2764_s5 + $0x18] sm:$0xff] %v1615_v1  }

</bundles_post_ra>
